<compile_context>
chip_gen: v7x
topology: tpu7x:2x2x1
jax: 0.10.0
libtpu: 0.0.40
codegen_flags: <defaults>
</compile_context>

<pallas_src>
import functools

import jax
import jax.numpy as jnp
from jax.experimental import pallas as pl
from jax.experimental.pallas import tpu as pltpu


# ---------------------------------------------------------------------------
# Kernel
#   x_ref  : (Bb, C, H*W)        input block (native dtype, lane-dense)
#   w1_ref : (C, Cr)             se[0] weight transposed (y = p @ w1)
#   w2_ref : (Cr, C)             se[2] weight transposed (y = h @ w2)
#   wv_ref : (2*K*K + 1, H*W)    per-tap masked conv weights (+ bias row), f32
#   o_ref  : (Bb, C, H*W)        output block
# ---------------------------------------------------------------------------
def cbam_kernel(x_ref, w1_ref, w2_ref, wv_ref, o_ref, *, width, ksize):
    f32 = jnp.float32
    W, K = width, ksize
    P = K // 2
    Bb, C, HW = x_ref.shape

    x = x_ref[...]                                             # (Bb, C, HW)

    # ---------------- Channel attention (2-D SE, channels on lanes) ----------------
    xm = jnp.max(x, axis=2).astype(f32)                        # (Bb, C) global max pool
    xa = jnp.sum(x, axis=2, dtype=f32) * (1.0 / HW)            # (Bb, C) global avg pool
    p = jnp.concatenate([xm, xa], axis=0)                      # (2*Bb, C): max/avg fused
    h = jnp.maximum(
        jnp.dot(p, w1_ref[...], preferred_element_type=f32), 0.0)   # (2Bb, Cr)
    y = jnp.dot(h, w2_ref[...], preferred_element_type=f32)         # (2Bb, C)
    ca = jax.nn.sigmoid(y[:Bb] + y[Bb:])                       # (Bb, C) f32

    out = x * ca[:, :, None].astype(x.dtype)                   # x * ChannelAttention(x)

    # ---------------- Spatial attention ----------------
    # channel max / mean: C is the sublane axis of the lane-dense block -> cheap.
    mmax = jnp.max(out, axis=1).astype(f32)                    # (Bb, HW)
    mavg = jnp.sum(out, axis=1, dtype=f32) * (1.0 / C)         # (Bb, HW)

    # 7x7 "same" conv in the flat lane layout: each (ki, kj) tap is a static lane
    # shift of the maps (zero-padded once) times a host-precomputed per-lane weight
    # row (kernel value * boundary mask).  Bias is folded in as the last weight row.
    maxd = P * W + P
    zpad = jnp.zeros((Bb, maxd), f32)
    mmax_p = jnp.concatenate([zpad, mmax, zpad], axis=1)       # (Bb, HW + 2*maxd)
    mavg_p = jnp.concatenate([zpad, mavg, zpad], axis=1)

    acc = jnp.zeros((Bb, HW), f32) + wv_ref[2 * K * K]         # start from the bias row
    for ki in range(K):
        for kj in range(K):
            d = (ki - P) * W + (kj - P)                        # flat lane offset of tap
            s = maxd + d
            i0 = ki * K + kj
            acc = acc + (mmax_p[:, s:s + HW] * wv_ref[i0]
                         + mavg_p[:, s:s + HW] * wv_ref[K * K + i0])
    sattn = jax.nn.sigmoid(acc)                                # (Bb, HW) f32

    # out * SpatialAttention(out) + residual  — single lane-dense full-block store.
    o_ref[...] = (out * sattn[:, None, :].astype(x.dtype) + x_ref[...]).astype(o_ref.dtype)


# ---------------------------------------------------------------------------
# Wrapper: NCHW in / NCHW out, only free view-reshapes on the host side.
# ---------------------------------------------------------------------------
def _vmem_capacity_bytes():
    try:
        return int(pltpu.get_tpu_info().vmem_capacity_bytes)
    except Exception:
        return 64 * 1024 * 1024                                # conservative (v7x per-TC)


def _pick_batch_block(batch, channels, hw, dtype, vmem_cap):
    """Largest batch sub-block whose PADDED VMEM footprint fits ~40% of VMEM while
    keeping the grid extent >= min(batch, 4) (>= 2 pipelined steps per v7x core)."""
    itemsize = jnp.dtype(dtype).itemsize
    sub = 8 * max(1, 4 // itemsize)                            # sublane multiple for dtype
    rows = -(-channels // sub) * sub
    lanes = -(-hw // 128) * 128
    img = rows * lanes * itemsize                              # padded activation image
    img32 = rows * lanes * 4                                   # f32-sized temporaries
    per_img = 4 * img + 3 * img32                              # dbl-buffered in+out + temps
    budget = int(vmem_cap * 0.4)
    min_steps = max(1, min(batch, 4))
    best = 1
    for d in range(1, batch + 1):
        if batch % d or batch // d < min_steps:
            continue
        if d * per_img <= budget:
            best = d
    return best


def cbam_forward(x_nchw, w1_oi, w2_oi, wsp, bsp, *, batch_block=None):
    """CBAMBlock forward.

    x_nchw: (B, C, H, W); w1_oi: (C//r, C) se[0] weight; w2_oi: (C, C//r) se[2] weight;
    wsp: (2, K, K) spatial conv weight; bsp: scalar spatial conv bias.
    """
    B, C, H, W = x_nchw.shape
    Cr = w1_oi.shape[0]
    K = wsp.shape[-1]
    P = K // 2
    HW = H * W

    # --- tiny, fully traced weight prep (no activation-sized host work) ---
    w1_r = jnp.asarray(w1_oi, jnp.float32).T                   # (C, Cr)
    w2_r = jnp.asarray(w2_oi, jnp.float32).T                   # (Cr, C)

    # Per-tap, per-lane masked conv weights:
    #   wv[m, ki, kj, l] = wsp[m, ki, kj] if the (ki, kj) tap at flat position l stays
    #   inside the image (zero "same" padding), else 0.   (+ one bias row appended)
    wsp_f = jnp.asarray(wsp, jnp.float32)                      # (2, K, K)
    ll = jnp.arange(HW)
    hh = (ll // W)[None, None, :]                              # (1, 1, HW)
    ww = (ll % W)[None, None, :]
    ki_g = jnp.arange(K)[:, None, None]                        # (K, 1, 1)
    kj_g = jnp.arange(K)[None, :, None]                        # (1, K, 1)
    valid = ((hh + ki_g - P >= 0) & (hh + ki_g - P < H) &
             (ww + kj_g - P >= 0) & (ww + kj_g - P < W))       # (K, K, HW)
    wv = jnp.where(valid[None], wsp_f[:, :, :, None], 0.0)     # (2, K, K, HW)
    wv = wv.reshape(2 * K * K, HW)
    bias_row = jnp.broadcast_to(jnp.asarray(bsp, jnp.float32), (1, HW))
    wvb = jnp.concatenate([wv, bias_row], axis=0)              # (2*K*K + 1, HW)

    vmem_cap = _vmem_capacity_bytes()
    if batch_block is None:
        batch_block = _pick_batch_block(B, C, HW, x_nchw.dtype, vmem_cap)
    Bb = batch_block
    assert B % Bb == 0

    x_flat = x_nchw.reshape(B, C, HW)                          # free view-reshape (lane-dense)
    kernel = functools.partial(cbam_kernel, width=W, ksize=K)

    out_flat = pl.pallas_call(
        kernel,
        out_shape=jax.ShapeDtypeStruct((B, C, HW), x_nchw.dtype),
        grid_spec=pltpu.PrefetchScalarGridSpec(
            num_scalar_prefetch=0,
            grid=(B // Bb,),
            in_specs=[
                pl.BlockSpec((Bb, C, HW), lambda b: (b, 0, 0)),
                pl.BlockSpec((C, Cr), lambda b: (0, 0)),
                pl.BlockSpec((Cr, C), lambda b: (0, 0)),
                pl.BlockSpec((2 * K * K + 1, HW), lambda b: (0, 0)),
            ],
            out_specs=pl.BlockSpec((Bb, C, HW), lambda b: (b, 0, 0)),
        ),
        compiler_params=pltpu.CompilerParams(
            dimension_semantics=("parallel",),
            vmem_limit_bytes=min(int(vmem_cap * 3 // 4), 96 * 1024 * 1024),
        ),
    )(x_flat, w1_r, w2_r, wvb)

    return out_flat.reshape(B, C, H, W)


# ---------------------------------------------------------------------------
# Pure-JAX reference (mirrors the PyTorch forward) for a correctness check
# ---------------------------------------------------------------------------
def ref_cbam(x, w1_oi, w2_oi, wsp, bsp):
    maxp = jnp.max(x, axis=(2, 3))
    avgp = jnp.mean(x, axis=(2, 3))

    def se(v):
        return jnp.maximum(v @ w1_oi.T, 0.0) @ w2_oi.T

    ca = jax.nn.sigmoid(se(maxp) + se(avgp))
    out = x * ca[:, :, None, None]

    mmap = jnp.max(out, axis=1, keepdims=True)
    amap = jnp.mean(out, axis=1, keepdims=True)
    inp = jnp.concatenate([mmap, amap], axis=1)
    P = wsp.shape[-1] // 2
    conv = jax.lax.conv_general_dilated(
        inp, wsp[None], window_strides=(1, 1), padding=((P, P), (P, P)),
        dimension_numbers=("NCHW", "OIHW", "NCHW")) + bsp
    sattn = jax.nn.sigmoid(conv)
    return out * sattn + x


if __name__ == "__main__":
    # Small shapes consistent with CBAMBlock(channel=C, reduction=8, kernel_size=7)
    B, C, H, W = 2, 16, 16, 16
    reduction, K = 8, 7
    Cr = C // reduction

    kx, k1, k2, k3 = jax.random.split(jax.random.PRNGKey(0), 4)
    x = jax.random.normal(kx, (B, C, H, W), jnp.float32)
    w1_oi = jax.random.normal(k1, (Cr, C), jnp.float32) * 0.1   # se[0]: Conv2d(C, C//r, 1)
    w2_oi = jax.random.normal(k2, (C, Cr), jnp.float32) * 0.1   # se[2]: Conv2d(C//r, C, 1)
    wsp = jax.random.normal(k3, (2, K, K), jnp.float32) * 0.05  # SpatialAttention conv weight
    bsp = 0.1                                                   # SpatialAttention conv bias

    cbam_jit = jax.jit(cbam_forward)          # weights stay traced: no per-value recompiles
    y = jax.block_until_ready(cbam_jit(x, w1_oi, w2_oi, wsp, bsp))

    y_ref = ref_cbam(x, w1_oi, w2_oi, wsp, bsp)
    assert y.shape == (B, C, H, W)
    assert bool(jnp.allclose(y, y_ref, atol=2e-3, rtol=2e-3)), "mismatch vs reference"

    print("KERNEL_OK")
</pallas_src>

<mosaic_0001>
module attributes {stable_mosaic.version = 11 : i64} {
  func.func @cbam_kernel(%arg0: i32, %arg1: memref<1x16x256xf32, #tpu.memory_space<vmem>>, %arg2: memref<16x2xf32, #tpu.memory_space<vmem>>, %arg3: memref<2x16xf32, #tpu.memory_space<vmem>>, %arg4: memref<99x256xf32, #tpu.memory_space<vmem>>, %arg5: memref<1x16x256xf32, #tpu.memory_space<vmem>>) attributes {dimension_semantics = [#tpu.dimension_semantics<parallel>], iteration_bounds = array<i64: 2>, scalar_prefetch = 0 : i64, scratch_operands = 0 : i64, tpu.core_type = #tpu.core_type<tc>, window_params = [{transform_indices = @transform_0, window_bounds = array<i64: 1, 16, 256>}, {pipeline_mode = #tpu.pipeline_mode<synchronous>, transform_indices = @transform_1, window_bounds = array<i64: 16, 2>}, {pipeline_mode = #tpu.pipeline_mode<synchronous>, transform_indices = @transform_2, window_bounds = array<i64: 2, 16>}, {pipeline_mode = #tpu.pipeline_mode<synchronous>, transform_indices = @transform_3, window_bounds = array<i64: 99, 256>}, {transform_indices = @transform_4, window_bounds = array<i64: 1, 16, 256>}]} {
    %c0 = arith.constant 0 : index
    %c0_0 = arith.constant 0 : index
    %c0_1 = arith.constant 0 : index
    %0 = vector.load %arg1[%c0, %c0_0, %c0_1] : memref<1x16x256xf32, #tpu.memory_space<vmem>>, vector<1x16x256xf32>
    %cst = arith.constant dense<0xFF800000> : vector<1x16xf32>
    %1 = vector.multi_reduction <maximumf>, %0, %cst [2] : vector<1x16x256xf32> to vector<1x16xf32>
    %cst_2 = arith.constant dense<0.000000e+00> : vector<1x16xf32>
    %2 = vector.multi_reduction <add>, %0, %cst_2 [2] : vector<1x16x256xf32> to vector<1x16xf32>
    %cst_3 = arith.constant 3.906250e-03 : f32
    %3 = vector.broadcast %cst_3 : f32 to vector<1x16xf32>
    %4 = arith.mulf %2, %3 : vector<1x16xf32>
    %5 = tpu.concatenate %1, %4 in 0 : vector<1x16xf32>, vector<1x16xf32> -> vector<2x16xf32>
    %c0_4 = arith.constant 0 : index
    %c0_5 = arith.constant 0 : index
    %6 = vector.load %arg2[%c0_4, %c0_5] : memref<16x2xf32, #tpu.memory_space<vmem>>, vector<16x2xf32>
    %cst_6 = arith.constant dense<0.000000e+00> : vector<2x2xf32>
    %7 = tpu.matmul %5, %6, %cst_6 {dimension_numbers = #tpu.dot_dimension_numbers<[1], [0], [0], [1], [0, 0, 1, 1], [], []>} : vector<2x16xf32>, vector<16x2xf32>, vector<2x2xf32> -> vector<2x2xf32>
    %cst_7 = arith.constant 0.000000e+00 : f32
    %8 = vector.broadcast %cst_7 : f32 to vector<2x2xf32>
    %9 = arith.maximumf %7, %8 : vector<2x2xf32>
    %c0_8 = arith.constant 0 : index
    %c0_9 = arith.constant 0 : index
    %10 = vector.load %arg3[%c0_8, %c0_9] : memref<2x16xf32, #tpu.memory_space<vmem>>, vector<2x16xf32>
    %cst_10 = arith.constant dense<0.000000e+00> : vector<2x16xf32>
    %11 = tpu.matmul %9, %10, %cst_10 {dimension_numbers = #tpu.dot_dimension_numbers<[1], [0], [0], [1], [0, 0, 1, 1], [], []>} : vector<2x2xf32>, vector<2x16xf32>, vector<2x16xf32> -> vector<2x16xf32>
    %12 = vector.extract_strided_slice %11 {offsets = [0, 0], sizes = [1, 16], strides = [1, 1]} : vector<2x16xf32> to vector<1x16xf32>
    %13 = vector.extract_strided_slice %11 {offsets = [1, 0], sizes = [1, 16], strides = [1, 1]} : vector<2x16xf32> to vector<1x16xf32>
    %14 = arith.addf %12, %13 : vector<1x16xf32>
    %15 = arith.negf %14 : vector<1x16xf32>
    %16 = math.exp %15 : vector<1x16xf32>
    %cst_11 = arith.constant 1.000000e+00 : f32
    %17 = vector.broadcast %cst_11 : f32 to vector<1x16xf32>
    %18 = arith.addf %17, %16 : vector<1x16xf32>
    %19 = arith.divf %17, %18 : vector<1x16xf32>
    %20 = vector.shape_cast %19 : vector<1x16xf32> to vector<1x16x1xf32>
    %21 = vector.broadcast %20 : vector<1x16x1xf32> to vector<1x16x256xf32>
    %22 = arith.mulf %0, %21 : vector<1x16x256xf32>
    %cst_12 = arith.constant dense<0xFF800000> : vector<1x256xf32>
    %23 = vector.multi_reduction <maximumf>, %22, %cst_12 [1] : vector<1x16x256xf32> to vector<1x256xf32>
    %cst_13 = arith.constant dense<0.000000e+00> : vector<1x256xf32>
    %24 = vector.multi_reduction <add>, %22, %cst_13 [1] : vector<1x16x256xf32> to vector<1x256xf32>
    %cst_14 = arith.constant 6.250000e-02 : f32
    %25 = vector.broadcast %cst_14 : f32 to vector<1x256xf32>
    %26 = arith.mulf %24, %25 : vector<1x256xf32>
    %cst_15 = arith.constant 0.000000e+00 : f32
    %27 = vector.broadcast %cst_15 : f32 to vector<1x51xf32>
    %28 = tpu.concatenate %27, %23, %27 in 1 : vector<1x51xf32>, vector<1x256xf32>, vector<1x51xf32> -> vector<1x358xf32>
    %29 = tpu.concatenate %27, %26, %27 in 1 : vector<1x51xf32>, vector<1x256xf32>, vector<1x51xf32> -> vector<1x358xf32>
    %cst_16 = arith.constant 0.000000e+00 : f32
    %30 = vector.broadcast %cst_16 : f32 to vector<1x256xf32>
    %c98 = arith.constant 98 : index
    %c0_17 = arith.constant 0 : index
    %31 = vector.load %arg4[%c98, %c0_17] : memref<99x256xf32, #tpu.memory_space<vmem>>, vector<1x256xf32>
    %32 = vector.shape_cast %31 : vector<1x256xf32> to vector<256xf32>
    %33 = vector.shape_cast %32 : vector<256xf32> to vector<1x256xf32>
    %34 = arith.addf %30, %33 : vector<1x256xf32>
    %35 = vector.extract_strided_slice %28 {offsets = [0, 0], sizes = [1, 256], strides = [1, 1]} : vector<1x358xf32> to vector<1x256xf32>
    %c0_18 = arith.constant 0 : index
    %c0_19 = arith.constant 0 : index
    %36 = vector.load %arg4[%c0_18, %c0_19] : memref<99x256xf32, #tpu.memory_space<vmem>>, vector<1x256xf32>
    %37 = vector.shape_cast %36 : vector<1x256xf32> to vector<256xf32>
    %38 = vector.shape_cast %37 : vector<256xf32> to vector<1x256xf32>
    %39 = arith.mulf %35, %38 : vector<1x256xf32>
    %40 = vector.extract_strided_slice %29 {offsets = [0, 0], sizes = [1, 256], strides = [1, 1]} : vector<1x358xf32> to vector<1x256xf32>
    %c49 = arith.constant 49 : index
    %c0_20 = arith.constant 0 : index
    %41 = vector.load %arg4[%c49, %c0_20] : memref<99x256xf32, #tpu.memory_space<vmem>>, vector<1x256xf32>
    %42 = vector.shape_cast %41 : vector<1x256xf32> to vector<256xf32>
    %43 = vector.shape_cast %42 : vector<256xf32> to vector<1x256xf32>
    %44 = arith.mulf %40, %43 : vector<1x256xf32>
    %45 = arith.addf %39, %44 : vector<1x256xf32>
    %46 = arith.addf %34, %45 : vector<1x256xf32>
    %47 = vector.extract_strided_slice %28 {offsets = [0, 1], sizes = [1, 256], strides = [1, 1]} : vector<1x358xf32> to vector<1x256xf32>
    %c1 = arith.constant 1 : index
    %c0_21 = arith.constant 0 : index
    %48 = vector.load %arg4[%c1, %c0_21] : memref<99x256xf32, #tpu.memory_space<vmem>>, vector<1x256xf32>
    %49 = vector.shape_cast %48 : vector<1x256xf32> to vector<256xf32>
    %50 = vector.shape_cast %49 : vector<256xf32> to vector<1x256xf32>
    %51 = arith.mulf %47, %50 : vector<1x256xf32>
    %52 = vector.extract_strided_slice %29 {offsets = [0, 1], sizes = [1, 256], strides = [1, 1]} : vector<1x358xf32> to vector<1x256xf32>
    %c50 = arith.constant 50 : index
    %c0_22 = arith.constant 0 : index
    %53 = vector.load %arg4[%c50, %c0_22] : memref<99x256xf32, #tpu.memory_space<vmem>>, vector<1x256xf32>
    %54 = vector.shape_cast %53 : vector<1x256xf32> to vector<256xf32>
    %55 = vector.shape_cast %54 : vector<256xf32> to vector<1x256xf32>
    %56 = arith.mulf %52, %55 : vector<1x256xf32>
    %57 = arith.addf %51, %56 : vector<1x256xf32>
    %58 = arith.addf %46, %57 : vector<1x256xf32>
    %59 = vector.extract_strided_slice %28 {offsets = [0, 2], sizes = [1, 256], strides = [1, 1]} : vector<1x358xf32> to vector<1x256xf32>
    %c2 = arith.constant 2 : index
    %c0_23 = arith.constant 0 : index
    %60 = vector.load %arg4[%c2, %c0_23] : memref<99x256xf32, #tpu.memory_space<vmem>>, vector<1x256xf32>
    %61 = vector.shape_cast %60 : vector<1x256xf32> to vector<256xf32>
    %62 = vector.shape_cast %61 : vector<256xf32> to vector<1x256xf32>
    %63 = arith.mulf %59, %62 : vector<1x256xf32>
    %64 = vector.extract_strided_slice %29 {offsets = [0, 2], sizes = [1, 256], strides = [1, 1]} : vector<1x358xf32> to vector<1x256xf32>
    %c51 = arith.constant 51 : index
    %c0_24 = arith.constant 0 : index
    %65 = vector.load %arg4[%c51, %c0_24] : memref<99x256xf32, #tpu.memory_space<vmem>>, vector<1x256xf32>
    %66 = vector.shape_cast %65 : vector<1x256xf32> to vector<256xf32>
    %67 = vector.shape_cast %66 : vector<256xf32> to vector<1x256xf32>
    %68 = arith.mulf %64, %67 : vector<1x256xf32>
    %69 = arith.addf %63, %68 : vector<1x256xf32>
    %70 = arith.addf %58, %69 : vector<1x256xf32>
    %71 = vector.extract_strided_slice %28 {offsets = [0, 3], sizes = [1, 256], strides = [1, 1]} : vector<1x358xf32> to vector<1x256xf32>
    %c3 = arith.constant 3 : index
    %c0_25 = arith.constant 0 : index
    %72 = vector.load %arg4[%c3, %c0_25] : memref<99x256xf32, #tpu.memory_space<vmem>>, vector<1x256xf32>
    %73 = vector.shape_cast %72 : vector<1x256xf32> to vector<256xf32>
    %74 = vector.shape_cast %73 : vector<256xf32> to vector<1x256xf32>
    %75 = arith.mulf %71, %74 : vector<1x256xf32>
    %76 = vector.extract_strided_slice %29 {offsets = [0, 3], sizes = [1, 256], strides = [1, 1]} : vector<1x358xf32> to vector<1x256xf32>
    %c52 = arith.constant 52 : index
    %c0_26 = arith.constant 0 : index
    %77 = vector.load %arg4[%c52, %c0_26] : memref<99x256xf32, #tpu.memory_space<vmem>>, vector<1x256xf32>
    %78 = vector.shape_cast %77 : vector<1x256xf32> to vector<256xf32>
    %79 = vector.shape_cast %78 : vector<256xf32> to vector<1x256xf32>
    %80 = arith.mulf %76, %79 : vector<1x256xf32>
    %81 = arith.addf %75, %80 : vector<1x256xf32>
    %82 = arith.addf %70, %81 : vector<1x256xf32>
    %83 = vector.extract_strided_slice %28 {offsets = [0, 4], sizes = [1, 256], strides = [1, 1]} : vector<1x358xf32> to vector<1x256xf32>
    %c4 = arith.constant 4 : index
    %c0_27 = arith.constant 0 : index
    %84 = vector.load %arg4[%c4, %c0_27] : memref<99x256xf32, #tpu.memory_space<vmem>>, vector<1x256xf32>
    %85 = vector.shape_cast %84 : vector<1x256xf32> to vector<256xf32>
    %86 = vector.shape_cast %85 : vector<256xf32> to vector<1x256xf32>
    %87 = arith.mulf %83, %86 : vector<1x256xf32>
    %88 = vector.extract_strided_slice %29 {offsets = [0, 4], sizes = [1, 256], strides = [1, 1]} : vector<1x358xf32> to vector<1x256xf32>
    %c53 = arith.constant 53 : index
    %c0_28 = arith.constant 0 : index
    %89 = vector.load %arg4[%c53, %c0_28] : memref<99x256xf32, #tpu.memory_space<vmem>>, vector<1x256xf32>
    %90 = vector.shape_cast %89 : vector<1x256xf32> to vector<256xf32>
    %91 = vector.shape_cast %90 : vector<256xf32> to vector<1x256xf32>
    %92 = arith.mulf %88, %91 : vector<1x256xf32>
    %93 = arith.addf %87, %92 : vector<1x256xf32>
    %94 = arith.addf %82, %93 : vector<1x256xf32>
    %95 = vector.extract_strided_slice %28 {offsets = [0, 5], sizes = [1, 256], strides = [1, 1]} : vector<1x358xf32> to vector<1x256xf32>
    %c5 = arith.constant 5 : index
    %c0_29 = arith.constant 0 : index
    %96 = vector.load %arg4[%c5, %c0_29] : memref<99x256xf32, #tpu.memory_space<vmem>>, vector<1x256xf32>
    %97 = vector.shape_cast %96 : vector<1x256xf32> to vector<256xf32>
    %98 = vector.shape_cast %97 : vector<256xf32> to vector<1x256xf32>
    %99 = arith.mulf %95, %98 : vector<1x256xf32>
    %100 = vector.extract_strided_slice %29 {offsets = [0, 5], sizes = [1, 256], strides = [1, 1]} : vector<1x358xf32> to vector<1x256xf32>
    %c54 = arith.constant 54 : index
    %c0_30 = arith.constant 0 : index
    %101 = vector.load %arg4[%c54, %c0_30] : memref<99x256xf32, #tpu.memory_space<vmem>>, vector<1x256xf32>
    %102 = vector.shape_cast %101 : vector<1x256xf32> to vector<256xf32>
    %103 = vector.shape_cast %102 : vector<256xf32> to vector<1x256xf32>
    %104 = arith.mulf %100, %103 : vector<1x256xf32>
    %105 = arith.addf %99, %104 : vector<1x256xf32>
    %106 = arith.addf %94, %105 : vector<1x256xf32>
    %107 = vector.extract_strided_slice %28 {offsets = [0, 6], sizes = [1, 256], strides = [1, 1]} : vector<1x358xf32> to vector<1x256xf32>
    %c6 = arith.constant 6 : index
    %c0_31 = arith.constant 0 : index
    %108 = vector.load %arg4[%c6, %c0_31] : memref<99x256xf32, #tpu.memory_space<vmem>>, vector<1x256xf32>
    %109 = vector.shape_cast %108 : vector<1x256xf32> to vector<256xf32>
    %110 = vector.shape_cast %109 : vector<256xf32> to vector<1x256xf32>
    %111 = arith.mulf %107, %110 : vector<1x256xf32>
    %112 = vector.extract_strided_slice %29 {offsets = [0, 6], sizes = [1, 256], strides = [1, 1]} : vector<1x358xf32> to vector<1x256xf32>
    %c55 = arith.constant 55 : index
    %c0_32 = arith.constant 0 : index
    %113 = vector.load %arg4[%c55, %c0_32] : memref<99x256xf32, #tpu.memory_space<vmem>>, vector<1x256xf32>
    %114 = vector.shape_cast %113 : vector<1x256xf32> to vector<256xf32>
    %115 = vector.shape_cast %114 : vector<256xf32> to vector<1x256xf32>
    %116 = arith.mulf %112, %115 : vector<1x256xf32>
    %117 = arith.addf %111, %116 : vector<1x256xf32>
    %118 = arith.addf %106, %117 : vector<1x256xf32>
    %119 = vector.extract_strided_slice %28 {offsets = [0, 16], sizes = [1, 256], strides = [1, 1]} : vector<1x358xf32> to vector<1x256xf32>
    %c7 = arith.constant 7 : index
    %c0_33 = arith.constant 0 : index
    %120 = vector.load %arg4[%c7, %c0_33] : memref<99x256xf32, #tpu.memory_space<vmem>>, vector<1x256xf32>
    %121 = vector.shape_cast %120 : vector<1x256xf32> to vector<256xf32>
    %122 = vector.shape_cast %121 : vector<256xf32> to vector<1x256xf32>
    %123 = arith.mulf %119, %122 : vector<1x256xf32>
    %124 = vector.extract_strided_slice %29 {offsets = [0, 16], sizes = [1, 256], strides = [1, 1]} : vector<1x358xf32> to vector<1x256xf32>
    %c56 = arith.constant 56 : index
    %c0_34 = arith.constant 0 : index
    %125 = vector.load %arg4[%c56, %c0_34] : memref<99x256xf32, #tpu.memory_space<vmem>>, vector<1x256xf32>
    %126 = vector.shape_cast %125 : vector<1x256xf32> to vector<256xf32>
    %127 = vector.shape_cast %126 : vector<256xf32> to vector<1x256xf32>
    %128 = arith.mulf %124, %127 : vector<1x256xf32>
    %129 = arith.addf %123, %128 : vector<1x256xf32>
    %130 = arith.addf %118, %129 : vector<1x256xf32>
    %131 = vector.extract_strided_slice %28 {offsets = [0, 17], sizes = [1, 256], strides = [1, 1]} : vector<1x358xf32> to vector<1x256xf32>
    %c8 = arith.constant 8 : index
    %c0_35 = arith.constant 0 : index
    %132 = vector.load %arg4[%c8, %c0_35] : memref<99x256xf32, #tpu.memory_space<vmem>>, vector<1x256xf32>
    %133 = vector.shape_cast %132 : vector<1x256xf32> to vector<256xf32>
    %134 = vector.shape_cast %133 : vector<256xf32> to vector<1x256xf32>
    %135 = arith.mulf %131, %134 : vector<1x256xf32>
    %136 = vector.extract_strided_slice %29 {offsets = [0, 17], sizes = [1, 256], strides = [1, 1]} : vector<1x358xf32> to vector<1x256xf32>
    %c57 = arith.constant 57 : index
    %c0_36 = arith.constant 0 : index
    %137 = vector.load %arg4[%c57, %c0_36] : memref<99x256xf32, #tpu.memory_space<vmem>>, vector<1x256xf32>
    %138 = vector.shape_cast %137 : vector<1x256xf32> to vector<256xf32>
    %139 = vector.shape_cast %138 : vector<256xf32> to vector<1x256xf32>
    %140 = arith.mulf %136, %139 : vector<1x256xf32>
    %141 = arith.addf %135, %140 : vector<1x256xf32>
    %142 = arith.addf %130, %141 : vector<1x256xf32>
    %143 = vector.extract_strided_slice %28 {offsets = [0, 18], sizes = [1, 256], strides = [1, 1]} : vector<1x358xf32> to vector<1x256xf32>
    %c9 = arith.constant 9 : index
    %c0_37 = arith.constant 0 : index
    %144 = vector.load %arg4[%c9, %c0_37] : memref<99x256xf32, #tpu.memory_space<vmem>>, vector<1x256xf32>
    %145 = vector.shape_cast %144 : vector<1x256xf32> to vector<256xf32>
    %146 = vector.shape_cast %145 : vector<256xf32> to vector<1x256xf32>
    %147 = arith.mulf %143, %146 : vector<1x256xf32>
    %148 = vector.extract_strided_slice %29 {offsets = [0, 18], sizes = [1, 256], strides = [1, 1]} : vector<1x358xf32> to vector<1x256xf32>
    %c58 = arith.constant 58 : index
    %c0_38 = arith.constant 0 : index
    %149 = vector.load %arg4[%c58, %c0_38] : memref<99x256xf32, #tpu.memory_space<vmem>>, vector<1x256xf32>
    %150 = vector.shape_cast %149 : vector<1x256xf32> to vector<256xf32>
    %151 = vector.shape_cast %150 : vector<256xf32> to vector<1x256xf32>
    %152 = arith.mulf %148, %151 : vector<1x256xf32>
    %153 = arith.addf %147, %152 : vector<1x256xf32>
    %154 = arith.addf %142, %153 : vector<1x256xf32>
    %155 = vector.extract_strided_slice %28 {offsets = [0, 19], sizes = [1, 256], strides = [1, 1]} : vector<1x358xf32> to vector<1x256xf32>
    %c10 = arith.constant 10 : index
    %c0_39 = arith.constant 0 : index
    %156 = vector.load %arg4[%c10, %c0_39] : memref<99x256xf32, #tpu.memory_space<vmem>>, vector<1x256xf32>
    %157 = vector.shape_cast %156 : vector<1x256xf32> to vector<256xf32>
    %158 = vector.shape_cast %157 : vector<256xf32> to vector<1x256xf32>
    %159 = arith.mulf %155, %158 : vector<1x256xf32>
    %160 = vector.extract_strided_slice %29 {offsets = [0, 19], sizes = [1, 256], strides = [1, 1]} : vector<1x358xf32> to vector<1x256xf32>
    %c59 = arith.constant 59 : index
    %c0_40 = arith.constant 0 : index
    %161 = vector.load %arg4[%c59, %c0_40] : memref<99x256xf32, #tpu.memory_space<vmem>>, vector<1x256xf32>
    %162 = vector.shape_cast %161 : vector<1x256xf32> to vector<256xf32>
    %163 = vector.shape_cast %162 : vector<256xf32> to vector<1x256xf32>
    %164 = arith.mulf %160, %163 : vector<1x256xf32>
    %165 = arith.addf %159, %164 : vector<1x256xf32>
    %166 = arith.addf %154, %165 : vector<1x256xf32>
    %167 = vector.extract_strided_slice %28 {offsets = [0, 20], sizes = [1, 256], strides = [1, 1]} : vector<1x358xf32> to vector<1x256xf32>
    %c11 = arith.constant 11 : index
    %c0_41 = arith.constant 0 : index
    %168 = vector.load %arg4[%c11, %c0_41] : memref<99x256xf32, #tpu.memory_space<vmem>>, vector<1x256xf32>
    %169 = vector.shape_cast %168 : vector<1x256xf32> to vector<256xf32>
    %170 = vector.shape_cast %169 : vector<256xf32> to vector<1x256xf32>
    %171 = arith.mulf %167, %170 : vector<1x256xf32>
    %172 = vector.extract_strided_slice %29 {offsets = [0, 20], sizes = [1, 256], strides = [1, 1]} : vector<1x358xf32> to vector<1x256xf32>
    %c60 = arith.constant 60 : index
    %c0_42 = arith.constant 0 : index
    %173 = vector.load %arg4[%c60, %c0_42] : memref<99x256xf32, #tpu.memory_space<vmem>>, vector<1x256xf32>
    %174 = vector.shape_cast %173 : vector<1x256xf32> to vector<256xf32>
    %175 = vector.shape_cast %174 : vector<256xf32> to vector<1x256xf32>
    %176 = arith.mulf %172, %175 : vector<1x256xf32>
    %177 = arith.addf %171, %176 : vector<1x256xf32>
    %178 = arith.addf %166, %177 : vector<1x256xf32>
    %179 = vector.extract_strided_slice %28 {offsets = [0, 21], sizes = [1, 256], strides = [1, 1]} : vector<1x358xf32> to vector<1x256xf32>
    %c12 = arith.constant 12 : index
    %c0_43 = arith.constant 0 : index
    %180 = vector.load %arg4[%c12, %c0_43] : memref<99x256xf32, #tpu.memory_space<vmem>>, vector<1x256xf32>
    %181 = vector.shape_cast %180 : vector<1x256xf32> to vector<256xf32>
    %182 = vector.shape_cast %181 : vector<256xf32> to vector<1x256xf32>
    %183 = arith.mulf %179, %182 : vector<1x256xf32>
    %184 = vector.extract_strided_slice %29 {offsets = [0, 21], sizes = [1, 256], strides = [1, 1]} : vector<1x358xf32> to vector<1x256xf32>
    %c61 = arith.constant 61 : index
    %c0_44 = arith.constant 0 : index
    %185 = vector.load %arg4[%c61, %c0_44] : memref<99x256xf32, #tpu.memory_space<vmem>>, vector<1x256xf32>
    %186 = vector.shape_cast %185 : vector<1x256xf32> to vector<256xf32>
    %187 = vector.shape_cast %186 : vector<256xf32> to vector<1x256xf32>
    %188 = arith.mulf %184, %187 : vector<1x256xf32>
    %189 = arith.addf %183, %188 : vector<1x256xf32>
    %190 = arith.addf %178, %189 : vector<1x256xf32>
    %191 = vector.extract_strided_slice %28 {offsets = [0, 22], sizes = [1, 256], strides = [1, 1]} : vector<1x358xf32> to vector<1x256xf32>
    %c13 = arith.constant 13 : index
    %c0_45 = arith.constant 0 : index
    %192 = vector.load %arg4[%c13, %c0_45] : memref<99x256xf32, #tpu.memory_space<vmem>>, vector<1x256xf32>
    %193 = vector.shape_cast %192 : vector<1x256xf32> to vector<256xf32>
    %194 = vector.shape_cast %193 : vector<256xf32> to vector<1x256xf32>
    %195 = arith.mulf %191, %194 : vector<1x256xf32>
    %196 = vector.extract_strided_slice %29 {offsets = [0, 22], sizes = [1, 256], strides = [1, 1]} : vector<1x358xf32> to vector<1x256xf32>
    %c62 = arith.constant 62 : index
    %c0_46 = arith.constant 0 : index
    %197 = vector.load %arg4[%c62, %c0_46] : memref<99x256xf32, #tpu.memory_space<vmem>>, vector<1x256xf32>
    %198 = vector.shape_cast %197 : vector<1x256xf32> to vector<256xf32>
    %199 = vector.shape_cast %198 : vector<256xf32> to vector<1x256xf32>
    %200 = arith.mulf %196, %199 : vector<1x256xf32>
    %201 = arith.addf %195, %200 : vector<1x256xf32>
    %202 = arith.addf %190, %201 : vector<1x256xf32>
    %203 = vector.extract_strided_slice %28 {offsets = [0, 32], sizes = [1, 256], strides = [1, 1]} : vector<1x358xf32> to vector<1x256xf32>
    %c14 = arith.constant 14 : index
    %c0_47 = arith.constant 0 : index
    %204 = vector.load %arg4[%c14, %c0_47] : memref<99x256xf32, #tpu.memory_space<vmem>>, vector<1x256xf32>
    %205 = vector.shape_cast %204 : vector<1x256xf32> to vector<256xf32>
    %206 = vector.shape_cast %205 : vector<256xf32> to vector<1x256xf32>
    %207 = arith.mulf %203, %206 : vector<1x256xf32>
    %208 = vector.extract_strided_slice %29 {offsets = [0, 32], sizes = [1, 256], strides = [1, 1]} : vector<1x358xf32> to vector<1x256xf32>
    %c63 = arith.constant 63 : index
    %c0_48 = arith.constant 0 : index
    %209 = vector.load %arg4[%c63, %c0_48] : memref<99x256xf32, #tpu.memory_space<vmem>>, vector<1x256xf32>
    %210 = vector.shape_cast %209 : vector<1x256xf32> to vector<256xf32>
    %211 = vector.shape_cast %210 : vector<256xf32> to vector<1x256xf32>
    %212 = arith.mulf %208, %211 : vector<1x256xf32>
    %213 = arith.addf %207, %212 : vector<1x256xf32>
    %214 = arith.addf %202, %213 : vector<1x256xf32>
    %215 = vector.extract_strided_slice %28 {offsets = [0, 33], sizes = [1, 256], strides = [1, 1]} : vector<1x358xf32> to vector<1x256xf32>
    %c15 = arith.constant 15 : index
    %c0_49 = arith.constant 0 : index
    %216 = vector.load %arg4[%c15, %c0_49] : memref<99x256xf32, #tpu.memory_space<vmem>>, vector<1x256xf32>
    %217 = vector.shape_cast %216 : vector<1x256xf32> to vector<256xf32>
    %218 = vector.shape_cast %217 : vector<256xf32> to vector<1x256xf32>
    %219 = arith.mulf %215, %218 : vector<1x256xf32>
    %220 = vector.extract_strided_slice %29 {offsets = [0, 33], sizes = [1, 256], strides = [1, 1]} : vector<1x358xf32> to vector<1x256xf32>
    %c64 = arith.constant 64 : index
    %c0_50 = arith.constant 0 : index
    %221 = vector.load %arg4[%c64, %c0_50] : memref<99x256xf32, #tpu.memory_space<vmem>>, vector<1x256xf32>
    %222 = vector.shape_cast %221 : vector<1x256xf32> to vector<256xf32>
    %223 = vector.shape_cast %222 : vector<256xf32> to vector<1x256xf32>
    %224 = arith.mulf %220, %223 : vector<1x256xf32>
    %225 = arith.addf %219, %224 : vector<1x256xf32>
    %226 = arith.addf %214, %225 : vector<1x256xf32>
    %227 = vector.extract_strided_slice %28 {offsets = [0, 34], sizes = [1, 256], strides = [1, 1]} : vector<1x358xf32> to vector<1x256xf32>
    %c16 = arith.constant 16 : index
    %c0_51 = arith.constant 0 : index
    %228 = vector.load %arg4[%c16, %c0_51] : memref<99x256xf32, #tpu.memory_space<vmem>>, vector<1x256xf32>
    %229 = vector.shape_cast %228 : vector<1x256xf32> to vector<256xf32>
    %230 = vector.shape_cast %229 : vector<256xf32> to vector<1x256xf32>
    %231 = arith.mulf %227, %230 : vector<1x256xf32>
    %232 = vector.extract_strided_slice %29 {offsets = [0, 34], sizes = [1, 256], strides = [1, 1]} : vector<1x358xf32> to vector<1x256xf32>
    %c65 = arith.constant 65 : index
    %c0_52 = arith.constant 0 : index
    %233 = vector.load %arg4[%c65, %c0_52] : memref<99x256xf32, #tpu.memory_space<vmem>>, vector<1x256xf32>
    %234 = vector.shape_cast %233 : vector<1x256xf32> to vector<256xf32>
    %235 = vector.shape_cast %234 : vector<256xf32> to vector<1x256xf32>
    %236 = arith.mulf %232, %235 : vector<1x256xf32>
    %237 = arith.addf %231, %236 : vector<1x256xf32>
    %238 = arith.addf %226, %237 : vector<1x256xf32>
    %239 = vector.extract_strided_slice %28 {offsets = [0, 35], sizes = [1, 256], strides = [1, 1]} : vector<1x358xf32> to vector<1x256xf32>
    %c17 = arith.constant 17 : index
    %c0_53 = arith.constant 0 : index
    %240 = vector.load %arg4[%c17, %c0_53] : memref<99x256xf32, #tpu.memory_space<vmem>>, vector<1x256xf32>
    %241 = vector.shape_cast %240 : vector<1x256xf32> to vector<256xf32>
    %242 = vector.shape_cast %241 : vector<256xf32> to vector<1x256xf32>
    %243 = arith.mulf %239, %242 : vector<1x256xf32>
    %244 = vector.extract_strided_slice %29 {offsets = [0, 35], sizes = [1, 256], strides = [1, 1]} : vector<1x358xf32> to vector<1x256xf32>
    %c66 = arith.constant 66 : index
    %c0_54 = arith.constant 0 : index
    %245 = vector.load %arg4[%c66, %c0_54] : memref<99x256xf32, #tpu.memory_space<vmem>>, vector<1x256xf32>
    %246 = vector.shape_cast %245 : vector<1x256xf32> to vector<256xf32>
    %247 = vector.shape_cast %246 : vector<256xf32> to vector<1x256xf32>
    %248 = arith.mulf %244, %247 : vector<1x256xf32>
    %249 = arith.addf %243, %248 : vector<1x256xf32>
    %250 = arith.addf %238, %249 : vector<1x256xf32>
    %251 = vector.extract_strided_slice %28 {offsets = [0, 36], sizes = [1, 256], strides = [1, 1]} : vector<1x358xf32> to vector<1x256xf32>
    %c18 = arith.constant 18 : index
    %c0_55 = arith.constant 0 : index
    %252 = vector.load %arg4[%c18, %c0_55] : memref<99x256xf32, #tpu.memory_space<vmem>>, vector<1x256xf32>
    %253 = vector.shape_cast %252 : vector<1x256xf32> to vector<256xf32>
    %254 = vector.shape_cast %253 : vector<256xf32> to vector<1x256xf32>
    %255 = arith.mulf %251, %254 : vector<1x256xf32>
    %256 = vector.extract_strided_slice %29 {offsets = [0, 36], sizes = [1, 256], strides = [1, 1]} : vector<1x358xf32> to vector<1x256xf32>
    %c67 = arith.constant 67 : index
    %c0_56 = arith.constant 0 : index
    %257 = vector.load %arg4[%c67, %c0_56] : memref<99x256xf32, #tpu.memory_space<vmem>>, vector<1x256xf32>
    %258 = vector.shape_cast %257 : vector<1x256xf32> to vector<256xf32>
    %259 = vector.shape_cast %258 : vector<256xf32> to vector<1x256xf32>
    %260 = arith.mulf %256, %259 : vector<1x256xf32>
    %261 = arith.addf %255, %260 : vector<1x256xf32>
    %262 = arith.addf %250, %261 : vector<1x256xf32>
    %263 = vector.extract_strided_slice %28 {offsets = [0, 37], sizes = [1, 256], strides = [1, 1]} : vector<1x358xf32> to vector<1x256xf32>
    %c19 = arith.constant 19 : index
    %c0_57 = arith.constant 0 : index
    %264 = vector.load %arg4[%c19, %c0_57] : memref<99x256xf32, #tpu.memory_space<vmem>>, vector<1x256xf32>
    %265 = vector.shape_cast %264 : vector<1x256xf32> to vector<256xf32>
    %266 = vector.shape_cast %265 : vector<256xf32> to vector<1x256xf32>
    %267 = arith.mulf %263, %266 : vector<1x256xf32>
    %268 = vector.extract_strided_slice %29 {offsets = [0, 37], sizes = [1, 256], strides = [1, 1]} : vector<1x358xf32> to vector<1x256xf32>
    %c68 = arith.constant 68 : index
    %c0_58 = arith.constant 0 : index
    %269 = vector.load %arg4[%c68, %c0_58] : memref<99x256xf32, #tpu.memory_space<vmem>>, vector<1x256xf32>
    %270 = vector.shape_cast %269 : vector<1x256xf32> to vector<256xf32>
    %271 = vector.shape_cast %270 : vector<256xf32> to vector<1x256xf32>
    %272 = arith.mulf %268, %271 : vector<1x256xf32>
    %273 = arith.addf %267, %272 : vector<1x256xf32>
    %274 = arith.addf %262, %273 : vector<1x256xf32>
    %275 = vector.extract_strided_slice %28 {offsets = [0, 38], sizes = [1, 256], strides = [1, 1]} : vector<1x358xf32> to vector<1x256xf32>
    %c20 = arith.constant 20 : index
    %c0_59 = arith.constant 0 : index
    %276 = vector.load %arg4[%c20, %c0_59] : memref<99x256xf32, #tpu.memory_space<vmem>>, vector<1x256xf32>
    %277 = vector.shape_cast %276 : vector<1x256xf32> to vector<256xf32>
    %278 = vector.shape_cast %277 : vector<256xf32> to vector<1x256xf32>
    %279 = arith.mulf %275, %278 : vector<1x256xf32>
    %280 = vector.extract_strided_slice %29 {offsets = [0, 38], sizes = [1, 256], strides = [1, 1]} : vector<1x358xf32> to vector<1x256xf32>
    %c69 = arith.constant 69 : index
    %c0_60 = arith.constant 0 : index
    %281 = vector.load %arg4[%c69, %c0_60] : memref<99x256xf32, #tpu.memory_space<vmem>>, vector<1x256xf32>
    %282 = vector.shape_cast %281 : vector<1x256xf32> to vector<256xf32>
    %283 = vector.shape_cast %282 : vector<256xf32> to vector<1x256xf32>
    %284 = arith.mulf %280, %283 : vector<1x256xf32>
    %285 = arith.addf %279, %284 : vector<1x256xf32>
    %286 = arith.addf %274, %285 : vector<1x256xf32>
    %287 = vector.extract_strided_slice %28 {offsets = [0, 48], sizes = [1, 256], strides = [1, 1]} : vector<1x358xf32> to vector<1x256xf32>
    %c21 = arith.constant 21 : index
    %c0_61 = arith.constant 0 : index
    %288 = vector.load %arg4[%c21, %c0_61] : memref<99x256xf32, #tpu.memory_space<vmem>>, vector<1x256xf32>
    %289 = vector.shape_cast %288 : vector<1x256xf32> to vector<256xf32>
    %290 = vector.shape_cast %289 : vector<256xf32> to vector<1x256xf32>
    %291 = arith.mulf %287, %290 : vector<1x256xf32>
    %292 = vector.extract_strided_slice %29 {offsets = [0, 48], sizes = [1, 256], strides = [1, 1]} : vector<1x358xf32> to vector<1x256xf32>
    %c70 = arith.constant 70 : index
    %c0_62 = arith.constant 0 : index
    %293 = vector.load %arg4[%c70, %c0_62] : memref<99x256xf32, #tpu.memory_space<vmem>>, vector<1x256xf32>
    %294 = vector.shape_cast %293 : vector<1x256xf32> to vector<256xf32>
    %295 = vector.shape_cast %294 : vector<256xf32> to vector<1x256xf32>
    %296 = arith.mulf %292, %295 : vector<1x256xf32>
    %297 = arith.addf %291, %296 : vector<1x256xf32>
    %298 = arith.addf %286, %297 : vector<1x256xf32>
    %299 = vector.extract_strided_slice %28 {offsets = [0, 49], sizes = [1, 256], strides = [1, 1]} : vector<1x358xf32> to vector<1x256xf32>
    %c22 = arith.constant 22 : index
    %c0_63 = arith.constant 0 : index
    %300 = vector.load %arg4[%c22, %c0_63] : memref<99x256xf32, #tpu.memory_space<vmem>>, vector<1x256xf32>
    %301 = vector.shape_cast %300 : vector<1x256xf32> to vector<256xf32>
    %302 = vector.shape_cast %301 : vector<256xf32> to vector<1x256xf32>
    %303 = arith.mulf %299, %302 : vector<1x256xf32>
    %304 = vector.extract_strided_slice %29 {offsets = [0, 49], sizes = [1, 256], strides = [1, 1]} : vector<1x358xf32> to vector<1x256xf32>
    %c71 = arith.constant 71 : index
    %c0_64 = arith.constant 0 : index
    %305 = vector.load %arg4[%c71, %c0_64] : memref<99x256xf32, #tpu.memory_space<vmem>>, vector<1x256xf32>
    %306 = vector.shape_cast %305 : vector<1x256xf32> to vector<256xf32>
    %307 = vector.shape_cast %306 : vector<256xf32> to vector<1x256xf32>
    %308 = arith.mulf %304, %307 : vector<1x256xf32>
    %309 = arith.addf %303, %308 : vector<1x256xf32>
    %310 = arith.addf %298, %309 : vector<1x256xf32>
    %311 = vector.extract_strided_slice %28 {offsets = [0, 50], sizes = [1, 256], strides = [1, 1]} : vector<1x358xf32> to vector<1x256xf32>
    %c23 = arith.constant 23 : index
    %c0_65 = arith.constant 0 : index
    %312 = vector.load %arg4[%c23, %c0_65] : memref<99x256xf32, #tpu.memory_space<vmem>>, vector<1x256xf32>
    %313 = vector.shape_cast %312 : vector<1x256xf32> to vector<256xf32>
    %314 = vector.shape_cast %313 : vector<256xf32> to vector<1x256xf32>
    %315 = arith.mulf %311, %314 : vector<1x256xf32>
    %316 = vector.extract_strided_slice %29 {offsets = [0, 50], sizes = [1, 256], strides = [1, 1]} : vector<1x358xf32> to vector<1x256xf32>
    %c72 = arith.constant 72 : index
    %c0_66 = arith.constant 0 : index
    %317 = vector.load %arg4[%c72, %c0_66] : memref<99x256xf32, #tpu.memory_space<vmem>>, vector<1x256xf32>
    %318 = vector.shape_cast %317 : vector<1x256xf32> to vector<256xf32>
    %319 = vector.shape_cast %318 : vector<256xf32> to vector<1x256xf32>
    %320 = arith.mulf %316, %319 : vector<1x256xf32>
    %321 = arith.addf %315, %320 : vector<1x256xf32>
    %322 = arith.addf %310, %321 : vector<1x256xf32>
    %323 = vector.extract_strided_slice %28 {offsets = [0, 51], sizes = [1, 256], strides = [1, 1]} : vector<1x358xf32> to vector<1x256xf32>
    %c24 = arith.constant 24 : index
    %c0_67 = arith.constant 0 : index
    %324 = vector.load %arg4[%c24, %c0_67] : memref<99x256xf32, #tpu.memory_space<vmem>>, vector<1x256xf32>
    %325 = vector.shape_cast %324 : vector<1x256xf32> to vector<256xf32>
    %326 = vector.shape_cast %325 : vector<256xf32> to vector<1x256xf32>
    %327 = arith.mulf %323, %326 : vector<1x256xf32>
    %328 = vector.extract_strided_slice %29 {offsets = [0, 51], sizes = [1, 256], strides = [1, 1]} : vector<1x358xf32> to vector<1x256xf32>
    %c73 = arith.constant 73 : index
    %c0_68 = arith.constant 0 : index
    %329 = vector.load %arg4[%c73, %c0_68] : memref<99x256xf32, #tpu.memory_space<vmem>>, vector<1x256xf32>
    %330 = vector.shape_cast %329 : vector<1x256xf32> to vector<256xf32>
    %331 = vector.shape_cast %330 : vector<256xf32> to vector<1x256xf32>
    %332 = arith.mulf %328, %331 : vector<1x256xf32>
    %333 = arith.addf %327, %332 : vector<1x256xf32>
    %334 = arith.addf %322, %333 : vector<1x256xf32>
    %335 = vector.extract_strided_slice %28 {offsets = [0, 52], sizes = [1, 256], strides = [1, 1]} : vector<1x358xf32> to vector<1x256xf32>
    %c25 = arith.constant 25 : index
    %c0_69 = arith.constant 0 : index
    %336 = vector.load %arg4[%c25, %c0_69] : memref<99x256xf32, #tpu.memory_space<vmem>>, vector<1x256xf32>
    %337 = vector.shape_cast %336 : vector<1x256xf32> to vector<256xf32>
    %338 = vector.shape_cast %337 : vector<256xf32> to vector<1x256xf32>
    %339 = arith.mulf %335, %338 : vector<1x256xf32>
    %340 = vector.extract_strided_slice %29 {offsets = [0, 52], sizes = [1, 256], strides = [1, 1]} : vector<1x358xf32> to vector<1x256xf32>
    %c74 = arith.constant 74 : index
    %c0_70 = arith.constant 0 : index
    %341 = vector.load %arg4[%c74, %c0_70] : memref<99x256xf32, #tpu.memory_space<vmem>>, vector<1x256xf32>
    %342 = vector.shape_cast %341 : vector<1x256xf32> to vector<256xf32>
    %343 = vector.shape_cast %342 : vector<256xf32> to vector<1x256xf32>
    %344 = arith.mulf %340, %343 : vector<1x256xf32>
    %345 = arith.addf %339, %344 : vector<1x256xf32>
    %346 = arith.addf %334, %345 : vector<1x256xf32>
    %347 = vector.extract_strided_slice %28 {offsets = [0, 53], sizes = [1, 256], strides = [1, 1]} : vector<1x358xf32> to vector<1x256xf32>
    %c26 = arith.constant 26 : index
    %c0_71 = arith.constant 0 : index
    %348 = vector.load %arg4[%c26, %c0_71] : memref<99x256xf32, #tpu.memory_space<vmem>>, vector<1x256xf32>
    %349 = vector.shape_cast %348 : vector<1x256xf32> to vector<256xf32>
    %350 = vector.shape_cast %349 : vector<256xf32> to vector<1x256xf32>
    %351 = arith.mulf %347, %350 : vector<1x256xf32>
    %352 = vector.extract_strided_slice %29 {offsets = [0, 53], sizes = [1, 256], strides = [1, 1]} : vector<1x358xf32> to vector<1x256xf32>
    %c75 = arith.constant 75 : index
    %c0_72 = arith.constant 0 : index
    %353 = vector.load %arg4[%c75, %c0_72] : memref<99x256xf32, #tpu.memory_space<vmem>>, vector<1x256xf32>
    %354 = vector.shape_cast %353 : vector<1x256xf32> to vector<256xf32>
    %355 = vector.shape_cast %354 : vector<256xf32> to vector<1x256xf32>
    %356 = arith.mulf %352, %355 : vector<1x256xf32>
    %357 = arith.addf %351, %356 : vector<1x256xf32>
    %358 = arith.addf %346, %357 : vector<1x256xf32>
    %359 = vector.extract_strided_slice %28 {offsets = [0, 54], sizes = [1, 256], strides = [1, 1]} : vector<1x358xf32> to vector<1x256xf32>
    %c27 = arith.constant 27 : index
    %c0_73 = arith.constant 0 : index
    %360 = vector.load %arg4[%c27, %c0_73] : memref<99x256xf32, #tpu.memory_space<vmem>>, vector<1x256xf32>
    %361 = vector.shape_cast %360 : vector<1x256xf32> to vector<256xf32>
    %362 = vector.shape_cast %361 : vector<256xf32> to vector<1x256xf32>
    %363 = arith.mulf %359, %362 : vector<1x256xf32>
    %364 = vector.extract_strided_slice %29 {offsets = [0, 54], sizes = [1, 256], strides = [1, 1]} : vector<1x358xf32> to vector<1x256xf32>
    %c76 = arith.constant 76 : index
    %c0_74 = arith.constant 0 : index
    %365 = vector.load %arg4[%c76, %c0_74] : memref<99x256xf32, #tpu.memory_space<vmem>>, vector<1x256xf32>
    %366 = vector.shape_cast %365 : vector<1x256xf32> to vector<256xf32>
    %367 = vector.shape_cast %366 : vector<256xf32> to vector<1x256xf32>
    %368 = arith.mulf %364, %367 : vector<1x256xf32>
    %369 = arith.addf %363, %368 : vector<1x256xf32>
    %370 = arith.addf %358, %369 : vector<1x256xf32>
    %371 = vector.extract_strided_slice %28 {offsets = [0, 64], sizes = [1, 256], strides = [1, 1]} : vector<1x358xf32> to vector<1x256xf32>
    %c28 = arith.constant 28 : index
    %c0_75 = arith.constant 0 : index
    %372 = vector.load %arg4[%c28, %c0_75] : memref<99x256xf32, #tpu.memory_space<vmem>>, vector<1x256xf32>
    %373 = vector.shape_cast %372 : vector<1x256xf32> to vector<256xf32>
    %374 = vector.shape_cast %373 : vector<256xf32> to vector<1x256xf32>
    %375 = arith.mulf %371, %374 : vector<1x256xf32>
    %376 = vector.extract_strided_slice %29 {offsets = [0, 64], sizes = [1, 256], strides = [1, 1]} : vector<1x358xf32> to vector<1x256xf32>
    %c77 = arith.constant 77 : index
    %c0_76 = arith.constant 0 : index
    %377 = vector.load %arg4[%c77, %c0_76] : memref<99x256xf32, #tpu.memory_space<vmem>>, vector<1x256xf32>
    %378 = vector.shape_cast %377 : vector<1x256xf32> to vector<256xf32>
    %379 = vector.shape_cast %378 : vector<256xf32> to vector<1x256xf32>
    %380 = arith.mulf %376, %379 : vector<1x256xf32>
    %381 = arith.addf %375, %380 : vector<1x256xf32>
    %382 = arith.addf %370, %381 : vector<1x256xf32>
    %383 = vector.extract_strided_slice %28 {offsets = [0, 65], sizes = [1, 256], strides = [1, 1]} : vector<1x358xf32> to vector<1x256xf32>
    %c29 = arith.constant 29 : index
    %c0_77 = arith.constant 0 : index
    %384 = vector.load %arg4[%c29, %c0_77] : memref<99x256xf32, #tpu.memory_space<vmem>>, vector<1x256xf32>
    %385 = vector.shape_cast %384 : vector<1x256xf32> to vector<256xf32>
    %386 = vector.shape_cast %385 : vector<256xf32> to vector<1x256xf32>
    %387 = arith.mulf %383, %386 : vector<1x256xf32>
    %388 = vector.extract_strided_slice %29 {offsets = [0, 65], sizes = [1, 256], strides = [1, 1]} : vector<1x358xf32> to vector<1x256xf32>
    %c78 = arith.constant 78 : index
    %c0_78 = arith.constant 0 : index
    %389 = vector.load %arg4[%c78, %c0_78] : memref<99x256xf32, #tpu.memory_space<vmem>>, vector<1x256xf32>
    %390 = vector.shape_cast %389 : vector<1x256xf32> to vector<256xf32>
    %391 = vector.shape_cast %390 : vector<256xf32> to vector<1x256xf32>
    %392 = arith.mulf %388, %391 : vector<1x256xf32>
    %393 = arith.addf %387, %392 : vector<1x256xf32>
    %394 = arith.addf %382, %393 : vector<1x256xf32>
    %395 = vector.extract_strided_slice %28 {offsets = [0, 66], sizes = [1, 256], strides = [1, 1]} : vector<1x358xf32> to vector<1x256xf32>
    %c30 = arith.constant 30 : index
    %c0_79 = arith.constant 0 : index
    %396 = vector.load %arg4[%c30, %c0_79] : memref<99x256xf32, #tpu.memory_space<vmem>>, vector<1x256xf32>
    %397 = vector.shape_cast %396 : vector<1x256xf32> to vector<256xf32>
    %398 = vector.shape_cast %397 : vector<256xf32> to vector<1x256xf32>
    %399 = arith.mulf %395, %398 : vector<1x256xf32>
    %400 = vector.extract_strided_slice %29 {offsets = [0, 66], sizes = [1, 256], strides = [1, 1]} : vector<1x358xf32> to vector<1x256xf32>
    %c79 = arith.constant 79 : index
    %c0_80 = arith.constant 0 : index
    %401 = vector.load %arg4[%c79, %c0_80] : memref<99x256xf32, #tpu.memory_space<vmem>>, vector<1x256xf32>
    %402 = vector.shape_cast %401 : vector<1x256xf32> to vector<256xf32>
    %403 = vector.shape_cast %402 : vector<256xf32> to vector<1x256xf32>
    %404 = arith.mulf %400, %403 : vector<1x256xf32>
    %405 = arith.addf %399, %404 : vector<1x256xf32>
    %406 = arith.addf %394, %405 : vector<1x256xf32>
    %407 = vector.extract_strided_slice %28 {offsets = [0, 67], sizes = [1, 256], strides = [1, 1]} : vector<1x358xf32> to vector<1x256xf32>
    %c31 = arith.constant 31 : index
    %c0_81 = arith.constant 0 : index
    %408 = vector.load %arg4[%c31, %c0_81] : memref<99x256xf32, #tpu.memory_space<vmem>>, vector<1x256xf32>
    %409 = vector.shape_cast %408 : vector<1x256xf32> to vector<256xf32>
    %410 = vector.shape_cast %409 : vector<256xf32> to vector<1x256xf32>
    %411 = arith.mulf %407, %410 : vector<1x256xf32>
    %412 = vector.extract_strided_slice %29 {offsets = [0, 67], sizes = [1, 256], strides = [1, 1]} : vector<1x358xf32> to vector<1x256xf32>
    %c80 = arith.constant 80 : index
    %c0_82 = arith.constant 0 : index
    %413 = vector.load %arg4[%c80, %c0_82] : memref<99x256xf32, #tpu.memory_space<vmem>>, vector<1x256xf32>
    %414 = vector.shape_cast %413 : vector<1x256xf32> to vector<256xf32>
    %415 = vector.shape_cast %414 : vector<256xf32> to vector<1x256xf32>
    %416 = arith.mulf %412, %415 : vector<1x256xf32>
    %417 = arith.addf %411, %416 : vector<1x256xf32>
    %418 = arith.addf %406, %417 : vector<1x256xf32>
    %419 = vector.extract_strided_slice %28 {offsets = [0, 68], sizes = [1, 256], strides = [1, 1]} : vector<1x358xf32> to vector<1x256xf32>
    %c32 = arith.constant 32 : index
    %c0_83 = arith.constant 0 : index
    %420 = vector.load %arg4[%c32, %c0_83] : memref<99x256xf32, #tpu.memory_space<vmem>>, vector<1x256xf32>
    %421 = vector.shape_cast %420 : vector<1x256xf32> to vector<256xf32>
    %422 = vector.shape_cast %421 : vector<256xf32> to vector<1x256xf32>
    %423 = arith.mulf %419, %422 : vector<1x256xf32>
    %424 = vector.extract_strided_slice %29 {offsets = [0, 68], sizes = [1, 256], strides = [1, 1]} : vector<1x358xf32> to vector<1x256xf32>
    %c81 = arith.constant 81 : index
    %c0_84 = arith.constant 0 : index
    %425 = vector.load %arg4[%c81, %c0_84] : memref<99x256xf32, #tpu.memory_space<vmem>>, vector<1x256xf32>
    %426 = vector.shape_cast %425 : vector<1x256xf32> to vector<256xf32>
    %427 = vector.shape_cast %426 : vector<256xf32> to vector<1x256xf32>
    %428 = arith.mulf %424, %427 : vector<1x256xf32>
    %429 = arith.addf %423, %428 : vector<1x256xf32>
    %430 = arith.addf %418, %429 : vector<1x256xf32>
    %431 = vector.extract_strided_slice %28 {offsets = [0, 69], sizes = [1, 256], strides = [1, 1]} : vector<1x358xf32> to vector<1x256xf32>
    %c33 = arith.constant 33 : index
    %c0_85 = arith.constant 0 : index
    %432 = vector.load %arg4[%c33, %c0_85] : memref<99x256xf32, #tpu.memory_space<vmem>>, vector<1x256xf32>
    %433 = vector.shape_cast %432 : vector<1x256xf32> to vector<256xf32>
    %434 = vector.shape_cast %433 : vector<256xf32> to vector<1x256xf32>
    %435 = arith.mulf %431, %434 : vector<1x256xf32>
    %436 = vector.extract_strided_slice %29 {offsets = [0, 69], sizes = [1, 256], strides = [1, 1]} : vector<1x358xf32> to vector<1x256xf32>
    %c82 = arith.constant 82 : index
    %c0_86 = arith.constant 0 : index
    %437 = vector.load %arg4[%c82, %c0_86] : memref<99x256xf32, #tpu.memory_space<vmem>>, vector<1x256xf32>
    %438 = vector.shape_cast %437 : vector<1x256xf32> to vector<256xf32>
    %439 = vector.shape_cast %438 : vector<256xf32> to vector<1x256xf32>
    %440 = arith.mulf %436, %439 : vector<1x256xf32>
    %441 = arith.addf %435, %440 : vector<1x256xf32>
    %442 = arith.addf %430, %441 : vector<1x256xf32>
    %443 = vector.extract_strided_slice %28 {offsets = [0, 70], sizes = [1, 256], strides = [1, 1]} : vector<1x358xf32> to vector<1x256xf32>
    %c34 = arith.constant 34 : index
    %c0_87 = arith.constant 0 : index
    %444 = vector.load %arg4[%c34, %c0_87] : memref<99x256xf32, #tpu.memory_space<vmem>>, vector<1x256xf32>
    %445 = vector.shape_cast %444 : vector<1x256xf32> to vector<256xf32>
    %446 = vector.shape_cast %445 : vector<256xf32> to vector<1x256xf32>
    %447 = arith.mulf %443, %446 : vector<1x256xf32>
    %448 = vector.extract_strided_slice %29 {offsets = [0, 70], sizes = [1, 256], strides = [1, 1]} : vector<1x358xf32> to vector<1x256xf32>
    %c83 = arith.constant 83 : index
    %c0_88 = arith.constant 0 : index
    %449 = vector.load %arg4[%c83, %c0_88] : memref<99x256xf32, #tpu.memory_space<vmem>>, vector<1x256xf32>
    %450 = vector.shape_cast %449 : vector<1x256xf32> to vector<256xf32>
    %451 = vector.shape_cast %450 : vector<256xf32> to vector<1x256xf32>
    %452 = arith.mulf %448, %451 : vector<1x256xf32>
    %453 = arith.addf %447, %452 : vector<1x256xf32>
    %454 = arith.addf %442, %453 : vector<1x256xf32>
    %455 = vector.extract_strided_slice %28 {offsets = [0, 80], sizes = [1, 256], strides = [1, 1]} : vector<1x358xf32> to vector<1x256xf32>
    %c35 = arith.constant 35 : index
    %c0_89 = arith.constant 0 : index
    %456 = vector.load %arg4[%c35, %c0_89] : memref<99x256xf32, #tpu.memory_space<vmem>>, vector<1x256xf32>
    %457 = vector.shape_cast %456 : vector<1x256xf32> to vector<256xf32>
    %458 = vector.shape_cast %457 : vector<256xf32> to vector<1x256xf32>
    %459 = arith.mulf %455, %458 : vector<1x256xf32>
    %460 = vector.extract_strided_slice %29 {offsets = [0, 80], sizes = [1, 256], strides = [1, 1]} : vector<1x358xf32> to vector<1x256xf32>
    %c84 = arith.constant 84 : index
    %c0_90 = arith.constant 0 : index
    %461 = vector.load %arg4[%c84, %c0_90] : memref<99x256xf32, #tpu.memory_space<vmem>>, vector<1x256xf32>
    %462 = vector.shape_cast %461 : vector<1x256xf32> to vector<256xf32>
    %463 = vector.shape_cast %462 : vector<256xf32> to vector<1x256xf32>
    %464 = arith.mulf %460, %463 : vector<1x256xf32>
    %465 = arith.addf %459, %464 : vector<1x256xf32>
    %466 = arith.addf %454, %465 : vector<1x256xf32>
    %467 = vector.extract_strided_slice %28 {offsets = [0, 81], sizes = [1, 256], strides = [1, 1]} : vector<1x358xf32> to vector<1x256xf32>
    %c36 = arith.constant 36 : index
    %c0_91 = arith.constant 0 : index
    %468 = vector.load %arg4[%c36, %c0_91] : memref<99x256xf32, #tpu.memory_space<vmem>>, vector<1x256xf32>
    %469 = vector.shape_cast %468 : vector<1x256xf32> to vector<256xf32>
    %470 = vector.shape_cast %469 : vector<256xf32> to vector<1x256xf32>
    %471 = arith.mulf %467, %470 : vector<1x256xf32>
    %472 = vector.extract_strided_slice %29 {offsets = [0, 81], sizes = [1, 256], strides = [1, 1]} : vector<1x358xf32> to vector<1x256xf32>
    %c85 = arith.constant 85 : index
    %c0_92 = arith.constant 0 : index
    %473 = vector.load %arg4[%c85, %c0_92] : memref<99x256xf32, #tpu.memory_space<vmem>>, vector<1x256xf32>
    %474 = vector.shape_cast %473 : vector<1x256xf32> to vector<256xf32>
    %475 = vector.shape_cast %474 : vector<256xf32> to vector<1x256xf32>
    %476 = arith.mulf %472, %475 : vector<1x256xf32>
    %477 = arith.addf %471, %476 : vector<1x256xf32>
    %478 = arith.addf %466, %477 : vector<1x256xf32>
    %479 = vector.extract_strided_slice %28 {offsets = [0, 82], sizes = [1, 256], strides = [1, 1]} : vector<1x358xf32> to vector<1x256xf32>
    %c37 = arith.constant 37 : index
    %c0_93 = arith.constant 0 : index
    %480 = vector.load %arg4[%c37, %c0_93] : memref<99x256xf32, #tpu.memory_space<vmem>>, vector<1x256xf32>
    %481 = vector.shape_cast %480 : vector<1x256xf32> to vector<256xf32>
    %482 = vector.shape_cast %481 : vector<256xf32> to vector<1x256xf32>
    %483 = arith.mulf %479, %482 : vector<1x256xf32>
    %484 = vector.extract_strided_slice %29 {offsets = [0, 82], sizes = [1, 256], strides = [1, 1]} : vector<1x358xf32> to vector<1x256xf32>
    %c86 = arith.constant 86 : index
    %c0_94 = arith.constant 0 : index
    %485 = vector.load %arg4[%c86, %c0_94] : memref<99x256xf32, #tpu.memory_space<vmem>>, vector<1x256xf32>
    %486 = vector.shape_cast %485 : vector<1x256xf32> to vector<256xf32>
    %487 = vector.shape_cast %486 : vector<256xf32> to vector<1x256xf32>
    %488 = arith.mulf %484, %487 : vector<1x256xf32>
    %489 = arith.addf %483, %488 : vector<1x256xf32>
    %490 = arith.addf %478, %489 : vector<1x256xf32>
    %491 = vector.extract_strided_slice %28 {offsets = [0, 83], sizes = [1, 256], strides = [1, 1]} : vector<1x358xf32> to vector<1x256xf32>
    %c38 = arith.constant 38 : index
    %c0_95 = arith.constant 0 : index
    %492 = vector.load %arg4[%c38, %c0_95] : memref<99x256xf32, #tpu.memory_space<vmem>>, vector<1x256xf32>
    %493 = vector.shape_cast %492 : vector<1x256xf32> to vector<256xf32>
    %494 = vector.shape_cast %493 : vector<256xf32> to vector<1x256xf32>
    %495 = arith.mulf %491, %494 : vector<1x256xf32>
    %496 = vector.extract_strided_slice %29 {offsets = [0, 83], sizes = [1, 256], strides = [1, 1]} : vector<1x358xf32> to vector<1x256xf32>
    %c87 = arith.constant 87 : index
    %c0_96 = arith.constant 0 : index
    %497 = vector.load %arg4[%c87, %c0_96] : memref<99x256xf32, #tpu.memory_space<vmem>>, vector<1x256xf32>
    %498 = vector.shape_cast %497 : vector<1x256xf32> to vector<256xf32>
    %499 = vector.shape_cast %498 : vector<256xf32> to vector<1x256xf32>
    %500 = arith.mulf %496, %499 : vector<1x256xf32>
    %501 = arith.addf %495, %500 : vector<1x256xf32>
    %502 = arith.addf %490, %501 : vector<1x256xf32>
    %503 = vector.extract_strided_slice %28 {offsets = [0, 84], sizes = [1, 256], strides = [1, 1]} : vector<1x358xf32> to vector<1x256xf32>
    %c39 = arith.constant 39 : index
    %c0_97 = arith.constant 0 : index
    %504 = vector.load %arg4[%c39, %c0_97] : memref<99x256xf32, #tpu.memory_space<vmem>>, vector<1x256xf32>
    %505 = vector.shape_cast %504 : vector<1x256xf32> to vector<256xf32>
    %506 = vector.shape_cast %505 : vector<256xf32> to vector<1x256xf32>
    %507 = arith.mulf %503, %506 : vector<1x256xf32>
    %508 = vector.extract_strided_slice %29 {offsets = [0, 84], sizes = [1, 256], strides = [1, 1]} : vector<1x358xf32> to vector<1x256xf32>
    %c88 = arith.constant 88 : index
    %c0_98 = arith.constant 0 : index
    %509 = vector.load %arg4[%c88, %c0_98] : memref<99x256xf32, #tpu.memory_space<vmem>>, vector<1x256xf32>
    %510 = vector.shape_cast %509 : vector<1x256xf32> to vector<256xf32>
    %511 = vector.shape_cast %510 : vector<256xf32> to vector<1x256xf32>
    %512 = arith.mulf %508, %511 : vector<1x256xf32>
    %513 = arith.addf %507, %512 : vector<1x256xf32>
    %514 = arith.addf %502, %513 : vector<1x256xf32>
    %515 = vector.extract_strided_slice %28 {offsets = [0, 85], sizes = [1, 256], strides = [1, 1]} : vector<1x358xf32> to vector<1x256xf32>
    %c40 = arith.constant 40 : index
    %c0_99 = arith.constant 0 : index
    %516 = vector.load %arg4[%c40, %c0_99] : memref<99x256xf32, #tpu.memory_space<vmem>>, vector<1x256xf32>
    %517 = vector.shape_cast %516 : vector<1x256xf32> to vector<256xf32>
    %518 = vector.shape_cast %517 : vector<256xf32> to vector<1x256xf32>
    %519 = arith.mulf %515, %518 : vector<1x256xf32>
    %520 = vector.extract_strided_slice %29 {offsets = [0, 85], sizes = [1, 256], strides = [1, 1]} : vector<1x358xf32> to vector<1x256xf32>
    %c89 = arith.constant 89 : index
    %c0_100 = arith.constant 0 : index
    %521 = vector.load %arg4[%c89, %c0_100] : memref<99x256xf32, #tpu.memory_space<vmem>>, vector<1x256xf32>
    %522 = vector.shape_cast %521 : vector<1x256xf32> to vector<256xf32>
    %523 = vector.shape_cast %522 : vector<256xf32> to vector<1x256xf32>
    %524 = arith.mulf %520, %523 : vector<1x256xf32>
    %525 = arith.addf %519, %524 : vector<1x256xf32>
    %526 = arith.addf %514, %525 : vector<1x256xf32>
    %527 = vector.extract_strided_slice %28 {offsets = [0, 86], sizes = [1, 256], strides = [1, 1]} : vector<1x358xf32> to vector<1x256xf32>
    %c41 = arith.constant 41 : index
    %c0_101 = arith.constant 0 : index
    %528 = vector.load %arg4[%c41, %c0_101] : memref<99x256xf32, #tpu.memory_space<vmem>>, vector<1x256xf32>
    %529 = vector.shape_cast %528 : vector<1x256xf32> to vector<256xf32>
    %530 = vector.shape_cast %529 : vector<256xf32> to vector<1x256xf32>
    %531 = arith.mulf %527, %530 : vector<1x256xf32>
    %532 = vector.extract_strided_slice %29 {offsets = [0, 86], sizes = [1, 256], strides = [1, 1]} : vector<1x358xf32> to vector<1x256xf32>
    %c90 = arith.constant 90 : index
    %c0_102 = arith.constant 0 : index
    %533 = vector.load %arg4[%c90, %c0_102] : memref<99x256xf32, #tpu.memory_space<vmem>>, vector<1x256xf32>
    %534 = vector.shape_cast %533 : vector<1x256xf32> to vector<256xf32>
    %535 = vector.shape_cast %534 : vector<256xf32> to vector<1x256xf32>
    %536 = arith.mulf %532, %535 : vector<1x256xf32>
    %537 = arith.addf %531, %536 : vector<1x256xf32>
    %538 = arith.addf %526, %537 : vector<1x256xf32>
    %539 = vector.extract_strided_slice %28 {offsets = [0, 96], sizes = [1, 256], strides = [1, 1]} : vector<1x358xf32> to vector<1x256xf32>
    %c42 = arith.constant 42 : index
    %c0_103 = arith.constant 0 : index
    %540 = vector.load %arg4[%c42, %c0_103] : memref<99x256xf32, #tpu.memory_space<vmem>>, vector<1x256xf32>
    %541 = vector.shape_cast %540 : vector<1x256xf32> to vector<256xf32>
    %542 = vector.shape_cast %541 : vector<256xf32> to vector<1x256xf32>
    %543 = arith.mulf %539, %542 : vector<1x256xf32>
    %544 = vector.extract_strided_slice %29 {offsets = [0, 96], sizes = [1, 256], strides = [1, 1]} : vector<1x358xf32> to vector<1x256xf32>
    %c91 = arith.constant 91 : index
    %c0_104 = arith.constant 0 : index
    %545 = vector.load %arg4[%c91, %c0_104] : memref<99x256xf32, #tpu.memory_space<vmem>>, vector<1x256xf32>
    %546 = vector.shape_cast %545 : vector<1x256xf32> to vector<256xf32>
    %547 = vector.shape_cast %546 : vector<256xf32> to vector<1x256xf32>
    %548 = arith.mulf %544, %547 : vector<1x256xf32>
    %549 = arith.addf %543, %548 : vector<1x256xf32>
    %550 = arith.addf %538, %549 : vector<1x256xf32>
    %551 = vector.extract_strided_slice %28 {offsets = [0, 97], sizes = [1, 256], strides = [1, 1]} : vector<1x358xf32> to vector<1x256xf32>
    %c43 = arith.constant 43 : index
    %c0_105 = arith.constant 0 : index
    %552 = vector.load %arg4[%c43, %c0_105] : memref<99x256xf32, #tpu.memory_space<vmem>>, vector<1x256xf32>
    %553 = vector.shape_cast %552 : vector<1x256xf32> to vector<256xf32>
    %554 = vector.shape_cast %553 : vector<256xf32> to vector<1x256xf32>
    %555 = arith.mulf %551, %554 : vector<1x256xf32>
    %556 = vector.extract_strided_slice %29 {offsets = [0, 97], sizes = [1, 256], strides = [1, 1]} : vector<1x358xf32> to vector<1x256xf32>
    %c92 = arith.constant 92 : index
    %c0_106 = arith.constant 0 : index
    %557 = vector.load %arg4[%c92, %c0_106] : memref<99x256xf32, #tpu.memory_space<vmem>>, vector<1x256xf32>
    %558 = vector.shape_cast %557 : vector<1x256xf32> to vector<256xf32>
    %559 = vector.shape_cast %558 : vector<256xf32> to vector<1x256xf32>
    %560 = arith.mulf %556, %559 : vector<1x256xf32>
    %561 = arith.addf %555, %560 : vector<1x256xf32>
    %562 = arith.addf %550, %561 : vector<1x256xf32>
    %563 = vector.extract_strided_slice %28 {offsets = [0, 98], sizes = [1, 256], strides = [1, 1]} : vector<1x358xf32> to vector<1x256xf32>
    %c44 = arith.constant 44 : index
    %c0_107 = arith.constant 0 : index
    %564 = vector.load %arg4[%c44, %c0_107] : memref<99x256xf32, #tpu.memory_space<vmem>>, vector<1x256xf32>
    %565 = vector.shape_cast %564 : vector<1x256xf32> to vector<256xf32>
    %566 = vector.shape_cast %565 : vector<256xf32> to vector<1x256xf32>
    %567 = arith.mulf %563, %566 : vector<1x256xf32>
    %568 = vector.extract_strided_slice %29 {offsets = [0, 98], sizes = [1, 256], strides = [1, 1]} : vector<1x358xf32> to vector<1x256xf32>
    %c93 = arith.constant 93 : index
    %c0_108 = arith.constant 0 : index
    %569 = vector.load %arg4[%c93, %c0_108] : memref<99x256xf32, #tpu.memory_space<vmem>>, vector<1x256xf32>
    %570 = vector.shape_cast %569 : vector<1x256xf32> to vector<256xf32>
    %571 = vector.shape_cast %570 : vector<256xf32> to vector<1x256xf32>
    %572 = arith.mulf %568, %571 : vector<1x256xf32>
    %573 = arith.addf %567, %572 : vector<1x256xf32>
    %574 = arith.addf %562, %573 : vector<1x256xf32>
    %575 = vector.extract_strided_slice %28 {offsets = [0, 99], sizes = [1, 256], strides = [1, 1]} : vector<1x358xf32> to vector<1x256xf32>
    %c45 = arith.constant 45 : index
    %c0_109 = arith.constant 0 : index
    %576 = vector.load %arg4[%c45, %c0_109] : memref<99x256xf32, #tpu.memory_space<vmem>>, vector<1x256xf32>
    %577 = vector.shape_cast %576 : vector<1x256xf32> to vector<256xf32>
    %578 = vector.shape_cast %577 : vector<256xf32> to vector<1x256xf32>
    %579 = arith.mulf %575, %578 : vector<1x256xf32>
    %580 = vector.extract_strided_slice %29 {offsets = [0, 99], sizes = [1, 256], strides = [1, 1]} : vector<1x358xf32> to vector<1x256xf32>
    %c94 = arith.constant 94 : index
    %c0_110 = arith.constant 0 : index
    %581 = vector.load %arg4[%c94, %c0_110] : memref<99x256xf32, #tpu.memory_space<vmem>>, vector<1x256xf32>
    %582 = vector.shape_cast %581 : vector<1x256xf32> to vector<256xf32>
    %583 = vector.shape_cast %582 : vector<256xf32> to vector<1x256xf32>
    %584 = arith.mulf %580, %583 : vector<1x256xf32>
    %585 = arith.addf %579, %584 : vector<1x256xf32>
    %586 = arith.addf %574, %585 : vector<1x256xf32>
    %587 = vector.extract_strided_slice %28 {offsets = [0, 100], sizes = [1, 256], strides = [1, 1]} : vector<1x358xf32> to vector<1x256xf32>
    %c46 = arith.constant 46 : index
    %c0_111 = arith.constant 0 : index
    %588 = vector.load %arg4[%c46, %c0_111] : memref<99x256xf32, #tpu.memory_space<vmem>>, vector<1x256xf32>
    %589 = vector.shape_cast %588 : vector<1x256xf32> to vector<256xf32>
    %590 = vector.shape_cast %589 : vector<256xf32> to vector<1x256xf32>
    %591 = arith.mulf %587, %590 : vector<1x256xf32>
    %592 = vector.extract_strided_slice %29 {offsets = [0, 100], sizes = [1, 256], strides = [1, 1]} : vector<1x358xf32> to vector<1x256xf32>
    %c95 = arith.constant 95 : index
    %c0_112 = arith.constant 0 : index
    %593 = vector.load %arg4[%c95, %c0_112] : memref<99x256xf32, #tpu.memory_space<vmem>>, vector<1x256xf32>
    %594 = vector.shape_cast %593 : vector<1x256xf32> to vector<256xf32>
    %595 = vector.shape_cast %594 : vector<256xf32> to vector<1x256xf32>
    %596 = arith.mulf %592, %595 : vector<1x256xf32>
    %597 = arith.addf %591, %596 : vector<1x256xf32>
    %598 = arith.addf %586, %597 : vector<1x256xf32>
    %599 = vector.extract_strided_slice %28 {offsets = [0, 101], sizes = [1, 256], strides = [1, 1]} : vector<1x358xf32> to vector<1x256xf32>
    %c47 = arith.constant 47 : index
    %c0_113 = arith.constant 0 : index
    %600 = vector.load %arg4[%c47, %c0_113] : memref<99x256xf32, #tpu.memory_space<vmem>>, vector<1x256xf32>
    %601 = vector.shape_cast %600 : vector<1x256xf32> to vector<256xf32>
    %602 = vector.shape_cast %601 : vector<256xf32> to vector<1x256xf32>
    %603 = arith.mulf %599, %602 : vector<1x256xf32>
    %604 = vector.extract_strided_slice %29 {offsets = [0, 101], sizes = [1, 256], strides = [1, 1]} : vector<1x358xf32> to vector<1x256xf32>
    %c96 = arith.constant 96 : index
    %c0_114 = arith.constant 0 : index
    %605 = vector.load %arg4[%c96, %c0_114] : memref<99x256xf32, #tpu.memory_space<vmem>>, vector<1x256xf32>
    %606 = vector.shape_cast %605 : vector<1x256xf32> to vector<256xf32>
    %607 = vector.shape_cast %606 : vector<256xf32> to vector<1x256xf32>
    %608 = arith.mulf %604, %607 : vector<1x256xf32>
    %609 = arith.addf %603, %608 : vector<1x256xf32>
    %610 = arith.addf %598, %609 : vector<1x256xf32>
    %611 = vector.extract_strided_slice %28 {offsets = [0, 102], sizes = [1, 256], strides = [1, 1]} : vector<1x358xf32> to vector<1x256xf32>
    %c48 = arith.constant 48 : index
    %c0_115 = arith.constant 0 : index
    %612 = vector.load %arg4[%c48, %c0_115] : memref<99x256xf32, #tpu.memory_space<vmem>>, vector<1x256xf32>
    %613 = vector.shape_cast %612 : vector<1x256xf32> to vector<256xf32>
    %614 = vector.shape_cast %613 : vector<256xf32> to vector<1x256xf32>
    %615 = arith.mulf %611, %614 : vector<1x256xf32>
    %616 = vector.extract_strided_slice %29 {offsets = [0, 102], sizes = [1, 256], strides = [1, 1]} : vector<1x358xf32> to vector<1x256xf32>
    %c97 = arith.constant 97 : index
    %c0_116 = arith.constant 0 : index
    %617 = vector.load %arg4[%c97, %c0_116] : memref<99x256xf32, #tpu.memory_space<vmem>>, vector<1x256xf32>
    %618 = vector.shape_cast %617 : vector<1x256xf32> to vector<256xf32>
    %619 = vector.shape_cast %618 : vector<256xf32> to vector<1x256xf32>
    %620 = arith.mulf %616, %619 : vector<1x256xf32>
    %621 = arith.addf %615, %620 : vector<1x256xf32>
    %622 = arith.addf %610, %621 : vector<1x256xf32>
    %623 = arith.negf %622 : vector<1x256xf32>
    %624 = math.exp %623 : vector<1x256xf32>
    %cst_117 = arith.constant 1.000000e+00 : f32
    %625 = vector.broadcast %cst_117 : f32 to vector<1x256xf32>
    %626 = arith.addf %625, %624 : vector<1x256xf32>
    %627 = arith.divf %625, %626 : vector<1x256xf32>
    %628 = vector.shape_cast %627 : vector<1x256xf32> to vector<1x1x256xf32>
    %629 = vector.broadcast %628 : vector<1x1x256xf32> to vector<1x16x256xf32>
    %630 = arith.mulf %22, %629 : vector<1x16x256xf32>
    %c0_118 = arith.constant 0 : index
    %c0_119 = arith.constant 0 : index
    %c0_120 = arith.constant 0 : index
    %631 = vector.load %arg1[%c0_118, %c0_119, %c0_120] : memref<1x16x256xf32, #tpu.memory_space<vmem>>, vector<1x16x256xf32>
    %632 = arith.addf %630, %631 : vector<1x16x256xf32>
    %c0_121 = arith.constant 0 : index
    %c0_122 = arith.constant 0 : index
    %c0_123 = arith.constant 0 : index
    %633 = vector.load %arg5[%c0_121, %c0_122, %c0_123] : memref<1x16x256xf32, #tpu.memory_space<vmem>>, vector<1x16x256xf32>
    tpu.vector_store %arg5[%c0_121, %c0_122, %c0_123], %632 {strides = array<i32>} : memref<1x16x256xf32, #tpu.memory_space<vmem>>, vector<1x16x256xf32>,
    return
  }
  func.func @transform_0(%arg0: i32) -> (i32, i32, i32) {
    %c0_i32 = arith.constant 0 : i32
    %c0_i32_0 = arith.constant 0 : i32
    %c0_i32_1 = arith.constant 0 : i32
    return %arg0, %c0_i32, %c0_i32_0 : i32, i32, i32
  }
  func.func @transform_1(%arg0: i32) -> (i32, i32) {
    %c0_i32 = arith.constant 0 : i32
    %c0_i32_0 = arith.constant 0 : i32
    %c0_i32_1 = arith.constant 0 : i32
    return %c0_i32, %c0_i32_0 : i32, i32
  }
  func.func @transform_2(%arg0: i32) -> (i32, i32) {
    %c0_i32 = arith.constant 0 : i32
    %c0_i32_0 = arith.constant 0 : i32
    %c0_i32_1 = arith.constant 0 : i32
    return %c0_i32, %c0_i32_0 : i32, i32
  }
  func.func @transform_3(%arg0: i32) -> (i32, i32) {
    %c0_i32 = arith.constant 0 : i32
    %c0_i32_0 = arith.constant 0 : i32
    %c0_i32_1 = arith.constant 0 : i32
    return %c0_i32, %c0_i32_0 : i32, i32
  }
  func.func @transform_4(%arg0: i32) -> (i32, i32, i32) {
    %c0_i32 = arith.constant 0 : i32
    %c0_i32_0 = arith.constant 0 : i32
    %c0_i32_1 = arith.constant 0 : i32
    return %arg0, %c0_i32, %c0_i32_0 : i32, i32, i32
  }
}

</mosaic_0001>

<bundles_post_ra>
// kernel: cbam_forward.1
= control target key start
LH: loop header
LB: loop body
LE: loop exit
PB: predicated region body
PF: predicated region fallthrough
CT: control target
= control target key end

     0   :  { %s4882_s15 = smov 0   ;;  %s8225_s0 = inlined_call_operand.vmem [shape: f32[2,16,256], index: 0, kind: input, shape index: {}]   ;;  %s8226_s1 = inlined_call_operand.vmem [shape: f32[16,2], index: 1, kind: input, shape index: {}]   ;;  %s8227_s2 = inlined_call_operand.vmem [shape: f32[2,16], index: 2, kind: input, shape index: {}]   ;;  %s8228_s3 = inlined_call_operand.vmem [shape: f32[99,256], index: 3, kind: input, shape index: {}]   ;;  %s8229_s4 = inlined_call_operand.vmem [shape: f32[2,16,256], index: 4, kind: output, shape index: {}]  }
   0x1 LB: > { %s4499_s16 = sadd.s32 4294967295, %s4760_s15   ;;  %p4503_p0 = scmp.ge.s32.totalorder %s4760_s15, 1  ;;  %s4760_s15 = sphi %s4882_s15, %s14_s15  }
   0x2   : > { %p162_p1 = scmp.lt.s32.totalorder %s4760_s15, 3 }
   0x4   : > { %p163_p2 = pnand %p4503_p0, %p162_p1 }
   0x6   : > { %166 = sbr.rel (%p163_p2) target bundleno = 1279 (0x4ff), region = 36 }
   0xd   : > { %p188_p3 = scmp.lt.s32.totalorder %s4499_s16, 1  ;;  %v218_v0 = vlaneseq  ;;  %v246_v14 = vld [vmem:[%s8226_s1] sm:$0xff]  ;;  %v247_v15 = vld [vmem:[%s8226_s1 + $0x8] sm:$0xff]  ;;  %v4762_v17 = vmov 0.0|0.0   ;;  %vm4763_vm0 = vmmov 0   ;;  %v4764_v20 = vmov 0.0  }
   0xe   : > { %v4633_v16 = vpack.c.bf16 %v247_v15, %v246_v14  ;;  %4632 = vmatprep.subr.bf16.mxu0 %v4762_v17  ;;  %4624 = vmatprep.mubr.msk.f32.mxu0 %vm4763_vm0, %v4764_v20  ;;  %v4514_v21 = vld [vmem:[%s8228_s3 + $0x1] ss:$8 sm:$0x3]  ;;  %s4765_s27 = smov 1   ;;  %vm229_vm1 = vcmask 130112   ;;  %vm244_vm2 = vcmask 1040384  }
   0xf   : > { %s9420_s16 = smov (!%p188_p3, %s4499_s16), 1  ;;  %v219_v1 = vand.u32 127, %v218_v0  ;;  %v4892_v2 = vshrl.u32 %v218_v0, 7  ;;  %4627 = vmatprep.subr.mxu1 %v4764_v20  ;;  %4629 = vmatprep.mubr.msk.f32.mxu1 %vm4763_vm0, %v4764_v20  ;;  %vm248_vm3 = vcmask 130048   ;;  %v323_v38 = vld [vmem:[%s8227_s2] sm:$0x3] }
  0x10   : > { %s4613_s17 = sshll.u32 %s9420_s16, 5  ;;  %4634 = vmatpush3.bf16.msra.mxu0 %v4633_v16  ;;  %v4515_v37 = vld [vmem:[%s8228_s3 + $0x62] ss:$8 sm:$0x3]  ;;  %vm328_vm4 = vcmask 1041408   ;;  %s4766_s10 = smov 2  }
  0x11   : > { %v222_v3 = vsub.s32 %v219_v1, %v4892_v2  ;;  %s4901_s20 = scalar_lea.vmem %s8225_s0, %s4613_s17  ;;  %v224_v12 = vadd.s32 4294967288, %v219_v1  ;;  %v4915_v18 = vsub.s32 0, %v4892_v2  ;;  %v4918_v19 = vsub.s32 1, %v4892_v2  ;;  %4628 = vmatpush3.msk.msra.mxu1 %vm328_vm4, %v323_v38  ;;  %v4516_v41 = vld [vmem:[%s8228_s3 + $0x2] ss:$8 sm:$0x3] }
  0x12   : > { %v198_v4 = vld [vmem:[%s4901_s20] sm:$0xff]  ;;  %v199_v5 = vld [vmem:[%s4901_s20 + $0x8] sm:$0xff]  ;;  %v200_v6 = vld [vmem:[%s4901_s20 + $0x10] sm:$0xff]  ;;  %s4767_s18 = smov 3   ;;  %s4768_s24 = smov 4   ;;  %vm324_vm5 = vcmask 15360  }
  0x13   : > { %v208_v7 = vadd.f32 %v199_v5, %v198_v4  ;;  %v202_v8 = vmax.f32 %v198_v4, %v199_v5  ;;  %v201_v9 = vld [vmem:[%s4901_s20 + $0x18] sm:$0xff]  ;;  %v227_v13 = vsub.s32 %v224_v12, %v4892_v2  ;;  %8435 = vst [vmem:[#allocation2_spill] sm:$0xff] %v4915_v18  ;;  %8436 = vst [vmem:[#allocation3_spill] sm:$0xff] %v4918_v19  ;;  %v4517_v44 = vld [vmem:[%s8228_s3 + $0x63] ss:$8 sm:$0x3] }
  0x14   : > { %v211_v10 = vadd.f32 %v201_v9, %v200_v6  ;;  %v205_v11 = vmax.f32 %v200_v6, %v201_v9  ;;  %v541_v22 = vrot.slane %v4514_v21, %v4915_v18  ;;  %v545_v23 = vrot.slane %v4514_v21, %v4918_v19  ;;  %v4518_v47 = vld [vmem:[%s8228_s3 + $0x3] ss:$8 sm:$0x3]  ;;  %v4519_v50 = vld [vmem:[%s8228_s3 + $0x64] ss:$8 sm:$0x3] }
  0x15   : > { %209 = vadd.xlane.f32.xlu0 %v208_v7  ;;  %203 = vmax.xlane.f32.xlu1 %v202_v8  ;;  %v564_v39 = vrot.slane %v4515_v37, %v4915_v18  ;;  %v568_v40 = vrot.slane %v4515_v37, %v4918_v19  ;;  %v626_v42 = vrot.slane %v4516_v41, %v4918_v19  ;;  %v4520_v53 = vld [vmem:[%s8228_s3 + $0x4] ss:$8 sm:$0x3]  ;;  %v4521_v56 = vld [vmem:[%s8228_s3 + $0x65] ss:$8 sm:$0x3] }
  0x16   : > { %v622_v43 = vrot.slane %v4516_v41, %v4915_v18  ;;  %v648_v45 = vrot.slane %v4517_v44, %v4918_v19  ;;  %v644_v46 = vrot.slane %v4517_v44, %v4915_v18  ;;  %v702_v48 = vrot.slane %v4518_v47, %v4915_v18  ;;  %v4522_v59 = vld [vmem:[%s8228_s3 + $0x5] ss:$8 sm:$0x3]  ;;  %v4523_v62 = vld [vmem:[%s8228_s3 + $0x66] ss:$8 sm:$0x3] }
  0x17   : > { %v706_v49 = vrot.slane %v4518_v47, %v4918_v19  ;;  %v725_v51 = vrot.slane %v4519_v50, %v4915_v18  ;;  %v729_v52 = vrot.slane %v4519_v50, %v4918_v19  ;;  %v787_v54 = vrot.slane %v4520_v53, %v4918_v19  ;;  %s4769_s29 = smov 5   ;;  %v4524_v1 = vld [vmem:[%s8228_s3 + $0x6] ss:$8 sm:$0x3]  ;;  %s4770_s8 = smov 6  }
  0x18   : > { %v783_v55 = vrot.slane %v4520_v53, %v4915_v18  ;;  %v810_v57 = vrot.slane %v4521_v56, %v4918_v19  ;;  %v806_v58 = vrot.slane %v4521_v56, %v4915_v18  ;;  %v864_v60 = vrot.slane %v4522_v59, %v4915_v18  ;;  %v4525_v5 = vld [vmem:[%s8228_s3 + $0x67] ss:$8 sm:$0x3]  ;;  %s4771_s13 = smov 16   ;;  %s4772_s22 = smov 17  }
  0x19   : > { %212 = vadd.xlane.f32.xlu0 %v211_v10  ;;  %206 = vmax.xlane.f32.xlu1 %v205_v11  ;;  %v868_v61 = vrot.slane %v4522_v59, %v4918_v19  ;;  %v887_v63 = vrot.slane %v4523_v62, %v4915_v18  ;;  %v891_v0 = vrot.slane %v4523_v62, %v4918_v19  ;;  %v4526_v8 = vld [vmem:[%s8228_s3 + $0x7] ss:$8 sm:$0x3]  ;;  %v4527_v11 = vld [vmem:[%s8228_s3 + $0x70] ss:$8 sm:$0x3] }
  0x1a   : > { %v945_v4 = vrot.slane %v4524_v1, %v4915_v18  ;;  %v972_v6 = vrot.slane %v4525_v5, %v4918_v19  ;;  %v968_v7 = vrot.slane %v4525_v5, %v4915_v18  ;;  %v1026_v9 = vrot.slane %v4526_v8, %v4915_v18  ;;  %v4528_v14 = vld [vmem:[%s8228_s3 + $0x10] ss:$8 sm:$0x3]  ;;  %v4529_v17 = vld [vmem:[%s8228_s3 + $0x71] ss:$8 sm:$0x3] }
  0x1b   : > { %v1030_v10 = vrot.slane %v4526_v8, %v4918_v19  ;;  %v1048_v12 = vrot.slane %v4527_v11, %v4915_v18  ;;  %v1110_v15 = vrot.slane %v4528_v14, %v4918_v19  ;;  %v1106_v16 = vrot.slane %v4528_v14, %v4915_v18  ;;  %s4774_s6 = smov 19   ;;  %v4535_v37 = vld [vmem:[%s8228_s3 + $0x74] ss:$8 sm:$0x3]  ;;  %s4775_s11 = smov 20  }
  0x1c   : > { %v1133_v20 = vrot.slane %v4529_v17, %v4918_v19  ;;  %v1129_v21 = vrot.slane %v4529_v17, %v4915_v18  ;;  %v1372_v38 = vrot.slane %v4535_v37, %v4915_v18  ;;  %s4776_s19 = smov 21   ;;  %s4777_s25 = smov 22   ;;  %v4546_v8 = vld [vmem:[%s8228_s3 + $0x21] ss:$8 sm:$0x3]  ;;  %vm550_vm6 = vcmask 7168  }
  0x1d   : > { %s4778_s30 = smov 32   ;;  %s4779_s9 = smov 33   ;;  %v4548_v17 = vld [vmem:[%s8228_s3 + $0x22] ss:$8 sm:$0x3]  ;;  %vm711_vm7 = vcmask 23552  }
  0x1e   : > { %s4780_s14 = smov 34   ;;  %s4781_s23 = smov 35   ;;  %vm792_vm8 = vcmask 31744   ;;  %vm873_vm9 = vcmask 39936   ;;  %vm954_vm10 = vcmask 48128   ;;  %vm1115_vm11 = vcmask 138240  }
  0x1f   : > { %s4782_s28 = smov 36   ;;  %s4787_s7 = smov 50   ;;  %vm1196_vm12 = vcmask 146432   ;;  %vm1277_vm13 = vcmask 154624   ;;  %vm1358_vm14 = vcmask 162816   ;;  %vm1439_vm15 = vcmask 171008  }
  0x20   : > { %s4788_s12 = smov 51   ;;  %s4789_s21 = smov 52   ;;  %vm1520_vm0 = vcmask 179200   ;;  %vm1844_vm4 = vcmask 285696  }
  0x21   : > { %s4794_s26 = smov 66   ;;  %s4798_s5 = smov 70  }
  0x2a   : > { %548 = vrot.lane.b32.xlu1 %v545_v23, %s4765_s27 }
  0x2e   : > { %571 = vrot.lane.b32.xlu1 %v568_v40, %s4765_s27  ;;  %v4536_v40 = vld [vmem:[%s8228_s3 + $0x14] ss:$8 sm:$0x3] }
  0x2f   : > { %546 = vrot.lane.b32.xlu0 %v541_v22, %s4765_s27  ;;  %v4530_v22 = vld [vmem:[%s8228_s3 + $0x11] ss:$8 sm:$0x3]  ;;  %v1434_v41 = vrot.slane %v4536_v40, %v4918_v19 }
  0x30   : > { %v1187_v23 = vrot.slane %v4530_v22, %v4915_v18 }
  0x32   : > { %627 = vrot.lane.b32.xlu1 %v622_v43, %s4766_s10  ;;  %v4537_v43 = vld [vmem:[%s8228_s3 + $0x75] ss:$8 sm:$0x3] }
  0x33   : > { %569 = vrot.lane.b32.xlu0 %v564_v39, %s4765_s27  ;;  %s4773_s27 = smov 18   ;;  %v1376_v39 = vrot.slane %v4535_v37, %v4918_v19  ;;  %v1457_v44 = vrot.slane %v4537_v43, %v4918_v19 }
  0x36   : > { %649 = vrot.lane.b32.xlu1 %v644_v46, %s4766_s10  ;;  %v4538_v46 = vld [vmem:[%s8228_s3 + $0x15] ss:$8 sm:$0x3] }
  0x37   : > { %629 = vrot.lane.b32.xlu0 %v626_v42, %s4766_s10  ;;  %v1430_v42 = vrot.slane %v4536_v40, %v4915_v18  ;;  %v1511_v47 = vrot.slane %v4538_v46, %v4915_v18 }
  0x3a   : > { %709 = vrot.lane.b32.xlu1 %v706_v49, %s4767_s18  ;;  %v4539_v49 = vld [vmem:[%s8228_s3 + $0x76] ss:$8 sm:$0x3] }
  0x3b   : > { %651 = vrot.lane.b32.xlu0 %v648_v45, %s4766_s10  ;;  %v1453_v45 = vrot.slane %v4537_v43, %v4915_v18  ;;  %v1534_v50 = vrot.slane %v4539_v49, %v4915_v18  ;;  %v4553_v43 = vld [vmem:[%s8228_s3 + $0x85] ss:$8 sm:$0x3]  ;;  %s4792_s10 = smov 64  }
  0x3e   : > { %732 = vrot.lane.b32.xlu1 %v729_v52, %s4767_s18  ;;  %v4540_v52 = vld [vmem:[%s8228_s3 + $0x16] ss:$8 sm:$0x3] }
  0x3f   : > { %707 = vrot.lane.b32.xlu0 %v702_v48, %s4767_s18  ;;  %v1515_v48 = vrot.slane %v4538_v46, %v4918_v19  ;;  %v1596_v53 = vrot.slane %v4540_v52, %v4918_v19  ;;  %v2101_v46 = vrot.slane %v4553_v43, %v4915_v18 }
  0x42   : > { %788 = vrot.lane.b32.xlu1 %v783_v55, %s4768_s24  ;;  %v4541_v55 = vld [vmem:[%s8228_s3 + $0x77] ss:$8 sm:$0x3] }
  0x43   : > { %730 = vrot.lane.b32.xlu0 %v725_v51, %s4767_s18  ;;  %v1538_v51 = vrot.slane %v4539_v49, %v4918_v19  ;;  %v1619_v56 = vrot.slane %v4541_v55, %v4918_v19  ;;  %s4796_s18 = smov 68  }
  0x46   : > { %811 = vrot.lane.b32.xlu1 %v806_v58, %s4768_s24  ;;  %v4542_v58 = vld [vmem:[%s8228_s3 + $0x17] ss:$8 sm:$0x3] }
  0x47   : > { %790 = vrot.lane.b32.xlu0 %v787_v54, %s4768_s24  ;;  %v1592_v54 = vrot.slane %v4540_v52, %v4915_v18  ;;  %v1673_v59 = vrot.slane %v4542_v58, %v4915_v18  ;;  %v4555_v52 = vld [vmem:[%s8228_s3 + $0x86] ss:$8 sm:$0x3] }
  0x4a   : > { %871 = vrot.lane.b32.xlu1 %v868_v61, %s4769_s29  ;;  %v4543_v61 = vld [vmem:[%s8228_s3 + $0x80] ss:$8 sm:$0x3] }
  0x4b   : > { %813 = vrot.lane.b32.xlu0 %v810_v57, %s4768_s24  ;;  %v1615_v57 = vrot.slane %v4541_v55, %v4915_v18  ;;  %v1696_v62 = vrot.slane %v4543_v61, %v4915_v18  ;;  %v2186_v55 = vrot.slane %v4555_v52, %v4918_v19  ;;  %s4824_s24 = smov 107  }
  0x4e   : > { %894 = vrot.lane.b32.xlu1 %v891_v0, %s4769_s29  ;;  %v4544_v0 = vld [vmem:[%s8228_s3 + $0x20] ss:$8 sm:$0x3] }
  0x4f   : > { %869 = vrot.lane.b32.xlu0 %v864_v60, %s4769_s29  ;;  %v1677_v60 = vrot.slane %v4542_v58, %v4918_v19 }
  0x52   : > { %950 = vrot.lane.b32.xlu1 %v945_v4, %s4770_s8  ;;  %v4545_v4 = vld [vmem:[%s8228_s3 + $0x81] ss:$8 sm:$0x3] }
  0x53   : > { %892 = vrot.lane.b32.xlu0 %v887_v63, %s4769_s29  ;;  %v1700_v63 = vrot.slane %v4543_v61, %v4918_v19  ;;  %s4830_s29 = smov 93  }
  0x56   : > { %973 = vrot.lane.b32.xlu1 %v968_v7, %s4770_s8  ;;  %v1777_v7 = vrot.slane %v4545_v4, %v4915_v18 }
  0x5a   : > { %1033 = vrot.lane.b32.xlu1 %v1030_v10, %s4771_s13  ;;  %v1835_v10 = vrot.slane %v4546_v8, %v4915_v18 }
  0xa2   : > { %v210_v24 = vpop.xlane.xlu0 %209  ;;  %v204_v25 = vpop.xlane.xlu1 %203 }
  0xa3   : > { %v214_v26 = vmul.f32 0.00390625, %v210_v24  ;;  %v223_v29 = vrot.slane %v204_v25, %v222_v3  ;;  %v1191_v24 = vrot.slane %v4530_v22, %v4918_v19  ;;  %v4531_v25 = vld [vmem:[%s8228_s3 + $0x72] ss:$8 sm:$0x3] }
  0xa5   : > { %v237_v32 = vrot.slane %v214_v26, %v222_v3  ;;  %v949_v3 = vrot.slane %v4524_v1, %v4918_v19  ;;  %v1210_v26 = vrot.slane %v4531_v25, %v4915_v18  ;;  %v1758_v1 = vrot.slane %v4544_v0, %v4918_v19 }
  0xa6   : > { %v213_v27 = vpop.xlane.xlu0 %212  ;;  %v207_v28 = vpop.xlane.xlu1 %206 }
  0xa7   : > { %v215_v30 = vmul.f32 0.00390625, %v213_v27  ;;  %v228_v31 = vrot.slane %v207_v28, %v227_v13  ;;  %952 = vrot.lane.b32.xlu0 %v949_v3, %s4770_s8  ;;  %v1214_v27 = vrot.slane %v4531_v25, %v4918_v19  ;;  %v4532_v28 = vld [vmem:[%s8228_s3 + $0x12] ss:$8 sm:$0x3]  ;;  %v1754_v3 = vrot.slane %v4544_v0, %v4915_v18 }
  0xa8   : > { %v1916_v25 = vrot.slane %v4548_v17, %v4915_v18 }
  0xa9   : > { %v241_v33 = vrot.slane %v215_v30, %v227_v13  ;;  %v230_v34 = vsel %vm229_vm1, %v228_v31, %v223_v29  ;;  %v1052_v13 = vrot.slane %v4527_v11, %v4918_v19  ;;  %v1272_v29 = vrot.slane %v4532_v28, %v4918_v19  ;;  %v4533_v31 = vld [vmem:[%s8228_s3 + $0x73] ss:$8 sm:$0x3] }
  0xaa   : > { %v1268_v30 = vrot.slane %v4532_v28, %v4915_v18  ;;  %v5086_v5 = vpop.permute.xlu1 %548  ;;  %v1839_v11 = vrot.slane %v4546_v8, %v4918_v19 }
  0xab   : > { %v242_v35 = vsel %vm229_vm1, %v241_v33, %v237_v32  ;;  %975 = vrot.lane.b32.xlu0 %v972_v6, %s4770_s8  ;;  %1055 = vrot.lane.b32.xlu1 %v1052_v13, %s4771_s13  ;;  %v1295_v32 = vrot.slane %v4533_v31, %v4918_v19  ;;  %v1291_v33 = vrot.slane %v4533_v31, %v4915_v18  ;;  %v5100_v13 = vpop.permute.xlu0 %546  ;;  %s4783_s8 = smov 37   ;;  %vm1601_vm1 = vcmask 261120  }
  0xac   : > { %v245_v36 = vsel %vm244_vm2, %v230_v34, %v242_v35  ;;  %v4534_v34 = vld [vmem:[%s8228_s3 + $0x13] ss:$8 sm:$0x3]  ;;  %8437 = vst [vmem:[#allocation4_spill] sm:$0xff] %v5086_v5  ;;  %v1781_v6 = vrot.slane %v4545_v4, %v4918_v19  ;;  %vm1682_vm2 = vcmask 269312  }
  0xad   : > { %4625 = vmatmul.mubr.msk.f32.vlgmr.msra.gmra.mrb[0].mxu0 %vm248_vm3, %v245_v36  ;;  %v1349_v35 = vrot.slane %v4534_v34, %v4915_v18  ;;  %v1353_v36 = vrot.slane %v4534_v34, %v4918_v19  ;;  %v4551_v34 = vld [vmem:[%s8228_s3 + $0x84] ss:$8 sm:$0x3] }
  0xae   : > { %v2020_v37 = vrot.slane %v4551_v34, %v4915_v18 }
  0xaf   : > { %1031 = vrot.lane.b32.xlu0 %v1026_v9, %s4771_s13  ;;  %1111 = vrot.lane.b32.xlu1 %v1106_v16, %s4772_s22  ;;  %v5093_v9 = vpop.permute.xlu1 %571 }
  0xb0   : > { %8438 = vst [vmem:[#allocation5_spill] sm:$0xff] %v5093_v9 }
  0xb3   : > { %1053 = vrot.lane.b32.xlu0 %v1048_v12, %s4771_s13  ;;  %1134 = vrot.lane.b32.xlu1 %v1129_v21, %s4772_s22  ;;  %v4547_v12 = vld [vmem:[%s8228_s3 + $0x82] ss:$8 sm:$0x3]  ;;  %v5107_v22 = vpop.permute.xlu1 %627  ;;  %s4784_s13 = smov 38  }
  0xb4   : > { %v1858_v14 = vrot.slane %v4547_v12, %v4915_v18  ;;  %v1862_v16 = vrot.slane %v4547_v12, %v4918_v19  ;;  %v4560_v12 = vld [vmem:[%s8228_s3 + $0x30] ss:$8 sm:$0x3] }
  0xb7   : > { %1113 = vrot.lane.b32.xlu0 %v1110_v15, %s4772_s22  ;;  %1194 = vrot.lane.b32.xlu1 %v1191_v24, %s4773_s27  ;;  %v1920_v24 = vrot.slane %v4548_v17, %v4918_v19  ;;  %v2402_v17 = vrot.slane %v4560_v12, %v4915_v18 }
  0xbb   : > { %1136 = vrot.lane.b32.xlu0 %v1133_v20, %s4772_s22  ;;  %1217 = vrot.lane.b32.xlu1 %v1214_v27, %s4773_s27  ;;  %v5117_v27 = vpop.permute.xlu1 %649  ;;  %s4785_s22 = smov 48  }
  0xbc   : > { %8440 = vst [vmem:[#allocation7_spill] sm:$0xff] %v5117_v27 }
  0xbf   : > { %1192 = vrot.lane.b32.xlu0 %v1187_v23, %s4773_s27  ;;  %1273 = vrot.lane.b32.xlu1 %v1268_v30, %s4774_s6  ;;  %v5110_v23 = vpop.permute.xlu0 %569  ;;  %v4550_v30 = vld [vmem:[%s8228_s3 + $0x23] ss:$8 sm:$0x3] }
  0xc0   : > { %8439 = vst [vmem:[#allocation6_spill] sm:$0xff] %v5110_v23 }
  0xc3   : > { %1215 = vrot.lane.b32.xlu0 %v1210_v26, %s4773_s27  ;;  %1296 = vrot.lane.b32.xlu1 %v1291_v33, %s4774_s6  ;;  %v4549_v26 = vld [vmem:[%s8228_s3 + $0x83] ss:$8 sm:$0x3]  ;;  %v5124_v31 = vpop.permute.xlu0 %629  ;;  %v2001_v33 = vrot.slane %v4550_v30, %v4918_v19  ;;  %s4786_s27 = smov 49  }
  0xc4   : > { %v1943_v28 = vrot.slane %v4549_v26, %v4918_v19  ;;  %8441 = vst [vmem:[#allocation8_spill] sm:$0xff] %v5124_v31 }
  0xc7   : > { %1275 = vrot.lane.b32.xlu0 %v1272_v29, %s4774_s6  ;;  %1356 = vrot.lane.b32.xlu1 %v1353_v36, %s4775_s11  ;;  %v1939_v29 = vrot.slane %v4549_v26, %v4915_v18  ;;  %v5133_v36 = vpop.permute.xlu0 %651  ;;  %v4562_v26 = vld [vmem:[%s8228_s3 + $0x31] ss:$8 sm:$0x3] }
  0xc8   : > { %8443 = vst [vmem:[#allocation10_spill] sm:$0xff] %v5133_v36 }
  0xcb   : > { %1298 = vrot.lane.b32.xlu0 %v1295_v32, %s4774_s6  ;;  %1379 = vrot.lane.b32.xlu1 %v1376_v39, %s4775_s11  ;;  %v1997_v32 = vrot.slane %v4550_v30, %v4915_v18  ;;  %v4552_v39 = vld [vmem:[%s8228_s3 + $0x24] ss:$8 sm:$0x3]  ;;  %v2486_v30 = vrot.slane %v4562_v26, %v4918_v19  ;;  %s4814_s6 = smov 126  }
  0xcf   : > { %1354 = vrot.lane.b32.xlu0 %v1349_v35, %s4775_s11  ;;  %1435 = vrot.lane.b32.xlu1 %v1430_v42, %s4776_s19  ;;  %v5131_v35 = vpop.permute.xlu1 %709  ;;  %v2078_v42 = vrot.slane %v4552_v39, %v4915_v18 }
  0xd0   : > { %8442 = vst [vmem:[#allocation9_spill] sm:$0xff] %v5131_v35 }
  0xd3   : > { %1377 = vrot.lane.b32.xlu0 %v1372_v38, %s4775_s11  ;;  %1458 = vrot.lane.b32.xlu1 %v1453_v45, %s4776_s19  ;;  %v2024_v38 = vrot.slane %v4551_v34, %v4918_v19  ;;  %v5140_v40 = vpop.permute.xlu1 %732  ;;  %v2105_v45 = vrot.slane %v4553_v43, %v4918_v19  ;;  %s4799_s11 = smov 80  }
  0xd4   : > { %8444 = vst [vmem:[#allocation11_spill] sm:$0xff] %v5140_v40 }
  0xd7   : > { %1437 = vrot.lane.b32.xlu0 %v1434_v41, %s4776_s19  ;;  %1518 = vrot.lane.b32.xlu1 %v1515_v48, %s4777_s25  ;;  %v2082_v41 = vrot.slane %v4552_v39, %v4918_v19  ;;  %v5154_v48 = vpop.permute.xlu1 %788  ;;  %v4564_v39 = vld [vmem:[%s8228_s3 + $0x32] ss:$8 sm:$0x3] }
  0xd8   : > { %v2563_v43 = vrot.slane %v4564_v39, %v4915_v18 }
  0xdb   : > { %1460 = vrot.lane.b32.xlu0 %v1457_v44, %s4776_s19  ;;  %1541 = vrot.lane.b32.xlu1 %v1538_v51, %s4777_s25  ;;  %v5147_v44 = vpop.permute.xlu0 %707  ;;  %s4793_s19 = smov 65  }
  0xdf   : > { %1516 = vrot.lane.b32.xlu0 %v1511_v47, %s4777_s25  ;;  %1597 = vrot.lane.b32.xlu1 %v1592_v54, %s4778_s30  ;;  %v4554_v47 = vld [vmem:[%s8228_s3 + $0x25] ss:$8 sm:$0x3]  ;;  %v5156_v49 = vpop.permute.xlu0 %730  ;;  %v2182_v54 = vrot.slane %v4555_v52, %v4915_v18 }
  0xe0   : > { %8445 = vst [vmem:[#allocation12_spill] sm:$0xff] %v5156_v49  ;;  %v2163_v51 = vrot.slane %v4554_v47, %v4918_v19 }
  0xe3   : > { %1539 = vrot.lane.b32.xlu0 %v1534_v50, %s4777_s25  ;;  %1620 = vrot.lane.b32.xlu1 %v1615_v57, %s4778_s30  ;;  %v2159_v50 = vrot.slane %v4554_v47, %v4915_v18  ;;  %v5172_v57 = vpop.permute.xlu0 %790  ;;  %s4797_s25 = smov 69  }
  0xe4   : > { %8447 = vst [vmem:[#allocation14_spill] sm:$0xff] %v5172_v57 }
  0xe7   : > { %1599 = vrot.lane.b32.xlu0 %v1596_v53, %s4778_s30  ;;  %1680 = vrot.lane.b32.xlu1 %v1677_v60, %s4779_s9  ;;  %v5163_v53 = vpop.permute.xlu1 %811  ;;  %v4557_v60 = vld [vmem:[%s8228_s3 + $0x87] ss:$8 sm:$0x3] }
  0xe8   : > { %8446 = vst [vmem:[#allocation13_spill] sm:$0xff] %v5163_v53  ;;  %v2263_v0 = vrot.slane %v4557_v60, %v4915_v18 }
  0xeb   : > { %1622 = vrot.lane.b32.xlu0 %v1619_v56, %s4778_s30  ;;  %1703 = vrot.lane.b32.xlu1 %v1700_v63, %s4779_s9  ;;  %v4556_v56 = vld [vmem:[%s8228_s3 + $0x26] ss:$8 sm:$0x3]  ;;  %v5181_v61 = vpop.permute.xlu1 %871  ;;  %v2267_v63 = vrot.slane %v4557_v60, %v4918_v19 }
  0xec   : > { %v2244_v58 = vrot.slane %v4556_v56, %v4918_v19  ;;  %8448 = vst [vmem:[#allocation15_spill] sm:$0xff] %v5181_v61 }
  0xef   : > { %1678 = vrot.lane.b32.xlu0 %v1673_v59, %s4779_s9  ;;  %1759 = vrot.lane.b32.xlu1 %v1754_v3, %s4780_s14  ;;  %v2240_v59 = vrot.slane %v4556_v56, %v4915_v18  ;;  %v5190_v3 = vpop.permute.xlu1 %894 }
  0xf0   : > { %8450 = vst [vmem:[#allocation17_spill] sm:$0xff] %v5190_v3 }
  0xf3   : > { %1701 = vrot.lane.b32.xlu0 %v1696_v62, %s4779_s9  ;;  %1782 = vrot.lane.b32.xlu1 %v1777_v7, %s4780_s14  ;;  %v5183_v62 = vpop.permute.xlu0 %813  ;;  %v4559_v7 = vld [vmem:[%s8228_s3 + $0x90] ss:$8 sm:$0x3]  ;;  %s4806_s9 = smov 96  }
  0xf4   : > { %8449 = vst [vmem:[#allocation16_spill] sm:$0xff] %v5183_v62 }
  0xf7   : > { %1761 = vrot.lane.b32.xlu0 %v1758_v1, %s4780_s14  ;;  %1842 = vrot.lane.b32.xlu1 %v1839_v11, %s4781_s23  ;;  %v4558_v1 = vld [vmem:[%s8228_s3 + $0x27] ss:$8 sm:$0x3]  ;;  %v5197_v8 = vpop.permute.xlu0 %869  ;;  %v2348_v11 = vrot.slane %v4559_v7, %v4918_v19 }
  0xf8   : > { %v2321_v4 = vrot.slane %v4558_v1, %v4915_v18 }
  0xfb   : > { %1784 = vrot.lane.b32.xlu0 %v1781_v6, %s4780_s14  ;;  %1865 = vrot.lane.b32.xlu1 %v1862_v16, %s4781_s23  ;;  %v2325_v6 = vrot.slane %v4558_v1, %v4918_v19  ;;  %v2406_v16 = vrot.slane %v4560_v12, %v4918_v19  ;;  %v4568_v1 = vld [vmem:[%s8228_s3 + $0x34] ss:$8 sm:$0x3]  ;;  %s4819_s14 = smov 123  }
  0xff   : > { %1840 = vrot.lane.b32.xlu0 %v1835_v10, %s4781_s23  ;;  %1921 = vrot.lane.b32.xlu1 %v1916_v25, %s4782_s28  ;;  %v2344_v10 = vrot.slane %v4559_v7, %v4915_v18  ;;  %v2725_v7 = vrot.slane %v4568_v1, %v4915_v18 }
 0x103   : > { %1863 = vrot.lane.b32.xlu0 %v1858_v14, %s4781_s23  ;;  %1944 = vrot.lane.b32.xlu1 %v1939_v29, %s4782_s28  ;;  %v5204_v14 = vpop.permute.xlu1 %950  ;;  %v2482_v29 = vrot.slane %v4562_v26, %v4915_v18  ;;  %s4823_s23 = smov 110  }
 0x107   : > { %1923 = vrot.lane.b32.xlu0 %v1920_v24, %s4782_s28  ;;  %2004 = vrot.lane.b32.xlu1 %v2001_v33, %s4783_s8 }
 0x10b   : > { %1946 = vrot.lane.b32.xlu0 %v1943_v28, %s4782_s28  ;;  %2027 = vrot.lane.b32.xlu1 %v2024_v38, %s4783_s8  ;;  %s4829_s28 = smov 92  }
 0x10f   : > { %2002 = vrot.lane.b32.xlu0 %v1997_v32, %s4783_s8  ;;  %2083 = vrot.lane.b32.xlu1 %v2078_v42, %s4784_s13  ;;  %v4563_v32 = vld [vmem:[%s8228_s3 + $0x92] ss:$8 sm:$0x3]  ;;  %v2567_v42 = vrot.slane %v4564_v39, %v4918_v19  ;;  %v4572_v39 = vld [vmem:[%s8228_s3 + $0x36] ss:$8 sm:$0x3] }
 0x110   : > { %v2509_v38 = vrot.slane %v4563_v32, %v4918_v19 }
 0x113   : > { %2025 = vrot.lane.b32.xlu0 %v2020_v37, %s4783_s8  ;;  %2106 = vrot.lane.b32.xlu1 %v2101_v46, %s4784_s13  ;;  %v2505_v37 = vrot.slane %v4563_v32, %v4915_v18  ;;  %s4795_s8 = smov 67  }
 0x117   : > { %2085 = vrot.lane.b32.xlu0 %v2082_v41, %s4784_s13  ;;  %2166 = vrot.lane.b32.xlu1 %v2163_v51, %s4785_s22  ;;  %v4566_v51 = vld [vmem:[%s8228_s3 + $0x33] ss:$8 sm:$0x3] }
 0x118   : > { %v2648_v56 = vrot.slane %v4566_v51, %v4918_v19 }
 0x11b   : > { %2108 = vrot.lane.b32.xlu0 %v2105_v45, %s4784_s13  ;;  %2189 = vrot.lane.b32.xlu1 %v2186_v55, %s4785_s22  ;;  %v4565_v45 = vld [vmem:[%s8228_s3 + $0x93] ss:$8 sm:$0x3]  ;;  %v2644_v55 = vrot.slane %v4566_v51, %v4915_v18  ;;  %s4818_s13 = smov 122  }
 0x11c   : > { %v2590_v47 = vrot.slane %v4565_v45, %v4918_v19 }
 0x11f   : > { %2164 = vrot.lane.b32.xlu0 %v2159_v50, %s4785_s22  ;;  %2245 = vrot.lane.b32.xlu1 %v2240_v59, %s4786_s27  ;;  %v2586_v50 = vrot.slane %v4565_v45, %v4915_v18 }
 0x123   : > { %2187 = vrot.lane.b32.xlu0 %v2182_v54, %s4785_s22  ;;  %2268 = vrot.lane.b32.xlu1 %v2263_v0, %s4786_s27 }
 0x127   : > { %2247 = vrot.lane.b32.xlu0 %v2244_v58, %s4786_s27  ;;  %2328 = vrot.lane.b32.xlu1 %v2325_v6, %s4787_s7  ;;  %v4567_v58 = vld [vmem:[%s8228_s3 + $0x94] ss:$8 sm:$0x3]  ;;  %v2729_v6 = vrot.slane %v4568_v1, %v4918_v19  ;;  %v5329_v1 = vld [vmem:[%s8228_s3 + $0xa0] ss:$8 sm:$0x3] }
 0x128   : > { %v2667_v60 = vrot.slane %v4567_v58, %v4915_v18 }
 0x12b   : > { %2270 = vrot.lane.b32.xlu0 %v2267_v63, %s4786_s27  ;;  %2351 = vrot.lane.b32.xlu1 %v2348_v11, %s4787_s7  ;;  %s4790_s27 = smov 53   ;;  %v2671_v63 = vrot.slane %v4567_v58, %v4918_v19  ;;  %v4569_v11 = vld [vmem:[%s8228_s3 + $0x95] ss:$8 sm:$0x3] }
 0x12c   : > { %v2752_v12 = vrot.slane %v4569_v11, %v4918_v19 }
 0x12f   : > { %2326 = vrot.lane.b32.xlu0 %v2321_v4, %s4787_s7  ;;  %2407 = vrot.lane.b32.xlu1 %v2402_v17, %s4788_s12 }
 0x133   : > { %2349 = vrot.lane.b32.xlu0 %v2344_v10, %s4787_s7  ;;  %s4791_s7 = smov 54  }
 0x137   : > { %2409 = vrot.lane.b32.xlu0 %v2406_v16, %s4788_s12  ;;  %v2748_v16 = vrot.slane %v4569_v11, %v4915_v18 }
 0x180   : > { %v318_v15 = vpop.f32.mrb[0].mxu0 }
 0x181   : > { %v322_v20 = vmax.f32 %v318_v15, 0.0  ;;  %v4626_v21 = vpop.f32.mrb[1].mxu0  ;;  %v5206_v15 = vpop.permute.xlu0 %892 }
 0x182   : > { %8451 = vst [vmem:[#allocation18_spill] sm:$0xff] %v5206_v15  ;;  %v5213_v21 = vpop.permute.xlu1 %973 }
 0x183   : > { %4630 = vmatmul.mubr.msk.f32.vlgmr.msra.gmra.mrb[0].mxu1 %vm324_vm5, %v322_v20  ;;  %v4561_v20 = vld [vmem:[%s8228_s3 + $0x91] ss:$8 sm:$0x3]  ;;  %8452 = vst [vmem:[#allocation19_spill] sm:$0xff] %v5213_v21 }
 0x184   : > { %v2428_v24 = vrot.slane %v4561_v20, %v4918_v19  ;;  %v2424_v25 = vrot.slane %v4561_v20, %v4915_v18  ;;  %v4570_v20 = vld [vmem:[%s8228_s3 + $0x35] ss:$8 sm:$0x3] }
 0x185   : > { %v5222_v28 = vpop.permute.xlu0 %952  ;;  %v2805_v26 = vrot.slane %v4570_v20, %v4915_v18 }
 0x186   : > { %8453 = vst [vmem:[#allocation20_spill] sm:$0xff] %v5222_v28  ;;  %2431 = vrot.lane.b32.xlu0 %v2428_v24, %s4788_s12  ;;  %2429 = vrot.lane.b32.xlu1 %v2424_v25, %s4788_s12  ;;  %v5231_v33 = vpop.permute.xlu1 %1033  ;;  %v2809_v25 = vrot.slane %v4570_v20, %v4918_v19 }
 0x187   : > { %8454 = vst [vmem:[#allocation21_spill] sm:$0xff] %v5231_v33 }
 0x189   : > { %v5233_v34 = vpop.permute.xlu0 %975 }
 0x18a   : > { %8455 = vst [vmem:[#allocation22_spill] sm:$0xff] %v5233_v34  ;;  %2487 = vrot.lane.b32.xlu0 %v2482_v29, %s4789_s21  ;;  %2489 = vrot.lane.b32.xlu1 %v2486_v30, %s4789_s21  ;;  %v5240_v41 = vpop.permute.xlu1 %1055  ;;  %v4571_v29 = vld [vmem:[%s8228_s3 + $0x96] ss:$8 sm:$0x3] }
 0x18b   : > { %8456 = vst [vmem:[#allocation23_spill] sm:$0xff] %v5240_v41  ;;  %v2832_v32 = vrot.slane %v4571_v29, %v4918_v19 }
 0x18d   : > { %v5247_v46 = vpop.permute.xlu0 %1031 }
 0x18e   : > { %2510 = vrot.lane.b32.xlu0 %v2505_v37, %s4789_s21  ;;  %2512 = vrot.lane.b32.xlu1 %v2509_v38, %s4789_s21  ;;  %v5254_v52 = vpop.permute.xlu1 %1111  ;;  %v2828_v37 = vrot.slane %v4571_v29, %v4915_v18  ;;  %s4800_s21 = smov 81  }
 0x191   : > { %v5256_v54 = vpop.permute.xlu0 %1053 }
 0x192   : > { %2570 = vrot.lane.b32.xlu0 %v2567_v42, %s4790_s27  ;;  %2568 = vrot.lane.b32.xlu1 %v2563_v43, %s4790_s27  ;;  %8457 = vst [vmem:[#allocation24_spill] sm:$0xff] %v5256_v54  ;;  %v5263_v59 = vpop.permute.xlu1 %1134  ;;  %v2890_v42 = vrot.slane %v4572_v39, %v4918_v19  ;;  %v2886_v43 = vrot.slane %v4572_v39, %v4915_v18 }
 0x193   : > { %8458 = vst [vmem:[#allocation25_spill] sm:$0xff] %v5263_v59 }
 0x195   : > { %v5267_v0 = vpop.permute.xlu0 %1113 }
 0x196   : > { %2593 = vrot.lane.b32.xlu0 %v2590_v47, %s4790_s27  ;;  %2591 = vrot.lane.b32.xlu1 %v2586_v50, %s4790_s27  ;;  %8459 = vst [vmem:[#allocation26_spill] sm:$0xff] %v5267_v0  ;;  %v5272_v4 = vpop.permute.xlu1 %1194  ;;  %v4573_v47 = vld [vmem:[%s8228_s3 + $0x97] ss:$8 sm:$0x3]  ;;  %s4801_s27 = smov 82  }
 0x197   : > { %8460 = vst [vmem:[#allocation27_spill] sm:$0xff] %v5272_v4  ;;  %v2913_v51 = vrot.slane %v4573_v47, %v4918_v19 }
 0x199   : > { %v5276_v10 = vpop.permute.xlu0 %1136 }
 0x19a   : > { %2649 = vrot.lane.b32.xlu0 %v2644_v55, %s4791_s7  ;;  %2651 = vrot.lane.b32.xlu1 %v2648_v56, %s4791_s7  ;;  %8461 = vst [vmem:[#allocation28_spill] sm:$0xff] %v5276_v10  ;;  %v5285_v17 = vpop.permute.xlu1 %1217  ;;  %v2909_v55 = vrot.slane %v4573_v47, %v4915_v18  ;;  %v4574_v56 = vld [vmem:[%s8228_s3 + $0x37] ss:$8 sm:$0x3] }
 0x19b   : > { %8462 = vst [vmem:[#allocation29_spill] sm:$0xff] %v5285_v17  ;;  %v2971_v58 = vrot.slane %v4574_v56, %v4918_v19 }
 0x19d   : > { %v5292_v24 = vpop.permute.xlu0 %1192 }
 0x19e   : > { %2672 = vrot.lane.b32.xlu0 %v2667_v60, %s4791_s7  ;;  %2674 = vrot.lane.b32.xlu1 %v2671_v63, %s4791_s7  ;;  %v5299_v30 = vpop.permute.xlu1 %1273  ;;  %v2967_v60 = vrot.slane %v4574_v56, %v4915_v18  ;;  %s4802_s7 = smov 83  }
 0x19f   : > { %8463 = vst [vmem:[#allocation30_spill] sm:$0xff] %v5299_v30 }
 0x1a1   : > { %v5303_v38 = vpop.permute.xlu0 %1215 }
 0x1a2   : > { %2732 = vrot.lane.b32.xlu0 %v2729_v6, %s4792_s10  ;;  %2730 = vrot.lane.b32.xlu1 %v2725_v7, %s4792_s10  ;;  %8464 = vst [vmem:[#allocation31_spill] sm:$0xff] %v5303_v38  ;;  %v5310_v45 = vpop.permute.xlu1 %1296  ;;  %v2990_v7 = vrot.slane %v5329_v1, %v4915_v18 }
 0x1a3   : > { %8465 = vst [vmem:[#allocation32_spill] sm:$0xff] %v5310_v45 }
 0x1a5   : > { %v5315_v50 = vpop.permute.xlu0 %1275 }
 0x1a6   : > { %2755 = vrot.lane.b32.xlu0 %v2752_v12, %s4792_s10  ;;  %2753 = vrot.lane.b32.xlu1 %v2748_v16, %s4792_s10  ;;  %8466 = vst [vmem:[#allocation33_spill] sm:$0xff] %v5315_v50  ;;  %v5324_v63 = vpop.permute.xlu1 %1356 }
 0x1a7   : > { %8467 = vst [vmem:[#allocation34_spill] sm:$0xff] %v5324_v63 }
 0x1a9   : > { %v5331_v6 = vpop.permute.xlu0 %1298 }
 0x1aa   : > { %2812 = vrot.lane.b32.xlu0 %v2809_v25, %s4793_s19  ;;  %2810 = vrot.lane.b32.xlu1 %v2805_v26, %s4793_s19  ;;  %8468 = vst [vmem:[#allocation35_spill] sm:$0xff] %v5331_v6  ;;  %v5337_v11 = vpop.permute.xlu1 %1379 }
 0x1ab   : > { %8469 = vst [vmem:[#allocation36_spill] sm:$0xff] %v5337_v11 }
 0x1ad   : > { %v5340_v12 = vpop.permute.xlu0 %1354 }
 0x1ae   : > { %2835 = vrot.lane.b32.xlu0 %v2832_v32, %s4793_s19  ;;  %2833 = vrot.lane.b32.xlu1 %v2828_v37, %s4793_s19  ;;  %8470 = vst [vmem:[#allocation37_spill] sm:$0xff] %v5340_v12  ;;  %v5342_v16 = vpop.permute.xlu1 %1435  ;;  %s4821_s19 = smov 112  }
 0x1af   : > { %8471 = vst [vmem:[#allocation38_spill] sm:$0xff] %v5342_v16 }
 0x1b1   : > { %v5344_v20 = vpop.permute.xlu0 %1377 }
 0x1b2   : > { %2893 = vrot.lane.b32.xlu0 %v2890_v42, %s4794_s26  ;;  %2891 = vrot.lane.b32.xlu1 %v2886_v43, %s4794_s26  ;;  %8472 = vst [vmem:[#allocation39_spill] sm:$0xff] %v5344_v20  ;;  %v5346_v25 = vpop.permute.xlu1 %1458 }
 0x1b3   : > { %8473 = vst [vmem:[#allocation40_spill] sm:$0xff] %v5346_v25 }
 0x1b5   : > { %v5348_v26 = vpop.permute.xlu0 %1437 }
 0x1b6   : > { %2916 = vrot.lane.b32.xlu0 %v2913_v51, %s4794_s26  ;;  %2914 = vrot.lane.b32.xlu1 %v2909_v55, %s4794_s26  ;;  %8474 = vst [vmem:[#allocation41_spill] sm:$0xff] %v5348_v26  ;;  %v5350_v29 = vpop.permute.xlu1 %1518  ;;  %s4826_s26 = smov 106  }
 0x1b7   : > { %8475 = vst [vmem:[#allocation42_spill] sm:$0xff] %v5350_v29 }
 0x1b9   : > { %v5352_v32 = vpop.permute.xlu0 %1460 }
 0x1ba   : > { %2974 = vrot.lane.b32.xlu0 %v2971_v58, %s4795_s8  ;;  %2972 = vrot.lane.b32.xlu1 %v2967_v60, %s4795_s8  ;;  %8476 = vst [vmem:[#allocation43_spill] sm:$0xff] %v5352_v32  ;;  %v5354_v37 = vpop.permute.xlu1 %1541 }
 0x1bb   : > { %8477 = vst [vmem:[#allocation44_spill] sm:$0xff] %v5354_v37 }
 0x1bd   : > { %v5356_v39 = vpop.permute.xlu0 %1516 }
 0x1be   : > { %2995 = vrot.lane.b32.xlu1 %v2990_v7, %s4795_s8  ;;  %8478 = vst [vmem:[#allocation45_spill] sm:$0xff] %v5356_v39  ;;  %v5358_v42 = vpop.permute.xlu1 %1597 }
 0x1bf   : > { %8479 = vst [vmem:[#allocation46_spill] sm:$0xff] %v5358_v42 }
 0x1c1   : > { %v5360_v43 = vpop.permute.xlu0 %1539 }
 0x1c2   : > { %8480 = vst [vmem:[#allocation47_spill] sm:$0xff] %v5360_v43  ;;  %v5362_v47 = vpop.permute.xlu1 %1620 }
 0x1c3   : > { %8481 = vst [vmem:[#allocation48_spill] sm:$0xff] %v5362_v47 }
 0x1c5   : > { %v5364_v51 = vpop.permute.xlu0 %1599 }
 0x1c6   : > { %8482 = vst [vmem:[#allocation49_spill] sm:$0xff] %v5364_v51  ;;  %v5366_v55 = vpop.permute.xlu1 %1680 }
 0x1c7   : > { %8483 = vst [vmem:[#allocation50_spill] sm:$0xff] %v5366_v55 }
 0x1c9   : > { %v5368_v56 = vpop.permute.xlu0 %1622 }
 0x1ca   : > { %8484 = vst [vmem:[#allocation51_spill] sm:$0xff] %v5368_v56  ;;  %v5370_v58 = vpop.permute.xlu1 %1703 }
 0x1cb   : > { %8485 = vst [vmem:[#allocation52_spill] sm:$0xff] %v5370_v58 }
 0x1cd   : > { %v5372_v60 = vpop.permute.xlu0 %1678 }
 0x1ce   : > { %8486 = vst [vmem:[#allocation53_spill] sm:$0xff] %v5372_v60  ;;  %v5374_v7 = vpop.permute.xlu1 %1759 }
 0x1cf   : > { %8487 = vst [vmem:[#allocation54_spill] sm:$0xff] %v5374_v7 }
 0x1d1   : > { %v5376_v37 = vpop.permute.xlu0 %1701 }
 0x1d2   : > { %8488 = vst [vmem:[#allocation55_spill] sm:$0xff] %v5376_v37  ;;  %v5378_v39 = vpop.permute.xlu1 %1782 }
 0x1d3   : > { %8489 = vst [vmem:[#allocation56_spill] sm:$0xff] %v5378_v39 }
 0x1d5   : > { %v5380_v42 = vpop.permute.xlu0 %1761 }
 0x1d6   : > { %8490 = vst [vmem:[#allocation57_spill] sm:$0xff] %v5380_v42  ;;  %v5382_v43 = vpop.permute.xlu1 %1842 }
 0x1d7   : > { %8491 = vst [vmem:[#allocation58_spill] sm:$0xff] %v5382_v43 }
 0x1d9   : > { %v5384_v47 = vpop.permute.xlu0 %1784 }
 0x1da   : > { %8492 = vst [vmem:[#allocation59_spill] sm:$0xff] %v5384_v47  ;;  %v5386_v51 = vpop.permute.xlu1 %1865 }
 0x1db   : > { %8493 = vst [vmem:[#allocation60_spill] sm:$0xff] %v5386_v51 }
 0x1dd   : > { %v5388_v55 = vpop.permute.xlu0 %1840 }
 0x1de   : > { %8494 = vst [vmem:[#allocation61_spill] sm:$0xff] %v5388_v55  ;;  %v5390_v56 = vpop.permute.xlu1 %1921 }
 0x1df   : > { %8495 = vst [vmem:[#allocation62_spill] sm:$0xff] %v5390_v56 }
 0x1e1   : > { %v5392_v58 = vpop.permute.xlu0 %1863 }
 0x1e2   : > { %8496 = vst [vmem:[#allocation63_spill] sm:$0xff] %v5392_v58  ;;  %v5394_v60 = vpop.permute.xlu1 %1944 }
 0x1e3   : > { %8497 = vst [vmem:[#allocation64_spill] sm:$0xff] %v5394_v60 }
 0x1e5   : > { %v5396_v7 = vpop.permute.xlu0 %1923 }
 0x1e6   : > { %8498 = vst [vmem:[#allocation65_spill] sm:$0xff] %v5396_v7  ;;  %v5398_v37 = vpop.permute.xlu1 %2004 }
 0x1e7   : > { %8499 = vst [vmem:[#allocation66_spill] sm:$0xff] %v5398_v37 }
 0x1e9   : > { %v5400_v39 = vpop.permute.xlu0 %1946 }
 0x1ea   : > { %8500 = vst [vmem:[#allocation67_spill] sm:$0xff] %v5400_v39  ;;  %v5402_v42 = vpop.permute.xlu1 %2027 }
 0x1eb   : > { %8501 = vst [vmem:[#allocation68_spill] sm:$0xff] %v5402_v42 }
 0x1ed   : > { %v5404_v43 = vpop.permute.xlu0 %2002 }
 0x1ee   : > { %8502 = vst [vmem:[#allocation69_spill] sm:$0xff] %v5404_v43  ;;  %v5406_v25 = vpop.permute.xlu1 %2083 }
 0x1ef   : > { %8503 = vst [vmem:[#allocation70_spill] sm:$0xff] %v5406_v25 }
 0x1f1   : > { %v5408_v58 = vpop.permute.xlu0 %2025 }
 0x1f2   : > { %8504 = vst [vmem:[#allocation71_spill] sm:$0xff] %v5408_v58  ;;  %v5410_v60 = vpop.permute.xlu1 %2106 }
 0x1f3   : > { %8505 = vst [vmem:[#allocation72_spill] sm:$0xff] %v5410_v60 }
 0x1f5   : > { %v5412_v7 = vpop.permute.xlu0 %2085 }
 0x1f6   : > { %8506 = vst [vmem:[#allocation73_spill] sm:$0xff] %v5412_v7  ;;  %v5414_v37 = vpop.permute.xlu1 %2166 }
 0x1f7   : > { %8507 = vst [vmem:[#allocation74_spill] sm:$0xff] %v5414_v37 }
 0x1f9   : > { %v5416_v42 = vpop.permute.xlu0 %2108 }
 0x1fa   : > { %8508 = vst [vmem:[#allocation75_spill] sm:$0xff] %v5416_v42  ;;  %v5418_v32 = vpop.permute.xlu1 %2189 }
 0x1fb   : > { %8509 = vst [vmem:[#allocation76_spill] sm:$0xff] %v5418_v32 }
 0x256   : > { %v398_v47 = vpop.f32.mrb[0].mxu1 }
 0x257   : > { %v403_v51 = vrot.slane %v398_v47, 1  ;;  %v4631_v29 = vpop.f32.mrb[1].mxu1 }
 0x258   : > { %v5420_v29 = vpop.permute.xlu0 %2164 }
 0x259   : > { %v405_v55 = vadd.f32 %v403_v51, %v398_v47  ;;  %8510 = vst [vmem:[#allocation77_spill] sm:$0xff] %v5420_v29  ;;  %v5422_v47 = vpop.permute.xlu1 %2245 }
 0x25a   : > { %8511 = vst [vmem:[#allocation78_spill] sm:$0xff] %v5422_v47  ;;  %v4577_v47 = vld [vmem:[%s8228_s3 + $0xa1] ss:$8 sm:$0x3] }
 0x25b   : > { %v4511_v56 = vmul.f32 -1.442695, %v405_v55  ;;  %v3075_v60 = vrot.slane %v4577_v47, %v4918_v19 }
 0x25c   : > { %v5424_v51 = vpop.permute.xlu0 %2187 }
 0x25d   : > { %4738 = vpow2.f32 %v4511_v56  ;;  %8512 = vst [vmem:[#allocation79_spill] sm:$0xff] %v5424_v51  ;;  %v4576_v56 = vld [vmem:[%s8228_s3 + $0x40] ss:$8 sm:$0x3] }
 0x25e   : > { %v3048_v32 = vrot.slane %v4576_v56, %v4915_v18  ;;  %v3052_v29 = vrot.slane %v4576_v56, %v4918_v19 }
 0x260   : > { %v5438_v51 = vpop.permute.xlu0 %2247 }
 0x261   : > { %8514 = vst [vmem:[#allocation81_spill] sm:$0xff] %v5438_v51 }
 0x267   : > { %v4739_v39 = vpop.eup %4738 }
 0x268   : > { %v409_v43 = vadd.f32 1.0, %v4739_v39  ;;  %v2994_v39 = vrot.slane %v5329_v1, %v4918_v19  ;;  %v4578_v1 = vld [vmem:[%s8228_s3 + $0x41] ss:$8 sm:$0x3] }
 0x269   : > { %v3133_v51 = vrot.slane %v4578_v1, %v4918_v19 }
 0x26a   : > { %4740 = vrcp.f32 %v409_v43  ;;  %v5432_v43 = vpop.permute.xlu1 %2268 }
 0x26b   : > { %8513 = vst [vmem:[#allocation80_spill] sm:$0xff] %v5432_v43  ;;  %v5448_v43 = vpop.permute.xlu0 %2270 }
 0x26c   : > { %8516 = vst [vmem:[#allocation83_spill] sm:$0xff] %v5448_v43 }
 0x274   : > { %v4741_v55 = vpop.eup %4740 }
 0x275   : > { %v415_v37 = vrot.slane %v4741_v55, %v4915_v18  ;;  %v5446_v55 = vpop.permute.xlu1 %2328 }
 0x276   : > { %8515 = vst [vmem:[#allocation82_spill] sm:$0xff] %v5446_v55 }
 0x277   : > { %417 = vbcast.lane.b32.xlu0 %v415_v37, 256  ;;  %421 = vbcast.lane.b32.xlu1 %v415_v37, 264  ;;  %v3071_v37 = vrot.slane %v4577_v47, %v4915_v18  ;;  %v5462_v47 = vpop.permute.xlu0 %2326 }
 0x278   : > { %8518 = vst [vmem:[#allocation85_spill] sm:$0xff] %v5462_v47 }
 0x279   : > { %v5455_v56 = vpop.permute.xlu1 %2351 }
 0x27a   : > { %8517 = vst [vmem:[#allocation84_spill] sm:$0xff] %v5455_v56 }
 0x27b   : > { %2997 = vrot.lane.b32.xlu0 %v2994_v39, %s4795_s8  ;;  %3053 = vrot.lane.b32.xlu1 %v3048_v32, %s4796_s18  ;;  %v3129_v39 = vrot.slane %v4578_v1, %v4915_v18  ;;  %v4579_v32 = vld [vmem:[%s8228_s3 + $0xa2] ss:$8 sm:$0x3]  ;;  %s4817_s8 = smov 125  }
 0x27c   : > { %v3152_v55 = vrot.slane %v4579_v32, %v4915_v18 }
 0x27d   : > { %v5469_v1 = vpop.permute.xlu1 %2407 }
 0x27e   : > { %8519 = vst [vmem:[#allocation86_spill] sm:$0xff] %v5469_v1 }
 0x27f   : > { %3055 = vrot.lane.b32.xlu0 %v3052_v29, %s4796_s18  ;;  %3076 = vrot.lane.b32.xlu1 %v3071_v37, %s4796_s18  ;;  %v4580_v29 = vld [vmem:[%s8228_s3 + $0x42] ss:$8 sm:$0x3]  ;;  %v3156_v37 = vrot.slane %v4579_v32, %v4918_v19 }
 0x280   : > { %v3210_v43 = vrot.slane %v4580_v29, %v4915_v18  ;;  %v3214_v56 = vrot.slane %v4580_v29, %v4918_v19  ;;  %v4583_v29 = vld [vmem:[%s8228_s3 + $0xa4] ss:$8 sm:$0x3] }
 0x281   : > { %v5478_v32 = vpop.permute.xlu1 %2429 }
 0x282   : > { %8521 = vst [vmem:[#allocation88_spill] sm:$0xff] %v5478_v32  ;;  %v3313_v32 = vrot.slane %v4583_v29, %v4915_v18 }
 0x283   : > { %3078 = vrot.lane.b32.xlu0 %v3075_v60, %s4796_s18  ;;  %3134 = vrot.lane.b32.xlu1 %v3129_v39, %s4797_s25  ;;  %v4581_v60 = vld [vmem:[%s8228_s3 + $0xa3] ss:$8 sm:$0x3]  ;;  %v5471_v39 = vpop.permute.xlu0 %2349  ;;  %s4803_s18 = smov 84  }
 0x284   : > { %8520 = vst [vmem:[#allocation87_spill] sm:$0xff] %v5471_v39  ;;  %v3237_v47 = vrot.slane %v4581_v60, %v4918_v19 }
 0x287   : > { %3136 = vrot.lane.b32.xlu0 %v3133_v51, %s4797_s25  ;;  %3157 = vrot.lane.b32.xlu1 %v3152_v55, %s4797_s25  ;;  %v3233_v51 = vrot.slane %v4581_v60, %v4915_v18  ;;  %v4582_v55 = vld [vmem:[%s8228_s3 + $0x43] ss:$8 sm:$0x3]  ;;  %v5493_v60 = vpop.permute.xlu1 %2489 }
 0x288   : > { %v3291_v1 = vrot.slane %v4582_v55, %v4915_v18  ;;  %8523 = vst [vmem:[#allocation90_spill] sm:$0xff] %v5493_v60 }
 0x28b   : > { %3159 = vrot.lane.b32.xlu0 %v3156_v37, %s4797_s25  ;;  %3215 = vrot.lane.b32.xlu1 %v3210_v43, %s4798_s5  ;;  %v5485_v37 = vpop.permute.xlu0 %2409  ;;  %v3295_v43 = vrot.slane %v4582_v55, %v4918_v19  ;;  %v5504_v55 = vpop.permute.xlu1 %2512  ;;  %s4804_s25 = smov 85  }
 0x28c   : > { %8522 = vst [vmem:[#allocation89_spill] sm:$0xff] %v5485_v37  ;;  %v3317_v37 = vrot.slane %v4583_v29, %v4918_v19  ;;  %8525 = vst [vmem:[#allocation92_spill] sm:$0xff] %v5504_v55 }
 0x28f   : > { %3217 = vrot.lane.b32.xlu0 %v3214_v56, %s4798_s5  ;;  %3238 = vrot.lane.b32.xlu1 %v3233_v51, %s4798_s5  ;;  %v4584_v56 = vld [vmem:[%s8228_s3 + $0x44] ss:$8 sm:$0x3]  ;;  %v5495_v51 = vpop.permute.xlu0 %2431 }
 0x290   : > { %8524 = vst [vmem:[#allocation91_spill] sm:$0xff] %v5495_v51  ;;  %v3374_v60 = vrot.slane %v4584_v56, %v4918_v19 }
 0x293   : > { %3240 = vrot.lane.b32.xlu0 %v3237_v47, %s4798_s5  ;;  %3296 = vrot.lane.b32.xlu1 %v3291_v1, %s4799_s11  ;;  %v3370_v47 = vrot.slane %v4584_v56, %v4915_v18  ;;  %v4585_v1 = vld [vmem:[%s8228_s3 + $0xa5] ss:$8 sm:$0x3]  ;;  %v5512_v29 = vpop.permute.xlu0 %2487  ;;  %v5519_v56 = vpop.permute.xlu1 %2568  ;;  %s4805_s5 = smov 86  }
 0x294   : > { %8526 = vst [vmem:[#allocation93_spill] sm:$0xff] %v5512_v29  ;;  %v3397_v51 = vrot.slane %v4585_v1, %v4918_v19  ;;  %8527 = vst [vmem:[#allocation94_spill] sm:$0xff] %v5519_v56 }
 0x297   : > { %3298 = vrot.lane.b32.xlu0 %v3295_v43, %s4799_s11  ;;  %3318 = vrot.lane.b32.xlu1 %v3313_v32, %s4799_s11  ;;  %v3393_v43 = vrot.slane %v4585_v1, %v4915_v18  ;;  %v4586_v32 = vld [vmem:[%s8228_s3 + $0x45] ss:$8 sm:$0x3]  ;;  %v4588_v1 = vld [vmem:[%s8228_s3 + $0x46] ss:$8 sm:$0x3] }
 0x298   : > { %v3451_v55 = vrot.slane %v4586_v32, %v4915_v18  ;;  %v3455_v39 = vrot.slane %v4586_v32, %v4918_v19  ;;  %v3532_v56 = vrot.slane %v4588_v1, %v4915_v18 }
 0x29b   : > { %3320 = vrot.lane.b32.xlu0 %v3317_v37, %s4799_s11  ;;  %3375 = vrot.lane.b32.xlu1 %v3370_v47, %s4800_s21  ;;  %v4587_v37 = vld [vmem:[%s8228_s3 + $0xa6] ss:$8 sm:$0x3]  ;;  %v5521_v47 = vpop.permute.xlu0 %2510 }
 0x29c   : > { %8528 = vst [vmem:[#allocation95_spill] sm:$0xff] %v5521_v47  ;;  %v3478_v29 = vrot.slane %v4587_v37, %v4918_v19 }
 0x29f   : > { %3377 = vrot.lane.b32.xlu0 %v3374_v60, %s4800_s21  ;;  %3398 = vrot.lane.b32.xlu1 %v3393_v43, %s4800_s21  ;;  %v3474_v60 = vrot.slane %v4587_v37, %v4915_v18  ;;  %v5528_v43 = vpop.permute.xlu1 %2591  ;;  %v5535_v32 = vpop.permute.xlu0 %2570 }
 0x2a0   : > { %8529 = vst [vmem:[#allocation96_spill] sm:$0xff] %v5528_v43  ;;  %8530 = vst [vmem:[#allocation97_spill] sm:$0xff] %v5535_v32 }
 0x2a3   : > { %3400 = vrot.lane.b32.xlu0 %v3397_v51, %s4800_s21  ;;  %3456 = vrot.lane.b32.xlu1 %v3451_v55, %s4801_s27  ;;  %v4589_v51 = vld [vmem:[%s8228_s3 + $0xa7] ss:$8 sm:$0x3]  ;;  %v3536_v55 = vrot.slane %v4588_v1, %v4918_v19  ;;  %v5542_v37 = vpop.permute.xlu1 %2651  ;;  %s4807_s21 = smov 97  }
 0x2a4   : > { %v3555_v47 = vrot.slane %v4589_v51, %v4915_v18  ;;  %8531 = vst [vmem:[#allocation98_spill] sm:$0xff] %v5542_v37  ;;  %v3559_v43 = vrot.slane %v4589_v51, %v4918_v19 }
 0x2a7   : > { %3458 = vrot.lane.b32.xlu0 %v3455_v39, %s4801_s27  ;;  %3479 = vrot.lane.b32.xlu1 %v3474_v60, %s4801_s27  ;;  %v4590_v39 = vld [vmem:[%s8228_s3 + $0x47] ss:$8 sm:$0x3]  ;;  %v5544_v60 = vpop.permute.xlu0 %2593  ;;  %v5551_v1 = vpop.permute.xlu1 %2674 }
 0x2a8   : > { %8532 = vst [vmem:[#allocation99_spill] sm:$0xff] %v5544_v60  ;;  %8533 = vst [vmem:[#allocation100_spill] sm:$0xff] %v5551_v1  ;;  %v3617_v32 = vrot.slane %v4590_v39, %v4918_v19 }
 0x2ab   : > { %3481 = vrot.lane.b32.xlu0 %v3478_v29, %s4801_s27  ;;  %3537 = vrot.lane.b32.xlu1 %v3532_v56, %s4802_s7  ;;  %v3613_v29 = vrot.slane %v4590_v39, %v4915_v18  ;;  %v4591_v56 = vld [vmem:[%s8228_s3 + $0xb0] ss:$8 sm:$0x3]  ;;  %v5555_v60 = vpop.permute.xlu0 %2649  ;;  %v5558_v51 = vpop.permute.xlu1 %2730  ;;  %s4808_s27 = smov 98  }
 0x2ac   : > { %v3636_v37 = vrot.slane %v4591_v56, %v4915_v18  ;;  %8534 = vst [vmem:[#allocation101_spill] sm:$0xff] %v5555_v60  ;;  %8535 = vst [vmem:[#allocation102_spill] sm:$0xff] %v5558_v51 }
 0x2af   : > { %3539 = vrot.lane.b32.xlu0 %v3536_v55, %s4802_s7  ;;  %3560 = vrot.lane.b32.xlu1 %v3555_v47, %s4802_s7  ;;  %v3640_v47 = vrot.slane %v4591_v56, %v4918_v19  ;;  %v5560_v55 = vpop.permute.xlu0 %2672  ;;  %v5562_v42 = vpop.permute.xlu1 %2753 }
 0x2b0   : > { %8536 = vst [vmem:[#allocation103_spill] sm:$0xff] %v5560_v55  ;;  %8537 = vst [vmem:[#allocation104_spill] sm:$0xff] %v5562_v42 }
 0x2b3   : > { %3562 = vrot.lane.b32.xlu0 %v3559_v43, %s4802_s7  ;;  %3618 = vrot.lane.b32.xlu1 %v3613_v29, %s4803_s18  ;;  %v5564_v43 = vpop.permute.xlu0 %2732  ;;  %v5566_v39 = vpop.permute.xlu1 %2810  ;;  %s4809_s7 = smov 99  }
 0x2b4   : > { %8538 = vst [vmem:[#allocation105_spill] sm:$0xff] %v5564_v43  ;;  %8539 = vst [vmem:[#allocation106_spill] sm:$0xff] %v5566_v39 }
 0x2b7   : > { %3620 = vrot.lane.b32.xlu0 %v3617_v32, %s4803_s18  ;;  %3641 = vrot.lane.b32.xlu1 %v3636_v37, %s4803_s18  ;;  %v5568_v29 = vpop.permute.xlu0 %2755  ;;  %v5570_v1 = vpop.permute.xlu1 %2833 }
 0x2b8   : > { %8540 = vst [vmem:[#allocation107_spill] sm:$0xff] %v5568_v29  ;;  %8541 = vst [vmem:[#allocation108_spill] sm:$0xff] %v5570_v1 }
 0x2bb   : > { %3643 = vrot.lane.b32.xlu0 %v3640_v47, %s4803_s18  ;;  %v5572_v32 = vpop.permute.xlu0 %2812  ;;  %v5574_v37 = vpop.permute.xlu1 %2891  ;;  %s4810_s18 = smov 100  }
 0x2bc   : > { %8542 = vst [vmem:[#allocation109_spill] sm:$0xff] %v5572_v32  ;;  %8543 = vst [vmem:[#allocation110_spill] sm:$0xff] %v5574_v37  ;;  %v4746_v32 = vld [vmem:[%s4901_s20] sm:$0xff]  ;;  %v4747_v37 = vld [vmem:[%s4901_s20 + $0x8] sm:$0xff] }
 0x2bf   : > { %v5576_v56 = vpop.permute.xlu0 %2835  ;;  %v5578_v47 = vpop.permute.xlu1 %2914 }
 0x2c0   : > { %8544 = vst [vmem:[#allocation111_spill] sm:$0xff] %v5576_v56  ;;  %8545 = vst [vmem:[#allocation112_spill] sm:$0xff] %v5578_v47  ;;  %v4748_v56 = vld [vmem:[%s4901_s20 + $0x10] sm:$0xff] }
 0x2c3   : > { %v5580_v42 = vpop.permute.xlu0 %2893  ;;  %v5582_v51 = vpop.permute.xlu1 %2972 }
 0x2c4   : > { %8546 = vst [vmem:[#allocation113_spill] sm:$0xff] %v5580_v42  ;;  %8547 = vst [vmem:[#allocation114_spill] sm:$0xff] %v5582_v51  ;;  %v4749_v42 = vld [vmem:[%s4901_s20 + $0x18] sm:$0xff] }
 0x2c7   : > { %v5584_v39 = vpop.permute.xlu0 %2916  ;;  %v5586_v43 = vpop.permute.xlu1 %2995 }
 0x2c8   : > { %8548 = vst [vmem:[#allocation115_spill] sm:$0xff] %v5584_v39  ;;  %8549 = vst [vmem:[#allocation116_spill] sm:$0xff] %v5586_v43 }
 0x2cb   : > { %v5588_v29 = vpop.permute.xlu0 %2974 }
 0x2cc   : > { %8550 = vst [vmem:[#allocation117_spill] sm:$0xff] %v5588_v29 }
 0x2e9   : > { %v418_v1 = vpop.permute.xlu0 %417  ;;  %v422_v55 = vpop.permute.xlu1 %421 }
 0x2ea   : > { %v5591_v60 = vmul.f32 %v4746_v32, %v418_v1  ;;  %v5594_v25 = vmul.f32 %v4747_v37, %v418_v1  ;;  %v5597_v47 = vmul.f32 %v4748_v56, %v422_v55  ;;  %v5600_v7 = vmul.f32 %v4749_v42, %v422_v55 }
 0x2ec   : > { %8551 = vst [vmem:[#allocation118_spill] sm:$0xff] %v5591_v60  ;;  %8552 = vst [vmem:[#allocation119_spill] sm:$0xff] %v5594_v25  ;;  %v427_v51 = vmax.f32 %v5591_v60, %v5597_v47  ;;  %v434_v43 = vmax.f32 %v5594_v25, %v5600_v7  ;;  %v441_v29 = vadd.f32 %v5597_v47, %v5591_v60 }
 0x2ed   : > { %8553 = vst [vmem:[#allocation120_spill] sm:$0xff] %v5597_v47  ;;  %8554 = vst [vmem:[#allocation121_spill] sm:$0xff] %v5600_v7  ;;  %v448_v32 = vadd.f32 %v5600_v7, %v5594_v25 }
 0x2ee   : > { %v428_v1 = vrot.slane %v427_v51, 4  ;;  %v435_v37 = vrot.slane %v434_v43, 4  ;;  %v442_v39 = vrot.slane %v441_v29, 4 }
 0x2ef   : > { %v449_v56 = vrot.slane %v448_v32, 4 }
 0x2f0   : > { %v429_v58 = vmax.f32 %v427_v51, %v428_v1  ;;  %v436_v16 = vmax.f32 %v434_v43, %v435_v37  ;;  %v443_v42 = vadd.f32 %v442_v39, %v441_v29  ;;  %v4592_v51 = vld [vmem:[%s8228_s3 + $0x50] ss:$8 sm:$0x3] }
 0x2f1   : > { %v450_v55 = vadd.f32 %v449_v56, %v448_v32  ;;  %v4598_v32 = vld [vmem:[%s8228_s3 + $0x53] ss:$8 sm:$0x3]  ;;  %v4599_v56 = vld [vmem:[%s8228_s3 + $0xb4] ss:$8 sm:$0x3] }
 0x2f2   : > { %v430_v26 = vrot.slane %v429_v58, 2  ;;  %v444_v20 = vrot.slane %v443_v42, 2  ;;  %v437_v11 = vrot.slane %v436_v16, 2  ;;  %v3939_v37 = vrot.slane %v4598_v32, %v4918_v19 }
 0x2f3   : > { %v451_v12 = vrot.slane %v450_v55, 2 }
 0x2f4   : > { %v431_v63 = vmax.f32 %v429_v58, %v430_v26  ;;  %v445_v45 = vadd.f32 %v444_v20, %v443_v42  ;;  %v438_v6 = vmax.f32 %v436_v16, %v437_v11  ;;  %v3698_v20 = vrot.slane %v4592_v51, %v4918_v19  ;;  %v4596_v26 = vld [vmem:[%s8228_s3 + $0x52] ss:$8 sm:$0x3] }
 0x2f5   : > { %v452_v30 = vadd.f32 %v451_v12, %v450_v55  ;;  %v3856_v1 = vrot.slane %v4596_v26, %v4915_v18  ;;  %v3962_v55 = vrot.slane %v4599_v56, %v4918_v19 }
 0x2f6   : > { %v432_v47 = vrot.slane %v431_v63, 1  ;;  %v446_v60 = vrot.slane %v445_v45, 1  ;;  %v439_v25 = vrot.slane %v438_v6, 1 }
 0x2f7   : > { %v453_v38 = vrot.slane %v452_v30, 1 }
 0x2f8   : > { %v433_v50 = vmax.f32 %v431_v63, %v432_v47  ;;  %v447_v7 = vadd.f32 %v446_v60, %v445_v45  ;;  %v440_v39 = vmax.f32 %v438_v6, %v439_v25  ;;  %v4593_v63 = vld [vmem:[%s8228_s3 + $0xb1] ss:$8 sm:$0x3]  ;;  %v3694_v6 = vrot.slane %v4592_v51, %v4915_v18  ;;  %v4597_v60 = vld [vmem:[%s8228_s3 + $0xb3] ss:$8 sm:$0x3] }
 0x2f9   : > { %v454_v11 = vadd.f32 %v453_v38, %v452_v30  ;;  %v3721_v12 = vrot.slane %v4593_v63, %v4918_v19  ;;  %v4595_v38 = vld [vmem:[%s8228_s3 + $0xb2] ss:$8 sm:$0x3]  ;;  %v3717_v16 = vrot.slane %v4593_v63, %v4915_v18  ;;  %v3882_v47 = vrot.slane %v4597_v60, %v4918_v19  ;;  %v4600_v51 = vld [vmem:[%s8228_s3 + $0x54] ss:$8 sm:$0x3] }
 0x2fa   : > { %459 = vrot.lane.b32.xlu1 %v433_v50, %s4788_s12  ;;  %v455_v43 = vmul.f32 0.0625, %v447_v7  ;;  %v4594_v50 = vld [vmem:[%s8228_s3 + $0x51] ss:$8 sm:$0x3]  ;;  %v3802_v25 = vrot.slane %v4595_v38, %v4918_v19  ;;  %v3860_v7 = vrot.slane %v4596_v26, %v4918_v19  ;;  %v3798_v29 = vrot.slane %v4595_v38, %v4915_v18  ;;  %v5680_v26 = vpop.permute.xlu1 %3053 }
 0x2fb   : > { %v456_v45 = vmul.f32 0.0625, %v454_v11  ;;  %v3779_v30 = vrot.slane %v4594_v50, %v4918_v19  ;;  %v3775_v58 = vrot.slane %v4594_v50, %v4915_v18  ;;  %v3878_v42 = vrot.slane %v4597_v60, %v4915_v18 }
 0x2fc   : > { %472 = vrot.lane.b32.xlu0 %v455_v43, %s4788_s12  ;;  %v3935_v43 = vrot.slane %v4598_v32, %v4915_v18  ;;  %v3958_v11 = vrot.slane %v4599_v56, %v4915_v18 }
 0x2fe   : > { %461 = vrot.lane.b32.xlu1 %v440_v39, %s4788_s12  ;;  %v4020_v39 = vrot.slane %v4600_v51, %v4918_v19  ;;  %v5690_v32 = vpop.permute.xlu1 %3076 }
 0x300   : > { %3701 = vrot.lane.b32.xlu0 %v3698_v20, %s4804_s25  ;;  %v4601_v20 = vld [vmem:[%s8228_s3 + $0xb5] ss:$8 sm:$0x3] }
 0x301   : > { %v4043_v63 = vrot.slane %v4601_v20, %v4918_v19 }
 0x302   : > { %474 = vrot.lane.b32.xlu1 %v456_v45, %s4788_s12  ;;  %v4602_v45 = vld [vmem:[%s8228_s3 + $0x55] ss:$8 sm:$0x3]  ;;  %s4816_s12 = smov 124  }
 0x303   : > { %v4101_v50 = vrot.slane %v4602_v45, %v4918_v19 }
 0x304   : > { %3724 = vrot.lane.b32.xlu0 %v3721_v12, %s4804_s25  ;;  %v4016_v12 = vrot.slane %v4600_v51, %v4915_v18 }
 0x306   : > { %3699 = vrot.lane.b32.xlu1 %v3694_v6, %s4804_s25  ;;  %v4603_v6 = vld [vmem:[%s8228_s3 + $0xb6] ss:$8 sm:$0x3] }
 0x307   : > { %v4124_v38 = vrot.slane %v4603_v6, %v4918_v19  ;;  %v4120_v60 = vrot.slane %v4603_v6, %v4915_v18 }
 0x308   : > { %3782 = vrot.lane.b32.xlu0 %v3779_v30, %s4805_s5  ;;  %v4039_v30 = vrot.slane %v4601_v20, %v4915_v18 }
 0x30a   : > { %3722 = vrot.lane.b32.xlu1 %v3717_v16, %s4804_s25  ;;  %v4604_v16 = vld [vmem:[%s8228_s3 + $0x56] ss:$8 sm:$0x3]  ;;  %s4811_s25 = smov 101  }
 0x30c   : > { %3805 = vrot.lane.b32.xlu0 %v3802_v25, %s4805_s5  ;;  %v4097_v25 = vrot.slane %v4602_v45, %v4915_v18 }
 0x30e   : > { %3780 = vrot.lane.b32.xlu1 %v3775_v58, %s4805_s5  ;;  %v4182_v58 = vrot.slane %v4604_v16, %v4918_v19 }
 0x310   : > { %3863 = vrot.lane.b32.xlu0 %v3860_v7, %s4806_s9  ;;  %v4605_v7 = vld [vmem:[%s8228_s3 + $0xb7] ss:$8 sm:$0x3] }
 0x311   : > { %v4201_v51 = vrot.slane %v4605_v7, %v4915_v18 }
 0x312   : > { %3803 = vrot.lane.b32.xlu1 %v3798_v29, %s4805_s5  ;;  %v5687_v29 = vpop.permute.xlu0 %2997  ;;  %s4812_s5 = smov 102  }
 0x313   : > { %8555 = vst [vmem:[#allocation122_spill] sm:$0xff] %v5687_v29 }
 0x314   : > { %3885 = vrot.lane.b32.xlu0 %v3882_v47, %s4806_s9  ;;  %v4205_v47 = vrot.slane %v4605_v7, %v4918_v19 }
 0x316   : > { %3861 = vrot.lane.b32.xlu1 %v3856_v1, %s4806_s9  ;;  %v4606_v1 = vld [vmem:[%s8228_s3 + $0x57] ss:$8 sm:$0x3]  ;;  %v5696_v56 = vpop.permute.xlu0 %3055 }
 0x317   : > { %8556 = vst [vmem:[#allocation123_spill] sm:$0xff] %v5696_v56 }
 0x318   : > { %3942 = vrot.lane.b32.xlu0 %v3939_v37, %s4807_s21  ;;  %v4178_v37 = vrot.slane %v4604_v16, %v4915_v18 }
 0x31a   : > { %3883 = vrot.lane.b32.xlu1 %v3878_v42, %s4806_s9  ;;  %v4263_v42 = vrot.slane %v4606_v1, %v4918_v19  ;;  %v5706_v20 = vpop.permute.xlu0 %3078 }
 0x31b   : > { %8557 = vst [vmem:[#allocation124_spill] sm:$0xff] %v5706_v20 }
 0x31c   : > { %3965 = vrot.lane.b32.xlu0 %v3962_v55, %s4807_s21  ;;  %v4607_v55 = vld [vmem:[%s8228_s3 + $0xc0] ss:$8 sm:$0x3] }
 0x31d   : > { %v4282_v6 = vrot.slane %v4607_v55, %v4915_v18 }
 0x31e   : > { %3940 = vrot.lane.b32.xlu1 %v3935_v43, %s4807_s21  ;;  %v5703_v43 = vpop.permute.xlu1 %3134 }
 0x320   : > { %4023 = vrot.lane.b32.xlu0 %v4020_v39, %s4808_s27  ;;  %v4286_v39 = vrot.slane %v4607_v55, %v4918_v19 }
 0x322   : > { %3963 = vrot.lane.b32.xlu1 %v3958_v11, %s4807_s21  ;;  %v4608_v11 = vld [vmem:[%s8228_s3 + $0x60] ss:$8 sm:$0x3]  ;;  %s4822_s21 = smov 109  }
 0x323   : > { %v4344_v45 = vrot.slane %v4608_v11, %v4918_v19  ;;  %v4340_v16 = vrot.slane %v4608_v11, %v4915_v18 }
 0x324   : > { %4046 = vrot.lane.b32.xlu0 %v4043_v63, %s4808_s27  ;;  %v4259_v63 = vrot.slane %v4606_v1, %v4915_v18 }
 0x326   : > { %4021 = vrot.lane.b32.xlu1 %v4016_v12, %s4808_s27  ;;  %v5713_v12 = vpop.permute.xlu1 %3157 }
 0x328   : > { %4104 = vrot.lane.b32.xlu0 %v4101_v50, %s4809_s7  ;;  %v4609_v50 = vld [vmem:[%s8228_s3 + $0xc1] ss:$8 sm:$0x3] }
 0x329   : > { %v4363_v7 = vrot.slane %v4609_v50, %v4915_v18 }
 0x32a   : > { %4044 = vrot.lane.b32.xlu1 %v4039_v30, %s4808_s27  ;;  %v5719_v30 = vpop.permute.xlu0 %3136  ;;  %s4828_s27 = smov 95  }
 0x32b   : > { %8558 = vst [vmem:[#allocation125_spill] sm:$0xff] %v5719_v30 }
 0x32c   : > { %4127 = vrot.lane.b32.xlu0 %v4124_v38, %s4809_s7  ;;  %v4367_v38 = vrot.slane %v4609_v50, %v4918_v19 }
 0x32e   : > { %4102 = vrot.lane.b32.xlu1 %v4097_v25, %s4809_s7  ;;  %v5723_v25 = vpop.permute.xlu1 %3215 }
 0x330   : > { %4185 = vrot.lane.b32.xlu0 %v4182_v58, %s4810_s18  ;;  %v5725_v58 = vpop.permute.xlu0 %3159 }
 0x331   : > { %8559 = vst [vmem:[#allocation126_spill] sm:$0xff] %v5725_v58 }
 0x332   : > { %4125 = vrot.lane.b32.xlu1 %v4120_v60, %s4809_s7  ;;  %v5728_v60 = vpop.permute.xlu1 %3238  ;;  %s4815_s7 = smov 127  }
 0x334   : > { %4208 = vrot.lane.b32.xlu0 %v4205_v47, %s4810_s18  ;;  %v5730_v47 = vpop.permute.xlu0 %3217 }
 0x335   : > { %8560 = vst [vmem:[#allocation127_spill] sm:$0xff] %v5730_v47 }
 0x336   : > { %4183 = vrot.lane.b32.xlu1 %v4178_v37, %s4810_s18  ;;  %v5732_v1 = vpop.permute.xlu1 %3296 }
 0x338   : > { %4266 = vrot.lane.b32.xlu0 %v4263_v42, %s4811_s25  ;;  %v5734_v37 = vpop.permute.xlu0 %3240 }
 0x339   : > { %8561 = vst [vmem:[#allocation128_spill] sm:$0xff] %v5734_v37 }
 0x33a   : > { %4206 = vrot.lane.b32.xlu1 %v4201_v51, %s4810_s18  ;;  %v5736_v42 = vpop.permute.xlu1 %3318  ;;  %s4820_s18 = smov 111  }
 0x33c   : > { %4289 = vrot.lane.b32.xlu0 %v4286_v39, %s4811_s25  ;;  %v5738_v55 = vpop.permute.xlu0 %3298 }
 0x33d   : > { %8562 = vst [vmem:[#allocation129_spill] sm:$0xff] %v5738_v55 }
 0x33e   : > { %4264 = vrot.lane.b32.xlu1 %v4259_v63, %s4811_s25  ;;  %v5740_v51 = vpop.permute.xlu1 %3375 }
 0x33f   : > { %8563 = vst [vmem:[#allocation130_spill] sm:$0xff] %v5740_v51 }
 0x340   : > { %4347 = vrot.lane.b32.xlu0 %v4344_v45, %s4812_s5  ;;  %v5742_v39 = vpop.permute.xlu0 %3320 }
 0x341   : > { %8564 = vst [vmem:[#allocation131_spill] sm:$0xff] %v5742_v39 }
 0x342   : > { %4287 = vrot.lane.b32.xlu1 %v4282_v6, %s4811_s25  ;;  %v5744_v11 = vpop.permute.xlu1 %3398  ;;  %v4813_v6 = vmov 1966171168   ;;  %s4825_s25 = smov 108  }
 0x343   : > { %8565 = vst [vmem:[#allocation132_spill] sm:$0xff] %v5744_v11  ;;  %v5763_v11 = vsel %vm550_vm6, %v5100_v13, %v5086_v5  ;;  %v5787_v5 = vsel %vm711_vm7, %v5156_v49, %v5140_v40  ;;  %v5807_v40 = vsel %vm873_vm9, %v5206_v15, %v5190_v3  ;;  %v5829_v3 = vsel %vm248_vm3, %v5256_v54, %v5240_v41  ;;  %v8656_v15 = vld [vmem:[#allocation72_spill] sm:$0xff] }
 0x344   : > { %4370 = vrot.lane.b32.xlu0 %v4367_v38, %s4812_s5  ;;  %v5746_v63 = vpop.permute.xlu0 %3377  ;;  %v520_v38 = vunpack.c.l.s4 %v4813_v6  ;;  %8570 = vst [vmem:[#allocation137_spill] sm:$0xff] %v5763_v11  ;;  %8576 = vst [vmem:[#allocation143_spill] sm:$0xff] %v5787_v5  ;;  %v5812_v5 = vsel %vm954_vm10, %v5204_v14, %v5222_v28  ;;  %v8594_v28 = vld [vmem:[#allocation32_spill] sm:$0xff] }
 0x345   : > { %8566 = vst [vmem:[#allocation133_spill] sm:$0xff] %v5746_v63  ;;  %8580 = vst [vmem:[#allocation147_spill] sm:$0xff] %v5807_v40  ;;  %v5834_v40 = vsel %vm1115_vm11, %v5254_v52, %v5267_v0  ;;  %v8624_v11 = vld [vmem:[#allocation52_spill] sm:$0xff] }
 0x346   : > { %4345 = vrot.lane.b32.xlu1 %v4340_v16, %s4812_s5  ;;  %v5748_v45 = vpop.permute.xlu1 %3456  ;;  %v521_v18 = vunpack.c.0.s8 %v520_v38  ;;  %v5779_v38 = vsel %vm324_vm5, %v5117_v27, %v5133_v36  ;;  %v5802_v36 = vsel %vm873_vm9, %v5197_v8, %v5181_v61  ;;  %8581 = vst [vmem:[#allocation148_spill] sm:$0xff] %v5812_v5  ;;  %8584 = vst [vmem:[#allocation151_spill] sm:$0xff] %v5829_v3  ;;  %v8590_v3 = vld [vmem:[#allocation33_spill] sm:$0xff]  ;;  %vm2249_vm9 = vcmask 400384  }
 0x347   : > { %8574 = vst [vmem:[#allocation141_spill] sm:$0xff] %v5779_v38  ;;  %8579 = vst [vmem:[#allocation146_spill] sm:$0xff] %v5802_v36  ;;  %v8607_v36 = vld [vmem:[#allocation40_spill] sm:$0xff] }
 0x348   : > { %v5750_v50 = vpop.permute.xlu0 %3400  ;;  %v5759_v51 = vsub.s32 %v521_v18, %v4892_v2  ;;  %v5769_v2 = vsel %vm550_vm6, %v5110_v23, %v5093_v9  ;;  %v5774_v18 = vsel %vm324_vm5, %v5107_v22, %v5124_v31  ;;  %v5792_v9 = vsel %vm792_vm8, %v5154_v48, %v5172_v57  ;;  %8585 = vst [vmem:[#allocation152_spill] sm:$0xff] %v5834_v40  ;;  %v8593_v40 = vld [vmem:[#allocation35_spill] sm:$0xff]  ;;  %v8616_v31 = vld [vmem:[#allocation46_spill] sm:$0xff] }
 0x349   : > { %8567 = vst [vmem:[#allocation134_spill] sm:$0xff] %v5750_v50  ;;  %8572 = vst [vmem:[#allocation139_spill] sm:$0xff] %v5769_v2  ;;  %v5797_v2 = vsel %vm792_vm8, %v5163_v53, %v5183_v62  ;;  %v5817_v62 = vsel %vm954_vm10, %v5213_v21, %v5233_v34  ;;  %v5839_v34 = vsel %vm1115_vm11, %v5263_v59, %v5276_v10  ;;  %vm1925_vm5 = vcmask 293888   ;;  %v8655_v21 = vld [vmem:[#allocation75_spill] sm:$0xff]  ;;  %v8682_v23 = vld [vmem:[#allocation90_spill] sm:$0xff] }
 0x34a   : > { %4368 = vrot.lane.b32.xlu1 %v4363_v7, %s4812_s5  ;;  %v5752_v16 = vpop.permute.xlu1 %3479  ;;  %8569 = vst [vmem:[#allocation136_spill] sm:$0xff] %v5759_v51  ;;  %8573 = vst [vmem:[#allocation140_spill] sm:$0xff] %v5774_v18  ;;  %v5783_v51 = vsel %vm711_vm7, %v5147_v44, %v5131_v35  ;;  %v5859_v10 = vsel %vm1277_vm13, %v8594_v28, %v8593_v40  ;;  %v8619_v18 = vld [vmem:[#allocation48_spill] sm:$0xff]  ;;  %vm2006_vm6 = vcmask 302080   ;;  %vm2087_vm7 = vcmask 310272   ;;  %s4831_s5 = smov 90  }
 0x34b   : > { %8575 = vst [vmem:[#allocation142_spill] sm:$0xff] %v5783_v51  ;;  %8577 = vst [vmem:[#allocation144_spill] sm:$0xff] %v5792_v9  ;;  %v8609_v9 = vld [vmem:[#allocation42_spill] sm:$0xff]  ;;  %v8615_v51 = vld [vmem:[#allocation49_spill] sm:$0xff]  ;;  %vm2168_vm8 = vcmask 392192   ;;  %vm2330_vm10 = vcmask 408576  }
 0x34c   : > { %v5754_v7 = vpop.permute.xlu0 %3458  ;;  %8578 = vst [vmem:[#allocation145_spill] sm:$0xff] %v5797_v2  ;;  %8582 = vst [vmem:[#allocation149_spill] sm:$0xff] %v5817_v62  ;;  %v5822_v2 = vsel %vm248_vm3, %v5247_v46, %v5231_v33  ;;  %v5844_v62 = vsel %vm1196_vm12, %v5292_v24, %v5272_v4  ;;  %v8588_v33 = vld [vmem:[#allocation31_spill] sm:$0xff]  ;;  %v8597_v4 = vld [vmem:[#allocation34_spill] sm:$0xff]  ;;  %vm1763_vm3 = vcmask 277504   ;;  %vm463_vm11 = vcmask 416768  }
 0x34d   : > { %8568 = vst [vmem:[#allocation135_spill] sm:$0xff] %v5754_v7  ;;  %8583 = vst [vmem:[#allocation150_spill] sm:$0xff] %v5822_v2  ;;  %v5849_v41 = vsel %vm1196_vm12, %v8588_v33, %v5285_v17  ;;  %v8591_v2 = vld [vmem:[#allocation30_spill] sm:$0xff]  ;;  %v8600_v17 = vld [vmem:[#allocation36_spill] sm:$0xff]  ;;  %vm2491_vm12 = vcmask 424960  }
 0x34e   : > { %v5756_v19 = vpop.permute.xlu1 %3537  ;;  %8586 = vst [vmem:[#allocation153_spill] sm:$0xff] %v5839_v34  ;;  %8587 = vst [vmem:[#allocation154_spill] sm:$0xff] %v5844_v62  ;;  %v5854_v0 = vsel %vm1277_vm13, %v8591_v2, %v8590_v3  ;;  %v8598_v62 = vld [vmem:[#allocation37_spill] sm:$0xff]  ;;  %vm2572_vm13 = vcmask 433152  }
 0x34f   : > { %8589 = vst [vmem:[#allocation155_spill] sm:$0xff] %v5849_v41  ;;  %8592 = vst [vmem:[#allocation30_spill] sm:$0xff] %v5854_v0  ;;  %v5866_v5 = vsel %vm1358_vm14, %v8598_v62, %v8597_v4  ;;  %v8601_v41 = vld [vmem:[#allocation39_spill] sm:$0xff]  ;;  %v8603_v3 = vld [vmem:[#allocation41_spill] sm:$0xff] }
 0x350   : > { %v5765_v6 = vpop.permute.xlu0 %3481  ;;  %8595 = vst [vmem:[#allocation156_spill] sm:$0xff] %v5859_v10  ;;  %8599 = vst [vmem:[#allocation37_spill] sm:$0xff] %v5866_v5  ;;  %v5871_v61 = vsel %vm1358_vm14, %v8601_v41, %v8600_v17  ;;  %v8604_v0 = vld [vmem:[#allocation38_spill] sm:$0xff]  ;;  %v8606_v10 = vld [vmem:[#allocation43_spill] sm:$0xff]  ;;  %vm2653_vm14 = vcmask 441344  }
 0x351   : > { %8571 = vst [vmem:[#allocation138_spill] sm:$0xff] %v5765_v6  ;;  %8602 = vst [vmem:[#allocation158_spill] sm:$0xff] %v5871_v61  ;;  %v5876_v40 = vsel %vm1439_vm15, %v8604_v0, %v8603_v3  ;;  %v5881_v57 = vsel %vm1439_vm15, %v8607_v36, %v8606_v10  ;;  %v8610_v4 = vld [vmem:[#allocation45_spill] sm:$0xff]  ;;  %v8612_v17 = vld [vmem:[#allocation44_spill] sm:$0xff]  ;;  %v5896_v3 = vsel %vm1601_vm1, %v8616_v31, %v8615_v51  ;;  %vm2734_vm15 = vcmask 523264  }
 0x352   : > { %v5824_v38 = vpop.permute.xlu1 %3560  ;;  %8605 = vst [vmem:[#allocation38_spill] sm:$0xff] %v5876_v40  ;;  %8608 = vst [vmem:[#allocation159_spill] sm:$0xff] %v5881_v57  ;;  %v5886_v5 = vsel %vm1520_vm0, %v8610_v4, %v8609_v9  ;;  %v8613_v61 = vld [vmem:[#allocation47_spill] sm:$0xff]  ;;  %v8621_v57 = vld [vmem:[#allocation50_spill] sm:$0xff] }
 0x353   : > { %8611 = vst [vmem:[#allocation45_spill] sm:$0xff] %v5886_v5  ;;  %v5891_v35 = vsel %vm1520_vm0, %v8613_v61, %v8612_v17  ;;  %8617 = vst [vmem:[#allocation46_spill] sm:$0xff] %v5896_v3  ;;  %v8618_v40 = vld [vmem:[#allocation51_spill] sm:$0xff]  ;;  %v8622_v9 = vld [vmem:[#allocation53_spill] sm:$0xff]  ;;  %vm2814_vm0 = vcmask 531456  }
 0x354   : > { %v5861_v34 = vpop.permute.xlu0 %3539  ;;  %8614 = vst [vmem:[#allocation160_spill] sm:$0xff] %v5891_v35  ;;  %v5901_v10 = vsel %vm1601_vm1, %v8619_v18, %v8618_v40  ;;  %v5905_v5 = vsel %vm1682_vm2, %v8622_v9, %v8621_v57  ;;  %v8625_v36 = vld [vmem:[#allocation55_spill] sm:$0xff]  ;;  %v8627_v17 = vld [vmem:[#allocation57_spill] sm:$0xff]  ;;  %v8628_v35 = vld [vmem:[#allocation54_spill] sm:$0xff] }
 0x355   : > { %8596 = vst [vmem:[#allocation157_spill] sm:$0xff] %v5861_v34  ;;  %8620 = vst [vmem:[#allocation161_spill] sm:$0xff] %v5901_v10  ;;  %v5909_v41 = vsel %vm1682_vm2, %v8625_v36, %v8624_v11  ;;  %v5913_v61 = vsel %vm1763_vm3, %v8628_v35, %v8627_v17  ;;  %v8630_v51 = vld [vmem:[#allocation59_spill] sm:$0xff]  ;;  %v8631_v3 = vld [vmem:[#allocation56_spill] sm:$0xff]  ;;  %vm2895_vm2 = vcmask 539648  }
 0x356   : > { %8623 = vst [vmem:[#allocation53_spill] sm:$0xff] %v5905_v5  ;;  %8626 = vst [vmem:[#allocation162_spill] sm:$0xff] %v5909_v41  ;;  %v5917_v28 = vsel %vm1763_vm3, %v8631_v3, %v8630_v51  ;;  %v5919_v33 = vpop.permute.xlu1 %3618  ;;  %v8633_v40 = vld [vmem:[#allocation58_spill] sm:$0xff]  ;;  %v8634_v10 = vld [vmem:[#allocation61_spill] sm:$0xff]  ;;  %vm2976_vm3 = vcmask 547840  }
 0x357   : > { %8629 = vst [vmem:[#allocation54_spill] sm:$0xff] %v5913_v61  ;;  %8632 = vst [vmem:[#allocation163_spill] sm:$0xff] %v5917_v28  ;;  %v5923_v18 = vsel %vm1844_vm4, %v8634_v10, %v8633_v40  ;;  %v8636_v57 = vld [vmem:[#allocation60_spill] sm:$0xff]  ;;  %v8637_v5 = vld [vmem:[#allocation63_spill] sm:$0xff] }
 0x358   : > { %8635 = vst [vmem:[#allocation61_spill] sm:$0xff] %v5923_v18  ;;  %v5927_v59 = vsel %vm1844_vm4, %v8637_v5, %v8636_v57  ;;  %v8639_v11 = vld [vmem:[#allocation65_spill] sm:$0xff]  ;;  %v8640_v41 = vld [vmem:[#allocation62_spill] sm:$0xff]  ;;  %v5933_v51 = vpop.permute.xlu0 %3562  ;;  %v8643_v28 = vld [vmem:[#allocation67_spill] sm:$0xff]  ;;  %vm3057_vm4 = vcmask 556032  }
 0x359   : > { %8638 = vst [vmem:[#allocation164_spill] sm:$0xff] %v5927_v59  ;;  %v5931_v17 = vsel %vm1925_vm5, %v8640_v41, %v8639_v11  ;;  %8642 = vst [vmem:[#allocation165_spill] sm:$0xff] %v5933_v51  ;;  %v8644_v61 = vld [vmem:[#allocation64_spill] sm:$0xff]  ;;  %v8646_v57 = vld [vmem:[#allocation66_spill] sm:$0xff] }
 0x35a   : > { %8641 = vst [vmem:[#allocation62_spill] sm:$0xff] %v5931_v17  ;;  %v5937_v3 = vsel %vm1925_vm5, %v8644_v61, %v8643_v28  ;;  %v8647_v59 = vld [vmem:[#allocation69_spill] sm:$0xff]  ;;  %v8649_v18 = vld [vmem:[#allocation68_spill] sm:$0xff]  ;;  %v8650_v5 = vld [vmem:[#allocation71_spill] sm:$0xff]  ;;  %v5953_v28 = vsel %vm2087_vm7, %v8656_v15, %v8655_v21  ;;  %vm3138_vm5 = vcmask 564224  }
 0x35b   : > { %8645 = vst [vmem:[#allocation166_spill] sm:$0xff] %v5937_v3  ;;  %v5941_v40 = vsel %vm2006_vm6, %v8647_v59, %v8646_v57  ;;  %v5945_v11 = vsel %vm2006_vm6, %v8650_v5, %v8649_v18  ;;  %v8652_v17 = vld [vmem:[#allocation73_spill] sm:$0xff]  ;;  %v8653_v36 = vld [vmem:[#allocation70_spill] sm:$0xff]  ;;  %8657 = vst [vmem:[#allocation168_spill] sm:$0xff] %v5953_v28  ;;  %vm3219_vm6 = vcmask 572416  }
 0x35c   : > { %8648 = vst [vmem:[#allocation69_spill] sm:$0xff] %v5941_v40  ;;  %8651 = vst [vmem:[#allocation167_spill] sm:$0xff] %v5945_v11  ;;  %v5949_v54 = vsel %vm2087_vm7, %v8653_v36, %v8652_v17  ;;  %v8658_v3 = vld [vmem:[#allocation74_spill] sm:$0xff]  ;;  %v8659_v61 = vld [vmem:[#allocation77_spill] sm:$0xff]  ;;  %vm2230_vm7 = vcmask 654336  }
 0x35d   : > { %8654 = vst [vmem:[#allocation70_spill] sm:$0xff] %v5949_v54  ;;  %v5958_v53 = vsel %vm2168_vm8, %v8659_v61, %v8658_v3  ;;  %v8661_v57 = vld [vmem:[#allocation76_spill] sm:$0xff]  ;;  %v8662_v40 = vld [vmem:[#allocation79_spill] sm:$0xff]  ;;  %v8664_v11 = vld [vmem:[#allocation81_spill] sm:$0xff]  ;;  %v5975_v3 = vpop.permute.xlu1 %3641 }
 0x35e   : > { %8660 = vst [vmem:[#allocation169_spill] sm:$0xff] %v5958_v53  ;;  %v5963_v18 = vsel %vm2168_vm8, %v8662_v40, %v8661_v57  ;;  %v8665_v17 = vld [vmem:[#allocation78_spill] sm:$0xff]  ;;  %v8667_v5 = vld [vmem:[#allocation83_spill] sm:$0xff]  ;;  %v8668_v21 = vld [vmem:[#allocation80_spill] sm:$0xff] }
 0x35f   : > { %8663 = vst [vmem:[#allocation170_spill] sm:$0xff] %v5963_v18  ;;  %v5968_v54 = vsel %vm2249_vm9, %v8665_v17, %v8664_v11  ;;  %v5973_v28 = vsel %vm2249_vm9, %v8668_v21, %v8667_v5  ;;  %v8670_v53 = vld [vmem:[#allocation82_spill] sm:$0xff]  ;;  %v8671_v15 = vld [vmem:[#allocation85_spill] sm:$0xff]  ;;  %v8673_v57 = vld [vmem:[#allocation84_spill] sm:$0xff]  ;;  %vm3379_vm9 = vcmask 662528  }
 0x360   : > { %8666 = vst [vmem:[#allocation171_spill] sm:$0xff] %v5968_v54  ;;  %8669 = vst [vmem:[#allocation172_spill] sm:$0xff] %v5973_v28  ;;  %v5980_v49 = vsel %vm2330_vm10, %v8671_v15, %v8670_v53  ;;  %v8674_v18 = vld [vmem:[#allocation87_spill] sm:$0xff]  ;;  %v8676_v11 = vld [vmem:[#allocation89_spill] sm:$0xff] }
 0x361   : > { %8672 = vst [vmem:[#allocation173_spill] sm:$0xff] %v5980_v49  ;;  %v5985_v40 = vsel %vm2330_vm10, %v8674_v18, %v8673_v57  ;;  %v8677_v54 = vld [vmem:[#allocation86_spill] sm:$0xff]  ;;  %v8679_v5 = vld [vmem:[#allocation91_spill] sm:$0xff]  ;;  %v8680_v28 = vld [vmem:[#allocation88_spill] sm:$0xff]  ;;  %vm3460_vm10 = vcmask 670720  }
 0x362   : > { %8675 = vst [vmem:[#allocation174_spill] sm:$0xff] %v5985_v40  ;;  %v5990_v27 = vsel %vm463_vm11, %v8677_v54, %v8676_v11  ;;  %v5995_v21 = vsel %vm463_vm11, %v8680_v28, %v8679_v5  ;;  %v8683_v17 = vld [vmem:[#allocation93_spill] sm:$0xff]  ;;  %v8685_v49 = vld [vmem:[#allocation92_spill] sm:$0xff]  ;;  %v8686_v15 = vld [vmem:[#allocation95_spill] sm:$0xff] }
 0x363   : > { %8678 = vst [vmem:[#allocation175_spill] sm:$0xff] %v5990_v27  ;;  %8681 = vst [vmem:[#allocation176_spill] sm:$0xff] %v5995_v21  ;;  %v6000_v53 = vsel %vm2491_vm12, %v8683_v17, %v8682_v23  ;;  %v6005_v57 = vsel %vm2491_vm12, %v8686_v15, %v8685_v49  ;;  %v8688_v40 = vld [vmem:[#allocation97_spill] sm:$0xff]  ;;  %v8689_v18 = vld [vmem:[#allocation94_spill] sm:$0xff]  ;;  %v6012_v27 = vpop.permute.xlu0 %3620  ;;  %vm3541_vm12 = vcmask 678912  }
 0x364   : > { %8684 = vst [vmem:[#allocation177_spill] sm:$0xff] %v6000_v53  ;;  %8687 = vst [vmem:[#allocation178_spill] sm:$0xff] %v6005_v57  ;;  %v6010_v11 = vsel %vm2572_vm13, %v8689_v18, %v8688_v40  ;;  %v8692_v54 = vld [vmem:[#allocation99_spill] sm:$0xff]  ;;  %v8693_v5 = vld [vmem:[#allocation96_spill] sm:$0xff] }
 0x365   : > { %8690 = vst [vmem:[#allocation179_spill] sm:$0xff] %v6010_v11  ;;  %8691 = vst [vmem:[#allocation180_spill] sm:$0xff] %v6012_v27  ;;  %v6017_v21 = vsel %vm2572_vm13, %v8693_v5, %v8692_v54  ;;  %v8695_v28 = vld [vmem:[#allocation98_spill] sm:$0xff]  ;;  %v8696_v23 = vld [vmem:[#allocation101_spill] sm:$0xff]  ;;  %vm3622_vm13 = vcmask 687104  }
 0x366   : > { %8694 = vst [vmem:[#allocation181_spill] sm:$0xff] %v6017_v21  ;;  %v6022_v53 = vsel %vm2653_vm14, %v8696_v23, %v8695_v28  ;;  %v8698_v17 = vld [vmem:[#allocation100_spill] sm:$0xff]  ;;  %v8699_v49 = vld [vmem:[#allocation103_spill] sm:$0xff]  ;;  %v8701_v15 = vld [vmem:[#allocation105_spill] sm:$0xff] }
 0x367   : > { %8697 = vst [vmem:[#allocation182_spill] sm:$0xff] %v6022_v53  ;;  %v6027_v57 = vsel %vm2653_vm14, %v8699_v49, %v8698_v17  ;;  %v8702_v40 = vld [vmem:[#allocation102_spill] sm:$0xff]  ;;  %v8704_v18 = vld [vmem:[#allocation107_spill] sm:$0xff]  ;;  %v8705_v61 = vld [vmem:[#allocation104_spill] sm:$0xff]  ;;  %vm3784_vm14 = vcmask 703488  }
 0x368   : > { %8700 = vst [vmem:[#allocation183_spill] sm:$0xff] %v6027_v57  ;;  %v6032_v11 = vsel %vm2734_vm15, %v8702_v40, %v8701_v15  ;;  %v6037_v54 = vsel %vm2734_vm15, %v8705_v61, %v8704_v18  ;;  %v8707_v21 = vld [vmem:[#allocation109_spill] sm:$0xff]  ;;  %v8708_v5 = vld [vmem:[#allocation106_spill] sm:$0xff]  ;;  %v8710_v53 = vld [vmem:[#allocation111_spill] sm:$0xff] }
 0x369   : > { %8703 = vst [vmem:[#allocation184_spill] sm:$0xff] %v6032_v11  ;;  %8706 = vst [vmem:[#allocation104_spill] sm:$0xff] %v6037_v54  ;;  %v6042_v28 = vsel %vm2814_vm0, %v8708_v5, %v8707_v21  ;;  %v8711_v23 = vld [vmem:[#allocation108_spill] sm:$0xff]  ;;  %v8713_v57 = vld [vmem:[#allocation113_spill] sm:$0xff] }
 0x36a   : > { %8709 = vst [vmem:[#allocation106_spill] sm:$0xff] %v6042_v28  ;;  %v6047_v17 = vsel %vm2814_vm0, %v8711_v23, %v8710_v53  ;;  %v8714_v49 = vld [vmem:[#allocation110_spill] sm:$0xff]  ;;  %v8716_v11 = vld [vmem:[#allocation115_spill] sm:$0xff]  ;;  %v8717_v40 = vld [vmem:[#allocation112_spill] sm:$0xff]  ;;  %vm1663_vm0 = vcmask 785408  }
 0x36b   : > { %8712 = vst [vmem:[#allocation108_spill] sm:$0xff] %v6047_v17  ;;  %v6052_v15 = vsel %vm2895_vm2, %v8714_v49, %v8713_v57  ;;  %v6057_v18 = vsel %vm2895_vm2, %v8717_v40, %v8716_v11  ;;  %v8719_v54 = vld [vmem:[#allocation117_spill] sm:$0xff]  ;;  %v8720_v21 = vld [vmem:[#allocation114_spill] sm:$0xff]  ;;  %v8722_v17 = vld [vmem:[#allocation116_spill] sm:$0xff]  ;;  %v6073_v11 = vsel %vm3057_vm4, %v5680_v26, %v5696_v56  ;;  %v6095_v56 = vsel %vm3219_vm6, %v5728_v60, %v5734_v37 }
 0x36c   : > { %8715 = vst [vmem:[#allocation110_spill] sm:$0xff] %v6052_v15  ;;  %8718 = vst [vmem:[#allocation112_spill] sm:$0xff] %v6057_v18  ;;  %v6062_v28 = vsel %vm2976_vm3, %v8720_v21, %v8719_v54  ;;  %v6064_v53 = vpop.permute.xlu1 %459  ;;  %v6069_v57 = vsel %vm2976_vm3, %v8722_v17, %v5687_v29  ;;  %v6077_v18 = vsel %vm3057_vm4, %v5690_v32, %v5706_v20  ;;  %v8736_v37 = vld [vmem:[#allocation132_spill] sm:$0xff]  ;;  %vm3944_vm2 = vcmask 793600  }
 0x36d   : > { %8721 = vst [vmem:[#allocation114_spill] sm:$0xff] %v6062_v28  ;;  %8723 = vst [vmem:[#allocation116_spill] sm:$0xff] %v6069_v57  ;;  %v6081_v54 = vsel %vm3138_vm5, %v5703_v43, %v5719_v30  ;;  %v6085_v28 = vsel %vm3138_vm5, %v5713_v12, %v5725_v58  ;;  %v6089_v29 = vsel %vm3219_vm6, %v5723_v25, %v5730_v47  ;;  %v6091_v57 = vpop.permute.xlu0 %3643  ;;  %vm4025_vm3 = vcmask 801792  }
 0x36e   : > { %8724 = vst [vmem:[#allocation185_spill] sm:$0xff] %v6073_v11  ;;  %8725 = vst [vmem:[#allocation186_spill] sm:$0xff] %v6077_v18  ;;  %v6100_v20 = vsel %vm2230_vm7, %v5732_v1, %v5738_v55  ;;  %v6105_v58 = vsel %vm2230_vm7, %v5736_v42, %v5742_v39  ;;  %v8734_v18 = vld [vmem:[#allocation130_spill] sm:$0xff]  ;;  %v6124_v55 = vsel %vm3460_vm10, %v5748_v45, %v5754_v7  ;;  %vm4106_vm4 = vcmask 809984  }
 0x36f   : > { %8726 = vst [vmem:[#allocation187_spill] sm:$0xff] %v6081_v54  ;;  %8727 = vst [vmem:[#allocation188_spill] sm:$0xff] %v6085_v28  ;;  %v6109_v28 = vsel %vm463_vm11, 0.0, %v6064_v53  ;;  %v6114_v47 = vsel %vm3379_vm9, %v8734_v18, %v5746_v63  ;;  %v6129_v39 = vsel %vm3460_vm10, %v5752_v16, %v5765_v6  ;;  %v6149_v6 = vsel %vm3622_vm13, %v5975_v3, %v6091_v57  ;;  %v8756_v63 = vld [vmem:[#allocation94_spill] sm:$0xff] }
 0x370   : > { %8728 = vst [vmem:[#allocation189_spill] sm:$0xff] %v6089_v29  ;;  %8729 = vst [vmem:[#allocation190_spill] sm:$0xff] %v6091_v57  ;;  %v6169_v57 = vmul.f32 %v5197_v8, %v6109_v28  ;;  %v6189_v8 = vmul.f32 %v8591_v2, %v6109_v28  ;;  %v6209_v2 = vmul.f32 %v8622_v9, %v6109_v28  ;;  %vm4187_vm5 = vcmask 818176  }
 0x371   : > { %8730 = vst [vmem:[#allocation191_spill] sm:$0xff] %v6095_v56  ;;  %8731 = vst [vmem:[#allocation192_spill] sm:$0xff] %v6100_v20  ;;  %v6119_v56 = vsel %vm3379_vm9, %v8736_v37, %v5750_v50  ;;  %v6139_v50 = vsel %vm3541_vm12, %v5824_v38, %v5933_v51  ;;  %v6161_v51 = vmul.f32 %v5147_v44, %v6109_v28  ;;  %v8760_v20 = vld [vmem:[#allocation102_spill] sm:$0xff]  ;;  %vm4268_vm6 = vcmask 826368  }
 0x372   : > { %8732 = vst [vmem:[#allocation193_spill] sm:$0xff] %v6105_v58  ;;  %8733 = vst [vmem:[#allocation194_spill] sm:$0xff] %v6109_v28  ;;  %v6134_v58 = vsel %vm3541_vm12, %v5756_v19, %v5861_v34  ;;  %v6157_v34 = vmul.f32 %v5107_v22, %v6109_v28  ;;  %v6177_v22 = vmul.f32 %v5247_v46, %v6109_v28  ;;  %vm4349_vm9 = vcmask 834560  }
 0x373   : > { %8735 = vst [vmem:[#allocation130_spill] sm:$0xff] %v6114_v47  ;;  %8737 = vst [vmem:[#allocation132_spill] sm:$0xff] %v6119_v56  ;;  %v6144_v56 = vsel %vm3622_vm13, %v5919_v33, %v6012_v27  ;;  %v6181_v44 = vmul.f32 %v5254_v52, %v6109_v28  ;;  %v6197_v46 = vmul.f32 %v8604_v0, %v6109_v28  ;;  %v8758_v47 = vld [vmem:[#allocation101_spill] sm:$0xff]  ;;  %vm612_vm10 = vcmask 1039360  }
 0x374   : > { %8738 = vst [vmem:[#allocation195_spill] sm:$0xff] %v6124_v55  ;;  %8739 = vst [vmem:[#allocation196_spill] sm:$0xff] %v6129_v39  ;;  %v6153_v39 = vmul.f32 %v5100_v13, %v6109_v28  ;;  %v6173_v13 = vmul.f32 %v5204_v14, %v6109_v28  ;;  %v6193_v14 = vmul.f32 %v8598_v62, %v6109_v28  ;;  %vm692_vm12 = vcmask 1031168  }
 0x375   : > { %8740 = vst [vmem:[#allocation197_spill] sm:$0xff] %v6134_v58  ;;  %8741 = vst [vmem:[#allocation198_spill] sm:$0xff] %v6139_v50  ;;  %v6165_v50 = vmul.f32 %v5154_v48, %v6109_v28  ;;  %v6185_v48 = vmul.f32 %v5292_v24, %v6109_v28  ;;  %v6201_v52 = vmul.f32 %v8610_v4, %v6109_v28  ;;  %vm773_vm13 = vcmask 1022976  }
 0x376   : > { %8742 = vst [vmem:[#allocation199_spill] sm:$0xff] %v6144_v56  ;;  %8743 = vst [vmem:[#allocation200_spill] sm:$0xff] %v6149_v6  ;;  %v6205_v24 = vmul.f32 %v8616_v31, %v6109_v28  ;;  %v6213_v62 = vmul.f32 %v8628_v35, %v6109_v28  ;;  %v6217_v0 = vmul.f32 %v8634_v10, %v6109_v28  ;;  %v6231_v6 = vpop.permute.xlu0 %472  ;;  %v8746_v35 = vld [vmem:[#allocation77_spill] sm:$0xff]  ;;  %v8748_v10 = vld [vmem:[#allocation78_spill] sm:$0xff] }
 0x377   : > { %v6221_v4 = vmul.f32 %v8640_v41, %v6109_v28  ;;  %v6225_v31 = vmul.f32 %v8647_v59, %v6109_v28  ;;  %v6229_v9 = vmul.f32 %v8653_v36, %v6109_v28  ;;  %8745 = vst [vmem:[#allocation202_spill] sm:$0xff] %v6231_v6  ;;  %v6235_v27 = vmul.f32 %v8746_v35, %v6109_v28  ;;  %v8750_v41 = vld [vmem:[#allocation85_spill] sm:$0xff]  ;;  %v8752_v59 = vld [vmem:[#allocation86_spill] sm:$0xff] }
 0x378   : > { %v6239_v56 = vmul.f32 %v8748_v10, %v6109_v28  ;;  %v6243_v58 = vmul.f32 %v8750_v41, %v6109_v28  ;;  %v6247_v7 = vmul.f32 %v8752_v59, %v6109_v28  ;;  %v8754_v36 = vld [vmem:[#allocation93_spill] sm:$0xff]  ;;  %v6255_v35 = vmul.f32 %v8756_v63, %v6109_v28 }
 0x379   : > { %8744 = vst [vmem:[#allocation201_spill] sm:$0xff] %v6229_v9  ;;  %8747 = vst [vmem:[#allocation77_spill] sm:$0xff] %v6235_v27  ;;  %v6251_v55 = vmul.f32 %v8754_v36, %v6109_v28  ;;  %v6259_v10 = vmul.f32 %v8758_v47, %v6109_v28  ;;  %v6263_v41 = vmul.f32 %v8760_v20, %v6109_v28  ;;  %v6279_v47 = vsel %vm463_vm11, 0.0, %v6231_v6  ;;  %v8801_v9 = vld [vmem:[#allocation96_spill] sm:$0xff] }
 0x37a   : > { %8749 = vst [vmem:[#allocation78_spill] sm:$0xff] %v6239_v56  ;;  %8751 = vst [vmem:[#allocation85_spill] sm:$0xff] %v6243_v58  ;;  %v6267_v59 = vmul.f32 %v8708_v5, %v6109_v28  ;;  %v6271_v36 = vmul.f32 %v8714_v49, %v6109_v28  ;;  %v6275_v63 = vmul.f32 %v8720_v21, %v6109_v28 }
 0x37b   : > { %8753 = vst [vmem:[#allocation86_spill] sm:$0xff] %v6247_v7  ;;  %8755 = vst [vmem:[#allocation93_spill] sm:$0xff] %v6251_v55  ;;  %v6283_v20 = vmul.f32 %v5680_v26, %v6109_v28  ;;  %v6287_v5 = vmul.f32 %v5703_v43, %v6109_v28  ;;  %v6291_v49 = vmul.f32 %v5723_v25, %v6109_v28  ;;  %v462_v55 = vpop.permute.xlu1 %461 }
 0x37c   : > { %8757 = vst [vmem:[#allocation94_spill] sm:$0xff] %v6255_v35  ;;  %8759 = vst [vmem:[#allocation101_spill] sm:$0xff] %v6259_v10  ;;  %v6295_v21 = vmul.f32 %v5732_v1, %v6109_v28  ;;  %v6299_v6 = vmul.f32 %v8734_v18, %v6109_v28  ;;  %v6303_v26 = vmul.f32 %v5748_v45, %v6109_v28  ;;  %v8776_v18 = vld [vmem:[#allocation12_spill] sm:$0xff]  ;;  %v8777_v45 = vld [vmem:[#allocation13_spill] sm:$0xff] }
 0x37d   : > { %8761 = vst [vmem:[#allocation102_spill] sm:$0xff] %v6263_v41  ;;  %8762 = vst [vmem:[#allocation203_spill] sm:$0xff] %v6267_v59  ;;  %v6307_v43 = vmul.f32 %v5756_v19, %v6109_v28  ;;  %v6311_v25 = vmul.f32 %v5919_v33, %v6109_v28  ;;  %v8780_v33 = vld [vmem:[#allocation24_spill] sm:$0xff]  ;;  %v8790_v59 = vld [vmem:[#allocation63_spill] sm:$0xff] }
 0x37e   : > { %8763 = vst [vmem:[#allocation204_spill] sm:$0xff] %v6271_v36  ;;  %8764 = vst [vmem:[#allocation205_spill] sm:$0xff] %v6275_v63  ;;  %v1061_v28 = vmul.f32 %v8780_v33, %v6279_v47  ;;  %v8791_v41 = vld [vmem:[#allocation64_spill] sm:$0xff]  ;;  %v8792_v10 = vld [vmem:[#allocation71_spill] sm:$0xff] }
 0x37f   : > { %8765 = vst [vmem:[#allocation206_spill] sm:$0xff] %v6279_v47  ;;  %8766 = vst [vmem:[#allocation207_spill] sm:$0xff] %v6283_v20  ;;  %v8793_v35 = vld [vmem:[#allocation72_spill] sm:$0xff] }
 0x380   : > { %8767 = vst [vmem:[#allocation208_spill] sm:$0xff] %v6287_v5  ;;  %8768 = vst [vmem:[#allocation209_spill] sm:$0xff] %v6291_v49  ;;  %v8774_v49 = vld [vmem:[#allocation6_spill] sm:$0xff] }
 0x381   : > { %8769 = vst [vmem:[#allocation210_spill] sm:$0xff] %v6295_v21  ;;  %8770 = vst [vmem:[#allocation211_spill] sm:$0xff] %v6299_v6  ;;  %v577_v1 = vmul.f32 %v8774_v49, %v6279_v47  ;;  %v8775_v21 = vld [vmem:[#allocation7_spill] sm:$0xff]  ;;  %v738_v6 = vmul.f32 %v8776_v18, %v6279_v47  ;;  %v8778_v5 = vld [vmem:[#allocation18_spill] sm:$0xff] }
 0x382   : > { %8771 = vst [vmem:[#allocation212_spill] sm:$0xff] %v6303_v26  ;;  %8772 = vst [vmem:[#allocation213_spill] sm:$0xff] %v6307_v43  ;;  %v657_v29 = vmul.f32 %v8775_v21, %v6279_v47  ;;  %v819_v26 = vmul.f32 %v8777_v45, %v6279_v47  ;;  %v900_v19 = vmul.f32 %v8778_v5, %v6279_v47  ;;  %v8779_v43 = vld [vmem:[#allocation19_spill] sm:$0xff]  ;;  %v8781_v49 = vld [vmem:[#allocation25_spill] sm:$0xff] }
 0x383   : > { %8773 = vst [vmem:[#allocation214_spill] sm:$0xff] %v6311_v25  ;;  %v981_v30 = vmul.f32 %v8779_v43, %v6279_v47  ;;  %v1142_v25 = vmul.f32 %v8781_v49, %v6279_v47  ;;  %v8782_v21 = vld [vmem:[#allocation31_spill] sm:$0xff]  ;;  %v8783_v18 = vld [vmem:[#allocation32_spill] sm:$0xff] }
 0x384   : > { %v1223_v54 = vmul.f32 %v8782_v21, %v6279_v47  ;;  %v1304_v20 = vmul.f32 %v8783_v18, %v6279_v47  ;;  %v8784_v45 = vld [vmem:[#allocation39_spill] sm:$0xff]  ;;  %v8785_v5 = vld [vmem:[#allocation40_spill] sm:$0xff] }
 0x385   : > { %v6335_v11 = vmul.f32 %v8784_v45, %v6279_v47  ;;  %v6339_v63 = vmul.f32 %v8785_v5, %v6279_v47  ;;  %v8786_v43 = vld [vmem:[#allocation47_spill] sm:$0xff]  ;;  %v8787_v49 = vld [vmem:[#allocation48_spill] sm:$0xff]  ;;  %v6359_v5 = vmul.f32 %v8790_v59, %v6279_v47 }
 0x386   : > { %v6343_v33 = vmul.f32 %v8786_v43, %v6279_v47  ;;  %v6347_v36 = vmul.f32 %v8787_v49, %v6279_v47  ;;  %v8788_v21 = vld [vmem:[#allocation55_spill] sm:$0xff]  ;;  %v8789_v18 = vld [vmem:[#allocation56_spill] sm:$0xff]  ;;  %v6363_v43 = vmul.f32 %v8791_v41, %v6279_v47  ;;  %v6367_v49 = vmul.f32 %v8792_v10, %v6279_v47 }
 0x387   : > { %v6351_v15 = vmul.f32 %v8788_v21, %v6279_v47  ;;  %v6355_v45 = vmul.f32 %v8789_v18, %v6279_v47  ;;  %v6371_v21 = vmul.f32 %v8793_v35, %v6279_v47  ;;  %v8795_v18 = vld [vmem:[#allocation79_spill] sm:$0xff]  ;;  %v8797_v59 = vld [vmem:[#allocation80_spill] sm:$0xff] }
 0x388   : > { %v6375_v7 = vmul.f32 %v8795_v18, %v6279_v47  ;;  %v6379_v58 = vmul.f32 %v8797_v59, %v6279_v47  ;;  %v8798_v41 = vld [vmem:[#allocation87_spill] sm:$0xff]  ;;  %v8799_v10 = vld [vmem:[#allocation88_spill] sm:$0xff]  ;;  %v6395_v18 = vmul.f32 %v8801_v9, %v6279_v47  ;;  %v6415_v9 = vmul.f32 %v8722_v17, %v6279_v47 }
 0x389   : > { %8794 = vst [vmem:[#allocation6_spill] sm:$0xff] %v6371_v21  ;;  %v6383_v56 = vmul.f32 %v8798_v41, %v6279_v47  ;;  %v6387_v27 = vmul.f32 %v8799_v10, %v6279_v47  ;;  %v8800_v35 = vld [vmem:[#allocation95_spill] sm:$0xff]  ;;  %v6403_v41 = vmul.f32 %v8705_v61, %v6279_v47  ;;  %v6407_v10 = vmul.f32 %v8711_v23, %v6279_v47 }
 0x38a   : > { %8796 = vst [vmem:[#allocation7_spill] sm:$0xff] %v6375_v7  ;;  %v6391_v21 = vmul.f32 %v8800_v35, %v6279_v47  ;;  %v8802_v7 = vld [vmem:[#allocation103_spill] sm:$0xff]  ;;  %v6411_v35 = vmul.f32 %v8717_v40, %v6279_v47  ;;  %v6423_v61 = vmul.f32 %v5690_v32, %v6279_v47  ;;  %v6427_v23 = vmul.f32 %v5713_v12, %v6279_v47 }
 0x38b   : > { %v6399_v59 = vmul.f32 %v8802_v7, %v6279_v47  ;;  %v6419_v7 = vsel %vm463_vm11, %v6064_v53, %v462_v55  ;;  %v6431_v40 = vmul.f32 %v5728_v60, %v6279_v47  ;;  %v6438_v17 = vmul.f32 %v5736_v42, %v6279_v47 }
 0x38c   : > { %8803 = vst [vmem:[#allocation12_spill] sm:$0xff] %v6411_v35  ;;  %8804 = vst [vmem:[#allocation13_spill] sm:$0xff] %v6419_v7  ;;  %v6434_v35 = vsel %vm463_vm11, %v462_v55, 0.0  ;;  %v6442_v53 = vmul.f32 %v8736_v37, %v6279_v47  ;;  %v6446_v32 = vmul.f32 %v5752_v16, %v6279_v47  ;;  %v6450_v12 = vmul.f32 %v5824_v38, %v6279_v47  ;;  %v8810_v55 = vld [vmem:[#allocation137_spill] sm:$0xff]  ;;  %v8812_v37 = vld [vmem:[#allocation140_spill] sm:$0xff] }
 0x38d   : > { %8805 = vst [vmem:[#allocation18_spill] sm:$0xff] %v6434_v35  ;;  %8806 = vst [vmem:[#allocation19_spill] sm:$0xff] %v6438_v17  ;;  %v6454_v60 = vmul.f32 %v5975_v3, %v6279_v47  ;;  %v6458_v42 = vmul.f32 %v8810_v55, %v6419_v7  ;;  %v6461_v17 = vadd.f32 %v577_v1, %v6153_v39  ;;  %v8813_v16 = vld [vmem:[#allocation4_spill] sm:$0xff]  ;;  %v8817_v55 = vld [vmem:[#allocation142_spill] sm:$0xff] }
 0x38e   : > { %8807 = vst [vmem:[#allocation24_spill] sm:$0xff] %v6442_v53  ;;  %8808 = vst [vmem:[#allocation25_spill] sm:$0xff] %v6446_v32  ;;  %v6465_v53 = vmul.f32 %v8812_v37, %v6419_v7  ;;  %v6469_v32 = vmul.f32 %v8813_v16, %v6434_v35  ;;  %v8814_v38 = vld [vmem:[#allocation8_spill] sm:$0xff]  ;;  %v6476_v3 = vadd.f32 %v657_v29, %v6157_v34  ;;  %v8818_v39 = vld [vmem:[#allocation9_spill] sm:$0xff] }
 0x38f   : > { %8809 = vst [vmem:[#allocation31_spill] sm:$0xff] %v6450_v12  ;;  %8811 = vst [vmem:[#allocation32_spill] sm:$0xff] %v6461_v17  ;;  %v6473_v12 = vmul.f32 %v8814_v38, %v6434_v35  ;;  %v6480_v47 = vmul.f32 %v8817_v55, %v6419_v7  ;;  %v6484_v1 = vmul.f32 %v8818_v39, %v6434_v35  ;;  %v8820_v16 = vld [vmem:[#allocation144_spill] sm:$0xff]  ;;  %v8821_v38 = vld [vmem:[#allocation14_spill] sm:$0xff] }
 0x390   : > { %8816 = vst [vmem:[#allocation40_spill] sm:$0xff] %v6476_v3  ;;  %v6487_v37 = vadd.f32 %v738_v6, %v6161_v51  ;;  %v6491_v17 = vmul.f32 %v8820_v16, %v6419_v7  ;;  %v6498_v34 = vadd.f32 %v819_v26, %v6165_v50  ;;  %v8823_v29 = vld [vmem:[#allocation146_spill] sm:$0xff]  ;;  %v8824_v39 = vld [vmem:[#allocation15_spill] sm:$0xff]  ;;  %v6509_v51 = vadd.f32 %v900_v19, %v6169_v57  ;;  %v8826_v6 = vld [vmem:[#allocation148_spill] sm:$0xff] }
 0x391   : > { %8815 = vst [vmem:[#allocation39_spill] sm:$0xff] %v6473_v12  ;;  %v6495_v12 = vmul.f32 %v8821_v38, %v6434_v35  ;;  %v6502_v55 = vmul.f32 %v8823_v29, %v6419_v7  ;;  %v6506_v3 = vmul.f32 %v8824_v39, %v6434_v35  ;;  %v6513_v16 = vmul.f32 %v8826_v6, %v6419_v7  ;;  %v8827_v38 = vld [vmem:[#allocation20_spill] sm:$0xff]  ;;  %v8829_v26 = vld [vmem:[#allocation150_spill] sm:$0xff]  ;;  %v8830_v39 = vld [vmem:[#allocation21_spill] sm:$0xff] }
 0x392   : > { %8819 = vst [vmem:[#allocation47_spill] sm:$0xff] %v6487_v37  ;;  %8822 = vst [vmem:[#allocation48_spill] sm:$0xff] %v6498_v34  ;;  %v6517_v37 = vmul.f32 %v8827_v38, %v6434_v35  ;;  %v6520_v50 = vadd.f32 %v981_v30, %v6173_v13  ;;  %v6524_v29 = vmul.f32 %v8829_v26, %v6419_v7  ;;  %v8832_v19 = vld [vmem:[#allocation152_spill] sm:$0xff]  ;;  %v8833_v38 = vld [vmem:[#allocation26_spill] sm:$0xff] }
 0x393   : > { %8825 = vst [vmem:[#allocation55_spill] sm:$0xff] %v6509_v51  ;;  %v6528_v34 = vmul.f32 %v8830_v39, %v6434_v35  ;;  %v6531_v57 = vadd.f32 %v1061_v28, %v6177_v22  ;;  %v6535_v6 = vmul.f32 %v8832_v19, %v6419_v7  ;;  %v6539_v51 = vmul.f32 %v8833_v38, %v6434_v35  ;;  %v8835_v13 = vld [vmem:[#allocation154_spill] sm:$0xff]  ;;  %v8836_v39 = vld [vmem:[#allocation27_spill] sm:$0xff]  ;;  %v8839_v38 = vld [vmem:[#allocation33_spill] sm:$0xff] }
 0x394   : > { %8828 = vst [vmem:[#allocation56_spill] sm:$0xff] %v6520_v50  ;;  %v6542_v30 = vadd.f32 %v1142_v25, %v6181_v44  ;;  %v6546_v26 = vmul.f32 %v8835_v13, %v6419_v7  ;;  %v6550_v50 = vmul.f32 %v8836_v39, %v6434_v35  ;;  %v6553_v28 = vadd.f32 %v1223_v54, %v6185_v48  ;;  %v8838_v22 = vld [vmem:[#allocation30_spill] sm:$0xff]  ;;  %v8841_v25 = vld [vmem:[#allocation37_spill] sm:$0xff] }
 0x395   : > { %8831 = vst [vmem:[#allocation63_spill] sm:$0xff] %v6531_v57  ;;  %v6557_v19 = vmul.f32 %v8838_v22, %v6419_v7  ;;  %v6561_v57 = vmul.f32 %v8839_v38, %v6434_v35  ;;  %v6564_v44 = vadd.f32 %v1304_v20, %v6189_v8  ;;  %v6568_v13 = vmul.f32 %v8841_v25, %v6419_v7  ;;  %v8842_v39 = vld [vmem:[#allocation34_spill] sm:$0xff]  ;;  %v8845_v38 = vld [vmem:[#allocation41_spill] sm:$0xff] }
 0x396   : > { %8834 = vst [vmem:[#allocation64_spill] sm:$0xff] %v6542_v30  ;;  %8837 = vst [vmem:[#allocation71_spill] sm:$0xff] %v6553_v28  ;;  %v6572_v30 = vmul.f32 %v8842_v39, %v6434_v35  ;;  %v6576_v54 = vadd.f32 %v6335_v11, %v6193_v14  ;;  %v8844_v48 = vld [vmem:[#allocation38_spill] sm:$0xff]  ;;  %v6584_v8 = vmul.f32 %v8845_v38, %v6434_v35  ;;  %v8847_v25 = vld [vmem:[#allocation45_spill] sm:$0xff] }
 0x397   : > { %8840 = vst [vmem:[#allocation72_spill] sm:$0xff] %v6564_v44  ;;  %v6580_v22 = vmul.f32 %v8844_v48, %v6419_v7  ;;  %v6588_v20 = vadd.f32 %v6339_v63, %v6197_v46  ;;  %v6592_v39 = vmul.f32 %v8847_v25, %v6419_v7  ;;  %v8848_v44 = vld [vmem:[#allocation42_spill] sm:$0xff]  ;;  %v6600_v14 = vadd.f32 %v6343_v33, %v6201_v52  ;;  %v8856_v25 = vld [vmem:[#allocation53_spill] sm:$0xff] }
 0x398   : > { %8843 = vst [vmem:[#allocation79_spill] sm:$0xff] %v6576_v54  ;;  %v6596_v11 = vmul.f32 %v8848_v44, %v6434_v35  ;;  %v8851_v48 = vld [vmem:[#allocation46_spill] sm:$0xff]  ;;  %v8853_v54 = vld [vmem:[#allocation49_spill] sm:$0xff]  ;;  %v6612_v63 = vadd.f32 %v6347_v36, %v6205_v24  ;;  %v6616_v44 = vmul.f32 %v8856_v25, %v6419_v7  ;;  %v6624_v33 = vadd.f32 %v6351_v15, %v6209_v2 }
 0x399   : > { %8846 = vst [vmem:[#allocation80_spill] sm:$0xff] %v6588_v20  ;;  %8850 = vst [vmem:[#allocation88_spill] sm:$0xff] %v6600_v14  ;;  %v6604_v38 = vmul.f32 %v8851_v48, %v6419_v7  ;;  %v6608_v46 = vmul.f32 %v8853_v54, %v6434_v35  ;;  %v8858_v20 = vld [vmem:[#allocation50_spill] sm:$0xff]  ;;  %v8863_v14 = vld [vmem:[#allocation57_spill] sm:$0xff]  ;;  %v6636_v36 = vadd.f32 %v6355_v45, %v6213_v62 }
 0x39a   : > { %8849 = vst [vmem:[#allocation87_spill] sm:$0xff] %v6596_v11  ;;  %8855 = vst [vmem:[#allocation103_spill] sm:$0xff] %v6612_v63  ;;  %v6620_v52 = vmul.f32 %v8858_v20, %v6434_v35  ;;  %v8861_v48 = vld [vmem:[#allocation54_spill] sm:$0xff]  ;;  %v6632_v24 = vmul.f32 %v8863_v14, %v6434_v35  ;;  %v8866_v25 = vld [vmem:[#allocation61_spill] sm:$0xff]  ;;  %v6648_v2 = vadd.f32 %v6359_v5, %v6217_v0 }
 0x39b   : > { %8852 = vst [vmem:[#allocation95_spill] sm:$0xff] %v6604_v38  ;;  %8854 = vst [vmem:[#allocation96_spill] sm:$0xff] %v6608_v46  ;;  %v6628_v54 = vmul.f32 %v8861_v48, %v6419_v7  ;;  %v6640_v20 = vmul.f32 %v8866_v25, %v6419_v7  ;;  %v8868_v63 = vld [vmem:[#allocation58_spill] sm:$0xff]  ;;  %v6660_v45 = vadd.f32 %v6363_v43, %v6221_v4  ;;  %v8876_v25 = vld [vmem:[#allocation69_spill] sm:$0xff] }
 0x39c   : > { %8857 = vst [vmem:[#allocation137_spill] sm:$0xff] %v6616_v44  ;;  %8859 = vst [vmem:[#allocation140_spill] sm:$0xff] %v6620_v52  ;;  %v6644_v15 = vmul.f32 %v8868_v63, %v6434_v35  ;;  %v8871_v48 = vld [vmem:[#allocation62_spill] sm:$0xff]  ;;  %v6664_v63 = vmul.f32 %v8876_v25, %v6419_v7  ;;  %v6672_v5 = vadd.f32 %v6367_v49, %v6225_v31  ;;  %v8885_v43 = vld [vmem:[#allocation201_spill] sm:$0xff] }
 0x39d   : > { %8860 = vst [vmem:[#allocation4_spill] sm:$0xff] %v6624_v33  ;;  %8862 = vst [vmem:[#allocation8_spill] sm:$0xff] %v6628_v54  ;;  %v6652_v14 = vmul.f32 %v8871_v48, %v6419_v7  ;;  %v8873_v33 = vld [vmem:[#allocation65_spill] sm:$0xff]  ;;  %v8881_v48 = vld [vmem:[#allocation70_spill] sm:$0xff] }
 0x39e   : > { %8864 = vst [vmem:[#allocation142_spill] sm:$0xff] %v6632_v24  ;;  %8865 = vst [vmem:[#allocation9_spill] sm:$0xff] %v6636_v36  ;;  %v6656_v62 = vmul.f32 %v8873_v33, %v6434_v35  ;;  %v8878_v36 = vld [vmem:[#allocation66_spill] sm:$0xff]  ;;  %v6676_v33 = vmul.f32 %v8881_v48, %v6419_v7  ;;  %v8888_v28 = vld [vmem:[#allocation169_spill] sm:$0xff] }
 0x39f   : > { %8867 = vst [vmem:[#allocation144_spill] sm:$0xff] %v6640_v20  ;;  %8869 = vst [vmem:[#allocation14_spill] sm:$0xff] %v6644_v15  ;;  %v6668_v0 = vmul.f32 %v8878_v36, %v6434_v35  ;;  %v6688_v36 = vmul.f32 %v8888_v28, %v6419_v7  ;;  %v8892_v49 = vld [vmem:[#allocation77_spill] sm:$0xff]  ;;  %v9036_v15 = vld [vmem:[#allocation43_spill] sm:$0xff] }
 0x3a0   : > { %8870 = vst [vmem:[#allocation146_spill] sm:$0xff] %v6648_v2  ;;  %8872 = vst [vmem:[#allocation15_spill] sm:$0xff] %v6652_v14  ;;  %v8883_v2 = vld [vmem:[#allocation73_spill] sm:$0xff]  ;;  %v9035_v14 = vld [vmem:[#allocation159_spill] sm:$0xff] }
 0x3a1   : > { %8874 = vst [vmem:[#allocation148_spill] sm:$0xff] %v6656_v62  ;;  %8875 = vst [vmem:[#allocation20_spill] sm:$0xff] %v6660_v45  ;;  %v6680_v4 = vmul.f32 %v8883_v2, %v6434_v35  ;;  %v8886_v45 = vld [vmem:[#allocation6_spill] sm:$0xff]  ;;  %v9034_v62 = vld [vmem:[#allocation36_spill] sm:$0xff] }
 0x3a2   : > { %8877 = vst [vmem:[#allocation150_spill] sm:$0xff] %v6664_v63  ;;  %8879 = vst [vmem:[#allocation21_spill] sm:$0xff] %v6668_v0  ;;  %v6684_v25 = vadd.f32 %v8886_v45, %v8885_v43  ;;  %v8890_v0 = vld [vmem:[#allocation74_spill] sm:$0xff]  ;;  %v9037_v20 = vld [vmem:[#allocation160_spill] sm:$0xff] }
 0x3a3   : > { %8880 = vst [vmem:[#allocation152_spill] sm:$0xff] %v6672_v5  ;;  %8882 = vst [vmem:[#allocation26_spill] sm:$0xff] %v6676_v33  ;;  %v6692_v31 = vmul.f32 %v8890_v0, %v6434_v35  ;;  %v8893_v5 = vld [vmem:[#allocation7_spill] sm:$0xff]  ;;  %v8899_v43 = vld [vmem:[#allocation78_spill] sm:$0xff] }
 0x3a4   : > { %8884 = vst [vmem:[#allocation154_spill] sm:$0xff] %v6680_v4  ;;  %8887 = vst [vmem:[#allocation27_spill] sm:$0xff] %v6684_v25  ;;  %v6696_v48 = vadd.f32 %v8893_v5, %v8892_v49  ;;  %v8895_v33 = vld [vmem:[#allocation171_spill] sm:$0xff]  ;;  %v8897_v4 = vld [vmem:[#allocation81_spill] sm:$0xff]  ;;  %v6708_v28 = vadd.f32 %v6379_v58, %v8899_v43 }
 0x3a5   : > { %8889 = vst [vmem:[#allocation30_spill] sm:$0xff] %v6688_v36  ;;  %8891 = vst [vmem:[#allocation33_spill] sm:$0xff] %v6692_v31  ;;  %v6700_v2 = vmul.f32 %v8895_v33, %v6419_v7  ;;  %v6704_v45 = vmul.f32 %v8897_v4, %v6434_v35  ;;  %v8901_v25 = vld [vmem:[#allocation173_spill] sm:$0xff]  ;;  %v8903_v31 = vld [vmem:[#allocation82_spill] sm:$0xff] }
 0x3a6   : > { %8894 = vst [vmem:[#allocation37_spill] sm:$0xff] %v6696_v48  ;;  %8900 = vst [vmem:[#allocation41_spill] sm:$0xff] %v6708_v28  ;;  %v6712_v0 = vmul.f32 %v8901_v25, %v6419_v7  ;;  %v6716_v5 = vmul.f32 %v8903_v31, %v6434_v35  ;;  %v8905_v49 = vld [vmem:[#allocation85_spill] sm:$0xff]  ;;  %v8907_v48 = vld [vmem:[#allocation175_spill] sm:$0xff] }
 0x3a7   : > { %8896 = vst [vmem:[#allocation34_spill] sm:$0xff] %v6700_v2  ;;  %8898 = vst [vmem:[#allocation38_spill] sm:$0xff] %v6704_v45  ;;  %v6720_v33 = vadd.f32 %v6383_v56, %v8905_v49  ;;  %v6724_v4 = vmul.f32 %v8907_v48, %v6419_v7  ;;  %v8909_v45 = vld [vmem:[#allocation89_spill] sm:$0xff]  ;;  %v8911_v43 = vld [vmem:[#allocation86_spill] sm:$0xff] }
 0x3a8   : > { %8902 = vst [vmem:[#allocation45_spill] sm:$0xff] %v6712_v0  ;;  %8904 = vst [vmem:[#allocation42_spill] sm:$0xff] %v6716_v5  ;;  %v6728_v58 = vmul.f32 %v8909_v45, %v6434_v35  ;;  %v6732_v25 = vadd.f32 %v6387_v27, %v8911_v43  ;;  %v8913_v28 = vld [vmem:[#allocation177_spill] sm:$0xff]  ;;  %v8915_v5 = vld [vmem:[#allocation90_spill] sm:$0xff] }
 0x3a9   : > { %8906 = vst [vmem:[#allocation46_spill] sm:$0xff] %v6720_v33  ;;  %8908 = vst [vmem:[#allocation49_spill] sm:$0xff] %v6724_v4  ;;  %v6736_v31 = vmul.f32 %v8913_v28, %v6419_v7  ;;  %v6740_v56 = vmul.f32 %v8915_v5, %v6434_v35  ;;  %v8917_v49 = vld [vmem:[#allocation93_spill] sm:$0xff]  ;;  %v8919_v33 = vld [vmem:[#allocation179_spill] sm:$0xff] }
 0x3aa   : > { %8910 = vst [vmem:[#allocation53_spill] sm:$0xff] %v6728_v58  ;;  %8912 = vst [vmem:[#allocation50_spill] sm:$0xff] %v6732_v25  ;;  %v6744_v48 = vadd.f32 %v6391_v21, %v8917_v49  ;;  %v6748_v45 = vmul.f32 %v8919_v33, %v6419_v7  ;;  %v8921_v58 = vld [vmem:[#allocation97_spill] sm:$0xff]  ;;  %v8923_v43 = vld [vmem:[#allocation94_spill] sm:$0xff] }
 0x3ab   : > { %8914 = vst [vmem:[#allocation54_spill] sm:$0xff] %v6736_v31  ;;  %8916 = vst [vmem:[#allocation57_spill] sm:$0xff] %v6740_v56  ;;  %v6752_v27 = vmul.f32 %v8921_v58, %v6434_v35  ;;  %v6756_v28 = vadd.f32 %v6395_v18, %v8923_v43  ;;  %v8925_v25 = vld [vmem:[#allocation182_spill] sm:$0xff]  ;;  %v8929_v49 = vld [vmem:[#allocation101_spill] sm:$0xff] }
 0x3ac   : > { %8918 = vst [vmem:[#allocation61_spill] sm:$0xff] %v6744_v48  ;;  %8920 = vst [vmem:[#allocation58_spill] sm:$0xff] %v6748_v45  ;;  %v6760_v5 = vmul.f32 %v8925_v25, %v6419_v7  ;;  %v8927_v56 = vld [vmem:[#allocation98_spill] sm:$0xff]  ;;  %v6768_v33 = vadd.f32 %v6399_v59, %v8929_v49  ;;  %v8931_v48 = vld [vmem:[#allocation184_spill] sm:$0xff] }
 0x3ad   : > { %8922 = vst [vmem:[#allocation62_spill] sm:$0xff] %v6752_v27  ;;  %8924 = vst [vmem:[#allocation65_spill] sm:$0xff] %v6756_v28  ;;  %v6764_v21 = vmul.f32 %v8927_v56, %v6434_v35  ;;  %v6772_v58 = vmul.f32 %v8931_v48, %v6419_v7  ;;  %v8933_v27 = vld [vmem:[#allocation105_spill] sm:$0xff]  ;;  %v8935_v43 = vld [vmem:[#allocation102_spill] sm:$0xff] }
 0x3ae   : > { %8926 = vst [vmem:[#allocation69_spill] sm:$0xff] %v6760_v5  ;;  %8930 = vst [vmem:[#allocation70_spill] sm:$0xff] %v6768_v33  ;;  %v6776_v18 = vmul.f32 %v8933_v27, %v6434_v35  ;;  %v6780_v25 = vadd.f32 %v6403_v41, %v8935_v43  ;;  %v8937_v28 = vld [vmem:[#allocation106_spill] sm:$0xff]  ;;  %v8941_v49 = vld [vmem:[#allocation203_spill] sm:$0xff] }
 0x3af   : > { %8928 = vst [vmem:[#allocation66_spill] sm:$0xff] %v6764_v21  ;;  %8932 = vst [vmem:[#allocation73_spill] sm:$0xff] %v6772_v58  ;;  %v6784_v56 = vmul.f32 %v8937_v28, %v6419_v7  ;;  %v8939_v21 = vld [vmem:[#allocation109_spill] sm:$0xff]  ;;  %v6792_v48 = vadd.f32 %v6407_v10, %v8941_v49  ;;  %v8943_v33 = vld [vmem:[#allocation110_spill] sm:$0xff] }
 0x3b0   : > { %8934 = vst [vmem:[#allocation201_spill] sm:$0xff] %v6776_v18  ;;  %8936 = vst [vmem:[#allocation6_spill] sm:$0xff] %v6780_v25  ;;  %v6788_v59 = vmul.f32 %v8939_v21, %v6434_v35  ;;  %v6796_v27 = vmul.f32 %v8943_v33, %v6419_v7  ;;  %v8945_v18 = vld [vmem:[#allocation113_spill] sm:$0xff]  ;;  %v8947_v43 = vld [vmem:[#allocation204_spill] sm:$0xff] }
 0x3b1   : > { %8938 = vst [vmem:[#allocation169_spill] sm:$0xff] %v6784_v56  ;;  %8942 = vst [vmem:[#allocation77_spill] sm:$0xff] %v6792_v48  ;;  %v6800_v41 = vmul.f32 %v8945_v18, %v6434_v35  ;;  %v8948_v25 = vld [vmem:[#allocation12_spill] sm:$0xff]  ;;  %v8950_v56 = vld [vmem:[#allocation114_spill] sm:$0xff] }
 0x3b2   : > { %8940 = vst [vmem:[#allocation74_spill] sm:$0xff] %v6788_v59  ;;  %8944 = vst [vmem:[#allocation7_spill] sm:$0xff] %v6796_v27  ;;  %v6804_v28 = vadd.f32 %v8948_v25, %v8947_v43  ;;  %v6808_v21 = vmul.f32 %v8950_v56, %v6419_v7  ;;  %v8952_v59 = vld [vmem:[#allocation117_spill] sm:$0xff]  ;;  %v8960_v43 = vld [vmem:[#allocation207_spill] sm:$0xff] }
 0x3b3   : > { %8946 = vst [vmem:[#allocation171_spill] sm:$0xff] %v6800_v41  ;;  %v6812_v10 = vmul.f32 %v8952_v59, %v6434_v35  ;;  %v8954_v49 = vld [vmem:[#allocation205_spill] sm:$0xff]  ;;  %v8958_v41 = vld [vmem:[#allocation123_spill] sm:$0xff]  ;;  %v6828_v56 = vadd.f32 %v6423_v61, %v8960_v43  ;;  %v9023_v27 = vld [vmem:[#allocation22_spill] sm:$0xff] }
 0x3b4   : > { %8949 = vst [vmem:[#allocation81_spill] sm:$0xff] %v6804_v28  ;;  %8951 = vst [vmem:[#allocation78_spill] sm:$0xff] %v6808_v21  ;;  %v6816_v33 = vadd.f32 %v6415_v9, %v8954_v49  ;;  %v8956_v48 = vld [vmem:[#allocation185_spill] sm:$0xff]  ;;  %v6824_v25 = vmul.f32 %v8958_v41, %v6434_v35  ;;  %v8962_v28 = vld [vmem:[#allocation187_spill] sm:$0xff] }
 0x3b5   : > { %8953 = vst [vmem:[#allocation173_spill] sm:$0xff] %v6812_v10  ;;  %v6820_v18 = vmul.f32 %v8956_v48, %v6419_v7  ;;  %8961 = vst [vmem:[#allocation89_spill] sm:$0xff] %v6828_v56  ;;  %v6832_v59 = vmul.f32 %v8962_v28, %v6419_v7  ;;  %v8964_v10 = vld [vmem:[#allocation125_spill] sm:$0xff]  ;;  %v8966_v49 = vld [vmem:[#allocation208_spill] sm:$0xff] }
 0x3b6   : > { %8955 = vst [vmem:[#allocation82_spill] sm:$0xff] %v6816_v33  ;;  %8959 = vst [vmem:[#allocation175_spill] sm:$0xff] %v6824_v25  ;;  %v6836_v9 = vmul.f32 %v8964_v10, %v6434_v35  ;;  %v6840_v48 = vadd.f32 %v6427_v23, %v8966_v49  ;;  %v475_v33 = vpop.permute.xlu1 %474  ;;  %v8968_v41 = vld [vmem:[#allocation189_spill] sm:$0xff]  ;;  %v8970_v61 = vld [vmem:[#allocation127_spill] sm:$0xff] }
 0x3b7   : > { %8957 = vst [vmem:[#allocation85_spill] sm:$0xff] %v6820_v18  ;;  %8963 = vst [vmem:[#allocation86_spill] sm:$0xff] %v6832_v59  ;;  %v6844_v25 = vmul.f32 %v8968_v41, %v6419_v7  ;;  %v6848_v43 = vmul.f32 %v8970_v61, %v6434_v35  ;;  %v8972_v56 = vld [vmem:[#allocation209_spill] sm:$0xff]  ;;  %v8974_v10 = vld [vmem:[#allocation192_spill] sm:$0xff] }
 0x3b8   : > { %8965 = vst [vmem:[#allocation177_spill] sm:$0xff] %v6836_v9  ;;  %8967 = vst [vmem:[#allocation90_spill] sm:$0xff] %v6840_v48  ;;  %v6852_v28 = vadd.f32 %v6431_v40, %v8972_v56  ;;  %v6856_v9 = vmul.f32 %v8974_v10, %v6419_v7  ;;  %v8976_v23 = vld [vmem:[#allocation129_spill] sm:$0xff]  ;;  %v8978_v48 = vld [vmem:[#allocation210_spill] sm:$0xff] }
 0x3b9   : > { %8969 = vst [vmem:[#allocation93_spill] sm:$0xff] %v6844_v25  ;;  %8971 = vst [vmem:[#allocation179_spill] sm:$0xff] %v6848_v43  ;;  %v6860_v49 = vmul.f32 %v8976_v23, %v6434_v35  ;;  %v8979_v59 = vld [vmem:[#allocation19_spill] sm:$0xff]  ;;  %v8981_v25 = vld [vmem:[#allocation130_spill] sm:$0xff] }
 0x3ba   : > { %8973 = vst [vmem:[#allocation97_spill] sm:$0xff] %v6852_v28  ;;  %8975 = vst [vmem:[#allocation94_spill] sm:$0xff] %v6856_v9  ;;  %v6864_v41 = vadd.f32 %v8979_v59, %v8978_v48  ;;  %v6868_v61 = vmul.f32 %v8981_v25, %v6419_v7  ;;  %v8983_v43 = vld [vmem:[#allocation133_spill] sm:$0xff]  ;;  %v8985_v56 = vld [vmem:[#allocation211_spill] sm:$0xff]  ;;  %v6886_v48 = vpop.permute.xlu0 %3701  ;;  %v6987_v31 = vpop.permute.xlu1 %3699 }
 0x3bb   : > { %8977 = vst [vmem:[#allocation182_spill] sm:$0xff] %v6860_v49  ;;  %v6872_v40 = vmul.f32 %v8983_v43, %v6434_v35  ;;  %v8986_v28 = vld [vmem:[#allocation24_spill] sm:$0xff]  ;;  %v8988_v9 = vld [vmem:[#allocation195_spill] sm:$0xff]  ;;  %8992 = vst [vmem:[#allocation109_spill] sm:$0xff] %v6886_v48 }
 0x3bc   : > { %8980 = vst [vmem:[#allocation98_spill] sm:$0xff] %v6864_v41  ;;  %8982 = vst [vmem:[#allocation101_spill] sm:$0xff] %v6868_v61  ;;  %v6876_v10 = vadd.f32 %v8986_v28, %v8985_v56  ;;  %v6880_v23 = vmul.f32 %v8988_v9, %v6419_v7  ;;  %v8990_v49 = vld [vmem:[#allocation135_spill] sm:$0xff]  ;;  %v8993_v25 = vld [vmem:[#allocation202_spill] sm:$0xff] }
 0x3bd   : > { %8984 = vst [vmem:[#allocation184_spill] sm:$0xff] %v6872_v40  ;;  %v6884_v59 = vmul.f32 %v8990_v49, %v6434_v35  ;;  %v6890_v41 = vsel %vm463_vm11, %v8993_v25, %v475_v33  ;;  %v8995_v43 = vld [vmem:[#allocation212_spill] sm:$0xff]  ;;  %v8996_v40 = vld [vmem:[#allocation25_spill] sm:$0xff]  ;;  %v6905_v49 = vsel %vm463_vm11, %v475_v33, 0.0  ;;  %v9006_v25 = vld [vmem:[#allocation199_spill] sm:$0xff]  ;;  %v6925_v33 = vmul.f32 %v6886_v48, %v6434_v35 }
 0x3be   : > { %8987 = vst [vmem:[#allocation105_spill] sm:$0xff] %v6876_v10  ;;  %8989 = vst [vmem:[#allocation102_spill] sm:$0xff] %v6880_v23  ;;  %v6894_v61 = vadd.f32 %v8996_v40, %v8995_v43  ;;  %v8998_v28 = vld [vmem:[#allocation197_spill] sm:$0xff]  ;;  %v9004_v23 = vld [vmem:[#allocation31_spill] sm:$0xff]  ;;  %v6913_v21 = vmul.f32 %v9006_v25, %v6419_v7  ;;  %vm3703_vm11 = vcmask 695296  }
 0x3bf   : > { %8991 = vst [vmem:[#allocation106_spill] sm:$0xff] %v6884_v59  ;;  %8994 = vst [vmem:[#allocation203_spill] sm:$0xff] %v6890_v41  ;;  %v6898_v56 = vmul.f32 %v8998_v28, %v6419_v7  ;;  %v9000_v9 = vld [vmem:[#allocation157_spill] sm:$0xff]  ;;  %v9008_v40 = vld [vmem:[#allocation180_spill] sm:$0xff] }
 0x3c0   : > { %8997 = vst [vmem:[#allocation110_spill] sm:$0xff] %v6894_v61  ;;  %v6902_v10 = vmul.f32 %v9000_v9, %v6434_v35  ;;  %9002 = vst [vmem:[#allocation12_spill] sm:$0xff] %v6905_v49  ;;  %v9003_v59 = vld [vmem:[#allocation213_spill] sm:$0xff]  ;;  %v6917_v43 = vmul.f32 %v9008_v40, %v6434_v35  ;;  %v9010_v28 = vld [vmem:[#allocation214_spill] sm:$0xff] }
 0x3c1   : > { %8999 = vst [vmem:[#allocation113_spill] sm:$0xff] %v6898_v56  ;;  %v6909_v18 = vadd.f32 %v9004_v23, %v9003_v59  ;;  %9007 = vst [vmem:[#allocation117_spill] sm:$0xff] %v6913_v21  ;;  %v6921_v61 = vadd.f32 %v6454_v60, %v9010_v28  ;;  %v9012_v9 = vld [vmem:[#allocation139_spill] sm:$0xff]  ;;  %v9013_v59 = vld [vmem:[#allocation141_spill] sm:$0xff] }
 0x3c2   : > { %9001 = vst [vmem:[#allocation204_spill] sm:$0xff] %v6902_v10  ;;  %9009 = vst [vmem:[#allocation205_spill] sm:$0xff] %v6917_v43  ;;  %v6929_v23 = vmul.f32 %v9012_v9, %v6890_v41  ;;  %v6933_v25 = vmul.f32 %v9013_v59, %v6890_v41  ;;  %v9015_v7 = vld [vmem:[#allocation5_spill] sm:$0xff]  ;;  %v9016_v28 = vld [vmem:[#allocation10_spill] sm:$0xff] }
 0x3c3   : > { %9005 = vst [vmem:[#allocation114_spill] sm:$0xff] %v6909_v18  ;;  %9011 = vst [vmem:[#allocation185_spill] sm:$0xff] %v6921_v61  ;;  %v9014_v18 = vld [vmem:[#allocation143_spill] sm:$0xff]  ;;  %v6941_v60 = vmul.f32 %v9015_v7, %v6905_v49  ;;  %v6945_v35 = vmul.f32 %v9016_v28, %v6905_v49  ;;  %v9018_v43 = vld [vmem:[#allocation145_spill] sm:$0xff] }
 0x3c4   : > { %v6937_v40 = vmul.f32 %v9014_v18, %v6890_v41  ;;  %v9017_v61 = vld [vmem:[#allocation11_spill] sm:$0xff]  ;;  %v6953_v59 = vmul.f32 %v9018_v43, %v6890_v41  ;;  %v9019_v21 = vld [vmem:[#allocation16_spill] sm:$0xff]  ;;  %v9021_v48 = vld [vmem:[#allocation17_spill] sm:$0xff]  ;;  %v6973_v43 = vmul.f32 %v9023_v27, %v6905_v49  ;;  %9027 = vst [vmem:[#allocation123_spill] sm:$0xff] %v6987_v31 }
 0x3c5   : > { %v6949_v9 = vmul.f32 %v9017_v61, %v6905_v49  ;;  %v6957_v18 = vmul.f32 %v9019_v21, %v6905_v49  ;;  %v9020_v10 = vld [vmem:[#allocation147_spill] sm:$0xff]  ;;  %v6965_v28 = vmul.f32 %v9021_v48, %v6905_v49  ;;  %v9022_v56 = vld [vmem:[#allocation149_spill] sm:$0xff]  ;;  %v9033_v31 = vld [vmem:[#allocation158_spill] sm:$0xff] }
 0x3c6   : > { %v6961_v7 = vmul.f32 %v9020_v10, %v6890_v41  ;;  %v6969_v61 = vmul.f32 %v9022_v56, %v6890_v41  ;;  %v9024_v58 = vld [vmem:[#allocation151_spill] sm:$0xff]  ;;  %v9026_v45 = vld [vmem:[#allocation153_spill] sm:$0xff]  ;;  %v9028_v56 = vld [vmem:[#allocation28_spill] sm:$0xff] }
 0x3c7   : > { %v6977_v21 = vmul.f32 %v9024_v58, %v6890_v41  ;;  %v9025_v5 = vld [vmem:[#allocation23_spill] sm:$0xff]  ;;  %v6985_v48 = vmul.f32 %v9026_v45, %v6890_v41  ;;  %v6991_v4 = vmul.f32 %v9028_v56, %v6905_v49  ;;  %v9030_v58 = vld [vmem:[#allocation29_spill] sm:$0xff]  ;;  %v7011_v56 = vmul.f32 %v9033_v31, %v6890_v41  ;;  %v9038_v24 = vld [vmem:[#allocation44_spill] sm:$0xff] }
 0x3c8   : > { %v6981_v10 = vmul.f32 %v9025_v5, %v6905_v49  ;;  %v9029_v27 = vld [vmem:[#allocation155_spill] sm:$0xff]  ;;  %v6999_v2 = vmul.f32 %v9030_v58, %v6905_v49  ;;  %v9031_v5 = vld [vmem:[#allocation156_spill] sm:$0xff]  ;;  %v7019_v58 = vmul.f32 %v9035_v14, %v6890_v41  ;;  %v7031_v31 = vmul.f32 %v9038_v24, %v6905_v49  ;;  %v9040_v54 = vld [vmem:[#allocation161_spill] sm:$0xff] }
 0x3c9   : > { %v6995_v0 = vmul.f32 %v9029_v27, %v6890_v41  ;;  %v7003_v36 = vmul.f32 %v9031_v5, %v6890_v41  ;;  %v9032_v45 = vld [vmem:[#allocation35_spill] sm:$0xff]  ;;  %v7015_v27 = vmul.f32 %v9034_v62, %v6905_v49  ;;  %v7023_v5 = vmul.f32 %v9036_v15, %v6905_v49  ;;  %v9044_v44 = vld [vmem:[#allocation162_spill] sm:$0xff]  ;;  %v9046_v46 = vld [vmem:[#allocation52_spill] sm:$0xff] }
 0x3ca   : > { %v7007_v63 = vmul.f32 %v9032_v45, %v6905_v49  ;;  %v7027_v45 = vmul.f32 %v9037_v20, %v6890_v41  ;;  %9039 = vst [vmem:[#allocation207_spill] sm:$0xff] %v7031_v31  ;;  %v7035_v62 = vmul.f32 %v9040_v54, %v6890_v41  ;;  %v9042_v52 = vld [vmem:[#allocation51_spill] sm:$0xff]  ;;  %v7043_v15 = vmul.f32 %v9044_v44, %v6890_v41 }
 0x3cb   : > { %v7039_v14 = vmul.f32 %v9042_v52, %v6905_v49  ;;  %v7047_v20 = vmul.f32 %v9046_v46, %v6905_v49  ;;  %v9048_v38 = vld [vmem:[#allocation163_spill] sm:$0xff] }
 0x3cc   : > { %9041 = vst [vmem:[#allocation187_spill] sm:$0xff] %v7035_v62  ;;  %9045 = vst [vmem:[#allocation208_spill] sm:$0xff] %v7043_v15  ;;  %v7051_v24 = vmul.f32 %v9048_v38, %v6890_v41  ;;  %v9050_v31 = vld [vmem:[#allocation59_spill] sm:$0xff]  ;;  %v9052_v62 = vld [vmem:[#allocation164_spill] sm:$0xff] }
 0x3cd   : > { %9043 = vst [vmem:[#allocation125_spill] sm:$0xff] %v7039_v14  ;;  %9047 = vst [vmem:[#allocation189_spill] sm:$0xff] %v7047_v20  ;;  %v7055_v54 = vmul.f32 %v9050_v31, %v6905_v49  ;;  %v7059_v52 = vmul.f32 %v9052_v62, %v6890_v41  ;;  %v9054_v14 = vld [vmem:[#allocation60_spill] sm:$0xff]  ;;  %v9056_v15 = vld [vmem:[#allocation166_spill] sm:$0xff] }
 0x3ce   : > { %9049 = vst [vmem:[#allocation127_spill] sm:$0xff] %v7051_v24  ;;  %v7063_v44 = vmul.f32 %v9054_v14, %v6905_v49  ;;  %v7067_v46 = vmul.f32 %v9056_v15, %v6890_v41  ;;  %v9058_v20 = vld [vmem:[#allocation67_spill] sm:$0xff] }
 0x3cf   : > { %9051 = vst [vmem:[#allocation209_spill] sm:$0xff] %v7055_v54  ;;  %9053 = vst [vmem:[#allocation192_spill] sm:$0xff] %v7059_v52  ;;  %v7071_v38 = vmul.f32 %v9058_v20, %v6905_v49  ;;  %v9060_v24 = vld [vmem:[#allocation167_spill] sm:$0xff]  ;;  %v9062_v54 = vld [vmem:[#allocation68_spill] sm:$0xff] }
 0x3d0   : > { %9055 = vst [vmem:[#allocation129_spill] sm:$0xff] %v7063_v44  ;;  %9057 = vst [vmem:[#allocation210_spill] sm:$0xff] %v7067_v46  ;;  %v7075_v31 = vmul.f32 %v9060_v24, %v6890_v41  ;;  %v7079_v62 = vmul.f32 %v9062_v54, %v6905_v49  ;;  %v9064_v52 = vld [vmem:[#allocation168_spill] sm:$0xff]  ;;  %v7085_v44 = vpop.permute.xlu1 %3722  ;;  %v9067_v15 = vld [vmem:[#allocation75_spill] sm:$0xff] }
 0x3d1   : > { %9059 = vst [vmem:[#allocation19_spill] sm:$0xff] %v7071_v38  ;;  %v7083_v14 = vmul.f32 %v9064_v52, %v6890_v41  ;;  %9066 = vst [vmem:[#allocation24_spill] sm:$0xff] %v7085_v44  ;;  %v7089_v46 = vmul.f32 %v9067_v15, %v6905_v49  ;;  %v9069_v20 = vld [vmem:[#allocation170_spill] sm:$0xff]  ;;  %v9071_v24 = vld [vmem:[#allocation76_spill] sm:$0xff] }
 0x3d2   : > { %9061 = vst [vmem:[#allocation130_spill] sm:$0xff] %v7075_v31  ;;  %9063 = vst [vmem:[#allocation133_spill] sm:$0xff] %v7079_v62  ;;  %v7093_v38 = vmul.f32 %v9069_v20, %v6890_v41  ;;  %v7097_v31 = vmul.f32 %v9071_v24, %v6905_v49  ;;  %v9073_v54 = vld [vmem:[#allocation172_spill] sm:$0xff]  ;;  %v9075_v52 = vld [vmem:[#allocation83_spill] sm:$0xff] }
 0x3d3   : > { %9065 = vst [vmem:[#allocation211_spill] sm:$0xff] %v7083_v14  ;;  %9068 = vst [vmem:[#allocation195_spill] sm:$0xff] %v7089_v46  ;;  %v7101_v62 = vmul.f32 %v9073_v54, %v6890_v41  ;;  %v7105_v14 = vmul.f32 %v9075_v52, %v6905_v49  ;;  %v9077_v44 = vld [vmem:[#allocation174_spill] sm:$0xff]  ;;  %v9079_v46 = vld [vmem:[#allocation84_spill] sm:$0xff] }
 0x3d4   : > { %9070 = vst [vmem:[#allocation135_spill] sm:$0xff] %v7093_v38  ;;  %9072 = vst [vmem:[#allocation202_spill] sm:$0xff] %v7097_v31  ;;  %v7109_v15 = vmul.f32 %v9077_v44, %v6890_v41  ;;  %v7113_v20 = vmul.f32 %v9079_v46, %v6905_v49  ;;  %v9081_v38 = vld [vmem:[#allocation176_spill] sm:$0xff]  ;;  %v7119_v31 = vpop.permute.xlu0 %3724  ;;  %v9084_v54 = vld [vmem:[#allocation91_spill] sm:$0xff] }
 0x3d5   : > { %9074 = vst [vmem:[#allocation212_spill] sm:$0xff] %v7101_v62  ;;  %9076 = vst [vmem:[#allocation25_spill] sm:$0xff] %v7105_v14  ;;  %v7117_v24 = vmul.f32 %v9081_v38, %v6890_v41  ;;  %v7123_v62 = vmul.f32 %v9084_v54, %v6905_v49  ;;  %v9086_v52 = vld [vmem:[#allocation178_spill] sm:$0xff]  ;;  %v9088_v44 = vld [vmem:[#allocation92_spill] sm:$0xff] }
 0x3d6   : > { %9078 = vst [vmem:[#allocation197_spill] sm:$0xff] %v7109_v15  ;;  %9080 = vst [vmem:[#allocation157_spill] sm:$0xff] %v7113_v20  ;;  %v7127_v14 = vmul.f32 %v9086_v52, %v6890_v41  ;;  %v7131_v15 = vmul.f32 %v9088_v44, %v6905_v49  ;;  %v9090_v46 = vld [vmem:[#allocation181_spill] sm:$0xff]  ;;  %v9092_v38 = vld [vmem:[#allocation99_spill] sm:$0xff] }
 0x3d7   : > { %9082 = vst [vmem:[#allocation213_spill] sm:$0xff] %v7117_v24  ;;  %9083 = vst [vmem:[#allocation31_spill] sm:$0xff] %v7119_v31  ;;  %v7135_v20 = vmul.f32 %v9090_v46, %v6890_v41  ;;  %v7139_v24 = vmul.f32 %v9092_v38, %v6905_v49  ;;  %v9094_v11 = vld [vmem:[#allocation183_spill] sm:$0xff] }
 0x3d8   : > { %9085 = vst [vmem:[#allocation199_spill] sm:$0xff] %v7123_v62  ;;  %9087 = vst [vmem:[#allocation180_spill] sm:$0xff] %v7127_v14  ;;  %v7143_v54 = vmul.f32 %v9094_v11, %v6890_v41  ;;  %v9096_v62 = vld [vmem:[#allocation100_spill] sm:$0xff] }
 0x3d9   : > { %9089 = vst [vmem:[#allocation214_spill] sm:$0xff] %v7131_v15  ;;  %9091 = vst [vmem:[#allocation139_spill] sm:$0xff] %v7135_v20  ;;  %v7147_v52 = vmul.f32 %v9096_v62, %v6905_v49  ;;  %v9098_v14 = vld [vmem:[#allocation104_spill] sm:$0xff]  ;;  %v9100_v15 = vld [vmem:[#allocation107_spill] sm:$0xff] }
 0x3da   : > { %9093 = vst [vmem:[#allocation141_spill] sm:$0xff] %v7139_v24  ;;  %9095 = vst [vmem:[#allocation143_spill] sm:$0xff] %v7143_v54  ;;  %v7151_v44 = vmul.f32 %v9098_v14, %v6890_v41  ;;  %v7155_v46 = vmul.f32 %v9100_v15, %v6905_v49  ;;  %v9102_v20 = vld [vmem:[#allocation108_spill] sm:$0xff]  ;;  %v9104_v24 = vld [vmem:[#allocation111_spill] sm:$0xff] }
 0x3db   : > { %9097 = vst [vmem:[#allocation5_spill] sm:$0xff] %v7147_v52  ;;  %v7159_v38 = vmul.f32 %v9102_v20, %v6890_v41  ;;  %v7163_v11 = vmul.f32 %v9104_v24, %v6905_v49  ;;  %v9106_v54 = vld [vmem:[#allocation112_spill] sm:$0xff]  ;;  %v9108_v52 = vld [vmem:[#allocation115_spill] sm:$0xff]  ;;  %v3732_v24 = vmul.f32 %v7119_v31, %v6905_v49 }
 0x3dc   : > { %9099 = vst [vmem:[#allocation10_spill] sm:$0xff] %v7151_v44  ;;  %9101 = vst [vmem:[#allocation11_spill] sm:$0xff] %v7155_v46  ;;  %v7167_v62 = vmul.f32 %v9106_v54, %v6890_v41  ;;  %v7171_v14 = vmul.f32 %v9108_v52, %v6905_v49  ;;  %v9110_v44 = vld [vmem:[#allocation116_spill] sm:$0xff]  ;;  %v9112_v46 = vld [vmem:[#allocation122_spill] sm:$0xff] }
 0x3dd   : > { %9103 = vst [vmem:[#allocation145_spill] sm:$0xff] %v7159_v38  ;;  %9105 = vst [vmem:[#allocation16_spill] sm:$0xff] %v7163_v11  ;;  %v7175_v15 = vmul.f32 %v9110_v44, %v6890_v41  ;;  %v7179_v20 = vmul.f32 %v9112_v46, %v6905_v49  ;;  %v7183_v11 = vpop.permute.xlu1 %3780  ;;  %v9115_v54 = vld [vmem:[#allocation186_spill] sm:$0xff]  ;;  %v9117_v52 = vld [vmem:[#allocation124_spill] sm:$0xff] }
 0x3de   : > { %9107 = vst [vmem:[#allocation147_spill] sm:$0xff] %v7167_v62  ;;  %9109 = vst [vmem:[#allocation17_spill] sm:$0xff] %v7171_v14  ;;  %v7187_v62 = vmul.f32 %v9115_v54, %v6890_v41  ;;  %v7191_v14 = vmul.f32 %v9117_v52, %v6905_v49  ;;  %v9119_v44 = vld [vmem:[#allocation188_spill] sm:$0xff]  ;;  %v9121_v46 = vld [vmem:[#allocation126_spill] sm:$0xff] }
 0x3df   : > { %9111 = vst [vmem:[#allocation149_spill] sm:$0xff] %v7175_v15  ;;  %9113 = vst [vmem:[#allocation22_spill] sm:$0xff] %v7179_v20  ;;  %v7195_v15 = vmul.f32 %v9119_v44, %v6890_v41  ;;  %v7199_v20 = vmul.f32 %v9121_v46, %v6905_v49  ;;  %v9123_v31 = vld [vmem:[#allocation191_spill] sm:$0xff]  ;;  %v9132_v46 = vld [vmem:[#allocation132_spill] sm:$0xff] }
 0x3e0   : > { %9114 = vst [vmem:[#allocation151_spill] sm:$0xff] %v7183_v11  ;;  %9116 = vst [vmem:[#allocation23_spill] sm:$0xff] %v7187_v62  ;;  %v7203_v38 = vmul.f32 %v9123_v31, %v6890_v41  ;;  %v9125_v11 = vld [vmem:[#allocation128_spill] sm:$0xff]  ;;  %v9127_v62 = vld [vmem:[#allocation193_spill] sm:$0xff] }
 0x3e1   : > { %9118 = vst [vmem:[#allocation153_spill] sm:$0xff] %v7191_v14  ;;  %9120 = vst [vmem:[#allocation28_spill] sm:$0xff] %v7195_v15  ;;  %v7207_v54 = vmul.f32 %v9125_v11, %v6905_v49  ;;  %v7211_v52 = vmul.f32 %v9127_v62, %v6890_v41  ;;  %v9129_v14 = vld [vmem:[#allocation131_spill] sm:$0xff]  ;;  %v7217_v15 = vpop.permute.xlu0 %3782  ;;  %v9134_v31 = vld [vmem:[#allocation134_spill] sm:$0xff] }
 0x3e2   : > { %9122 = vst [vmem:[#allocation155_spill] sm:$0xff] %v7199_v20  ;;  %9124 = vst [vmem:[#allocation29_spill] sm:$0xff] %v7203_v38  ;;  %v7215_v44 = vmul.f32 %v9129_v14, %v6905_v49  ;;  %v7221_v20 = vmul.f32 %v9132_v46, %v6890_v41  ;;  %v7225_v38 = vmul.f32 %v9134_v31, %v6905_v49  ;;  %v9136_v11 = vld [vmem:[#allocation196_spill] sm:$0xff]  ;;  %v9138_v62 = vld [vmem:[#allocation138_spill] sm:$0xff] }
 0x3e3   : > { %9126 = vst [vmem:[#allocation156_spill] sm:$0xff] %v7207_v54  ;;  %9128 = vst [vmem:[#allocation35_spill] sm:$0xff] %v7211_v52  ;;  %v7229_v54 = vmul.f32 %v9136_v11, %v6890_v41  ;;  %v7233_v52 = vmul.f32 %v9138_v62, %v6905_v49  ;;  %v9139_v14 = vld [vmem:[#allocation198_spill] sm:$0xff]  ;;  %v7256_v62 = vadd.f32 %v6929_v23, %v6458_v42  ;;  %v9183_v23 = vld [vmem:[#allocation135_spill] sm:$0xff] }
 0x3e4   : > { %9130 = vst [vmem:[#allocation158_spill] sm:$0xff] %v7215_v44  ;;  %9131 = vst [vmem:[#allocation36_spill] sm:$0xff] %v7217_v15  ;;  %v7237_v44 = vmul.f32 %v9139_v14, %v6890_v41  ;;  %v9140_v15 = vld [vmem:[#allocation165_spill] sm:$0xff]  ;;  %v9143_v11 = vld [vmem:[#allocation190_spill] sm:$0xff]  ;;  %v7260_v14 = vadd.f32 %v6941_v60, %v6469_v32  ;;  %v7278_v42 = vadd.f32 %v6953_v59, %v6491_v17  ;;  %v7280_v32 = vpop.permute.xlu1 %3803 }
 0x3e5   : > { %9133 = vst [vmem:[#allocation159_spill] sm:$0xff] %v7221_v20  ;;  %9135 = vst [vmem:[#allocation43_spill] sm:$0xff] %v7225_v38  ;;  %v7241_v46 = vmul.f32 %v9140_v15, %v6905_v49  ;;  %v9141_v20 = vld [vmem:[#allocation200_spill] sm:$0xff]  ;;  %v7248_v38 = vadd.f32 %v3732_v24, %v6925_v33  ;;  %v661_v15 = vadd.f32 %v6933_v25, %v6465_v53  ;;  %v9153_v60 = vld [vmem:[#allocation125_spill] sm:$0xff] }
 0x3e6   : > { %9137 = vst [vmem:[#allocation160_spill] sm:$0xff] %v7229_v54  ;;  %v7245_v31 = vmul.f32 %v9141_v20, %v6890_v41  ;;  %v7252_v54 = vmul.f32 %v9143_v11, %v6905_v49  ;;  %v9144_v20 = vld [vmem:[#allocation39_spill] sm:$0xff]  ;;  %v7270_v33 = vadd.f32 %v6937_v40, %v6480_v47  ;;  %v7274_v24 = vadd.f32 %v6949_v9, %v6484_v1  ;;  %v9146_v17 = vld [vmem:[#allocation136_spill] sm:$0xff]  ;;  %v9154_v9 = vld [vmem:[#allocation137_spill] sm:$0xff] }
 0x3e7   : > { %9142 = vst [vmem:[#allocation44_spill] sm:$0xff] %v7248_v38  ;;  %v7266_v41 = vadd.f32 %v6945_v35, %v9144_v20  ;;  %9145 = vst [vmem:[#allocation161_spill] sm:$0xff] %v7280_v32  ;;  %v7284_v53 = vadd.f32 %v6957_v18, %v6495_v12  ;;  %v7288_v35 = vadd.f32 %v6961_v7, %v6502_v55  ;;  %v9155_v59 = vld [vmem:[#allocation208_spill] sm:$0xff]  ;;  %v9157_v7 = vld [vmem:[#allocation189_spill] sm:$0xff] }
 0x3e8   : > { %v7292_v47 = vadd.f32 %v6965_v28, %v6506_v3  ;;  %v7296_v1 = vadd.f32 %v6969_v61, %v6513_v16  ;;  %v7302_v25 = vadd.f32 %v6973_v43, %v6517_v37  ;;  %v7306_v12 = vadd.f32 %v6977_v21, %v6524_v29  ;;  %v7312_v3 = vpop.permute.xlu0 %3805  ;;  %v9156_v18 = vld [vmem:[#allocation140_spill] sm:$0xff]  ;;  %v7378_v28 = vpop.permute.xlu1 %3861  ;;  %v9160_v43 = vld [vmem:[#allocation127_spill] sm:$0xff]  ;;  %v9166_v11 = vld [vmem:[#allocation129_spill] sm:$0xff] }
 0x3e9   : > { %v7310_v55 = vadd.f32 %v6981_v10, %v6528_v34  ;;  %9147 = vst [vmem:[#allocation51_spill] sm:$0xff] %v7312_v3  ;;  %v7316_v16 = vadd.f32 %v6985_v48, %v6535_v6  ;;  %v7320_v40 = vadd.f32 %v6991_v4, %v6539_v51  ;;  %v7324_v37 = vadd.f32 %v6995_v0, %v6546_v26  ;;  %v9151_v0 = vld [vmem:[#allocation187_spill] sm:$0xff]  ;;  %v9152_v4 = vld [vmem:[#allocation96_spill] sm:$0xff]  ;;  %v9161_v10 = vld [vmem:[#allocation142_spill] sm:$0xff] }
 0x3ea   : > { %v7328_v29 = vadd.f32 %v6999_v2, %v6550_v50  ;;  %v7332_v34 = vadd.f32 %v7003_v36, %v6557_v19  ;;  %v7336_v6 = vadd.f32 %v7007_v63, %v6561_v57  ;;  %v7340_v51 = vadd.f32 %v7011_v56, %v6568_v13  ;;  %v9148_v63 = vld [vmem:[#allocation87_spill] sm:$0xff]  ;;  %9158 = vst [vmem:[#allocation162_spill] sm:$0xff] %v7378_v28  ;;  %v9159_v61 = vld [vmem:[#allocation8_spill] sm:$0xff]  ;;  %v9162_v48 = vld [vmem:[#allocation209_spill] sm:$0xff] }
 0x3eb   : > { %v7344_v26 = vadd.f32 %v7015_v27, %v6572_v30  ;;  %v7348_v50 = vadd.f32 %v7019_v58, %v6580_v22  ;;  %v7352_v19 = vadd.f32 %v7023_v5, %v6584_v8  ;;  %v7356_v57 = vadd.f32 %v7027_v45, %v6592_v39  ;;  %v9149_v36 = vld [vmem:[#allocation207_spill] sm:$0xff]  ;;  %v9163_v27 = vld [vmem:[#allocation144_spill] sm:$0xff]  ;;  %v9165_v45 = vld [vmem:[#allocation14_spill] sm:$0xff] }
 0x3ec   : > { %v7360_v13 = vadd.f32 %v9149_v36, %v9148_v63  ;;  %v9150_v2 = vld [vmem:[#allocation95_spill] sm:$0xff]  ;;  %v7368_v22 = vadd.f32 %v9153_v60, %v9152_v4  ;;  %v7372_v8 = vadd.f32 %v9155_v59, %v9154_v9  ;;  %v7376_v39 = vadd.f32 %v9157_v7, %v9156_v18  ;;  %v9164_v58 = vld [vmem:[#allocation192_spill] sm:$0xff]  ;;  %v9168_v36 = vld [vmem:[#allocation210_spill] sm:$0xff] }
 0x3ed   : > { %v7364_v30 = vadd.f32 %v9151_v0, %v9150_v2  ;;  %v7382_v21 = vadd.f32 %v9160_v43, %v9159_v61  ;;  %v7386_v56 = vadd.f32 %v9162_v48, %v9161_v10  ;;  %v7390_v5 = vadd.f32 %v9164_v58, %v9163_v27  ;;  %v9167_v63 = vld [vmem:[#allocation15_spill] sm:$0xff]  ;;  %v9169_v0 = vld [vmem:[#allocation148_spill] sm:$0xff]  ;;  %v9171_v9 = vld [vmem:[#allocation150_spill] sm:$0xff]  ;;  %v7409_v43 = vpop.permute.xlu0 %3863 }
 0x3ee   : > { %v7394_v20 = vadd.f32 %v9166_v11, %v9165_v45  ;;  %v7398_v2 = vadd.f32 %v9168_v36, %v9167_v63  ;;  %v9170_v4 = vld [vmem:[#allocation19_spill] sm:$0xff]  ;;  %v9172_v59 = vld [vmem:[#allocation130_spill] sm:$0xff]  ;;  %v9173_v7 = vld [vmem:[#allocation40_spill] sm:$0xff]  ;;  %9174 = vst [vmem:[#allocation52_spill] sm:$0xff] %v7409_v43 }
 0x3ef   : > { %v7402_v60 = vadd.f32 %v9170_v4, %v9169_v0  ;;  %v7406_v18 = vadd.f32 %v9172_v59, %v9171_v9  ;;  %v666_v61 = vcombine.low %v9173_v7, %v661_v15  ;;  %v9175_v10 = vld [vmem:[#allocation21_spill] sm:$0xff]  ;;  %v9177_v58 = vld [vmem:[#allocation26_spill] sm:$0xff]  ;;  %v9178_v45 = vld [vmem:[#allocation211_spill] sm:$0xff] }
 0x3f0   : > { %v9176_v48 = vld [vmem:[#allocation133_spill] sm:$0xff]  ;;  %v7417_v11 = vadd.f32 %v9178_v45, %v9177_v58  ;;  %v9179_v63 = vld [vmem:[#allocation154_spill] sm:$0xff]  ;;  %v9180_v36 = vld [vmem:[#allocation195_spill] sm:$0xff] }
 0x3f1   : > { %v7413_v27 = vadd.f32 %v9176_v48, %v9175_v10  ;;  %v7421_v0 = vadd.f32 %v9180_v36, %v9179_v63  ;;  %v9181_v4 = vld [vmem:[#allocation32_spill] sm:$0xff]  ;;  %v9182_v59 = vld [vmem:[#allocation30_spill] sm:$0xff]  ;;  %v9184_v7 = vld [vmem:[#allocation33_spill] sm:$0xff] }
 0x3f2   : > { %v586_v9 = vcombine.low %v9181_v4, %v7256_v62  ;;  %v7427_v15 = vadd.f32 %v9183_v23, %v9182_v59  ;;  %v9185_v38 = vld [vmem:[#allocation202_spill] sm:$0xff]  ;;  %v9188_v48 = vld [vmem:[#allocation212_spill] sm:$0xff]  ;;  %v9191_v45 = vld [vmem:[#allocation25_spill] sm:$0xff] }
 0x3f3   : > { %v7431_v28 = vadd.f32 %v9185_v38, %v9184_v7  ;;  %v9187_v10 = vld [vmem:[#allocation34_spill] sm:$0xff]  ;;  %v9193_v63 = vld [vmem:[#allocation45_spill] sm:$0xff]  ;;  %v9201_v7 = vld [vmem:[#allocation48_spill] sm:$0xff] }
 0x3f4   : > { %v7435_v43 = vadd.f32 %v9188_v48, %v9187_v10  ;;  %v9190_v58 = vld [vmem:[#allocation38_spill] sm:$0xff]  ;;  %v9194_v36 = vld [vmem:[#allocation197_spill] sm:$0xff]  ;;  %v828_v10 = vcombine.low %v9201_v7, %v7278_v42  ;;  %v9214_v7 = vld [vmem:[#allocation139_spill] sm:$0xff] }
 0x3f5   : > { %9186 = vst [vmem:[#allocation163_spill] sm:$0xff] %v7431_v28  ;;  %v7439_v32 = vadd.f32 %v9191_v45, %v9190_v58  ;;  %v7443_v3 = vadd.f32 %v9194_v36, %v9193_v63  ;;  %v9195_v62 = vld [vmem:[#allocation42_spill] sm:$0xff]  ;;  %v9196_v4 = vld [vmem:[#allocation157_spill] sm:$0xff]  ;;  %v9206_v45 = vld [vmem:[#allocation180_spill] sm:$0xff] }
 0x3f6   : > { %9189 = vst [vmem:[#allocation59_spill] sm:$0xff] %v7435_v43  ;;  %v7447_v23 = vadd.f32 %v9196_v4, %v9195_v62  ;;  %v9198_v59 = vld [vmem:[#allocation49_spill] sm:$0xff]  ;;  %v9203_v43 = vld [vmem:[#allocation199_spill] sm:$0xff]  ;;  %v9205_v58 = vld [vmem:[#allocation54_spill] sm:$0xff]  ;;  %v673_v62 = vrot.slane %v666_v61, %v9146_v17  ;;  %v7466_v4 = vpop.permute.xlu1 %3883 }
 0x3f7   : > { %9192 = vst [vmem:[#allocation164_spill] sm:$0xff] %v7439_v32  ;;  %v9199_v49 = vld [vmem:[#allocation213_spill] sm:$0xff]  ;;  %v7461_v32 = vadd.f32 %v9206_v45, %v9205_v58  ;;  %v9208_v63 = vld [vmem:[#allocation47_spill] sm:$0xff]  ;;  %9209 = vst [vmem:[#allocation68_spill] sm:$0xff] %v7466_v4  ;;  %v593_v58 = vrot.slane %v586_v9, %v9146_v17  ;;  %v600_v9 = vrot.slane %v7260_v14, %v9146_v17 }
 0x3f8   : > { %9197 = vst [vmem:[#allocation60_spill] sm:$0xff] %v7447_v23  ;;  %v7451_v38 = vadd.f32 %v9199_v49, %v9198_v59  ;;  %v9202_v48 = vld [vmem:[#allocation53_spill] sm:$0xff]  ;;  %v747_v36 = vcombine.low %v9208_v63, %v7270_v33  ;;  %v9211_v59 = vld [vmem:[#allocation214_spill] sm:$0xff]  ;;  %v9220_v33 = vld [vmem:[#allocation143_spill] sm:$0xff] }
 0x3f9   : > { %v7457_v28 = vadd.f32 %v9203_v43, %v9202_v48  ;;  %9207 = vst [vmem:[#allocation167_spill] sm:$0xff] %v7461_v32  ;;  %v9210_v49 = vld [vmem:[#allocation57_spill] sm:$0xff]  ;;  %v9213_v42 = vld [vmem:[#allocation58_spill] sm:$0xff] }
 0x3fa   : > { %9200 = vst [vmem:[#allocation166_spill] sm:$0xff] %v7451_v38  ;;  %v7470_v38 = vadd.f32 %v9211_v59, %v9210_v49  ;;  %v7474_v23 = vadd.f32 %v9214_v7, %v9213_v42  ;;  %v9216_v43 = vld [vmem:[#allocation62_spill] sm:$0xff]  ;;  %v9217_v48 = vld [vmem:[#allocation141_spill] sm:$0xff]  ;;  %v680_v42 = vrot.slane %v7266_v41, %v9146_v17  ;;  %v7495_v7 = vpop.permute.xlu0 %3885 }
 0x3fb   : > { %9204 = vst [vmem:[#allocation67_spill] sm:$0xff] %v7457_v28  ;;  %v7478_v28 = vadd.f32 %v9217_v48, %v9216_v43  ;;  %v9219_v45 = vld [vmem:[#allocation69_spill] sm:$0xff]  ;;  %v9222_v61 = vld [vmem:[#allocation66_spill] sm:$0xff]  ;;  %9228 = vst [vmem:[#allocation174_spill] sm:$0xff] %v7495_v7  ;;  %v754_v7 = vrot.slane %v747_v36, %v9146_v17 }
 0x3fc   : > { %9212 = vst [vmem:[#allocation168_spill] sm:$0xff] %v7470_v38  ;;  %9215 = vst [vmem:[#allocation75_spill] sm:$0xff] %v7474_v23  ;;  %v7483_v63 = vadd.f32 %v9220_v33, %v9219_v45  ;;  %v9223_v4 = vld [vmem:[#allocation5_spill] sm:$0xff]  ;;  %v9226_v59 = vld [vmem:[#allocation10_spill] sm:$0xff] }
 0x3fd   : > { %9218 = vst [vmem:[#allocation170_spill] sm:$0xff] %v7478_v28  ;;  %v7487_v32 = vadd.f32 %v9223_v4, %v9222_v61  ;;  %v9225_v49 = vld [vmem:[#allocation73_spill] sm:$0xff]  ;;  %v9229_v43 = vld [vmem:[#allocation55_spill] sm:$0xff]  ;;  %v9230_v45 = vld [vmem:[#allocation56_spill] sm:$0xff]  ;;  %v835_v4 = vrot.slane %v828_v10, %v9146_v17  ;;  %v842_v10 = vrot.slane %v7284_v53, %v9146_v17 }
 0x3fe   : > { %9221 = vst [vmem:[#allocation76_spill] sm:$0xff] %v7483_v63  ;;  %v7491_v38 = vadd.f32 %v9226_v59, %v9225_v49  ;;  %v909_v48 = vcombine.low %v9229_v43, %v7288_v35  ;;  %v990_v33 = vcombine.low %v9230_v45, %v7296_v1  ;;  %v9231_v61 = vld [vmem:[#allocation201_spill] sm:$0xff]  ;;  %v681_v63 = vcombine.low %v673_v62, %v680_v42  ;;  %v9235_v14 = vld [vmem:[#allocation74_spill] sm:$0xff]  ;;  %v9236_v28 = vld [vmem:[#allocation16_spill] sm:$0xff] }
 0x3ff   : > { %9224 = vst [vmem:[#allocation172_spill] sm:$0xff] %v7487_v32  ;;  %v9232_v32 = vld [vmem:[#allocation11_spill] sm:$0xff]  ;;  %v9233_v59 = vld [vmem:[#allocation169_spill] sm:$0xff]  ;;  %v7515_v23 = vadd.f32 %v9236_v28, %v9235_v14  ;;  %v9240_v62 = vld [vmem:[#allocation64_spill] sm:$0xff] }
 0x400   : > { %9227 = vst [vmem:[#allocation83_spill] sm:$0xff] %v7491_v38  ;;  %v7506_v49 = vadd.f32 %v9232_v32, %v9231_v61  ;;  %v9234_v38 = vld [vmem:[#allocation145_spill] sm:$0xff]  ;;  %v9237_v35 = vld [vmem:[#allocation7_spill] sm:$0xff]  ;;  %v601_v32 = vcombine.low %v593_v58, %v600_v9  ;;  %v1151_v42 = vcombine.low %v9240_v62, %v7316_v16  ;;  %v688_v28 = vrot.slane %v681_v63, %v9146_v17  ;;  %v7530_v61 = vpop.permute.xlu1 %3940  ;;  %v9247_v62 = vld [vmem:[#allocation22_spill] sm:$0xff] }
 0x401   : > { %v7510_v41 = vadd.f32 %v9234_v38, %v9233_v59  ;;  %v9238_v43 = vld [vmem:[#allocation147_spill] sm:$0xff]  ;;  %v761_v38 = vrot.slane %v7274_v24, %v9146_v17  ;;  %9241 = vst [vmem:[#allocation84_spill] sm:$0xff] %v7530_v61  ;;  %v916_v59 = vrot.slane %v909_v48, %v9146_v17  ;;  %v997_v14 = vrot.slane %v990_v33, %v9146_v17  ;;  %v9246_v16 = vld [vmem:[#allocation173_spill] sm:$0xff]  ;;  %v7547_v61 = vpop.permute.xlu0 %3942 }
 0x402   : > { %v7519_v1 = vadd.f32 %v9238_v43, %v9237_v35  ;;  %v9239_v45 = vld [vmem:[#allocation63_spill] sm:$0xff]  ;;  %v608_v53 = vrot.slane %v601_v32, %v9146_v17  ;;  %v843_v58 = vcombine.low %v835_v4, %v842_v10  ;;  %v9243_v35 = vld [vmem:[#allocation17_spill] sm:$0xff]  ;;  %v9244_v43 = vld [vmem:[#allocation78_spill] sm:$0xff]  ;;  %v7545_v63 = vadd.f32 %v9247_v62, %v9246_v16  ;;  %689 = vrot.lane.b32.xlu1 %v688_v28, %s4814_s6  ;;  %s4832_s6 = smov 91  }
 0x403   : > { %v1070_v36 = vcombine.low %v9239_v45, %v7306_v12  ;;  %v9242_v9 = vld [vmem:[#allocation171_spill] sm:$0xff]  ;;  %v9245_v12 = vld [vmem:[#allocation149_spill] sm:$0xff]  ;;  %v762_v48 = vcombine.low %v754_v7, %v761_v38  ;;  %9248 = vst [vmem:[#allocation176_spill] sm:$0xff] %v7547_v61  ;;  %v9256_v28 = vld [vmem:[#allocation72_spill] sm:$0xff]  ;;  %v1158_v62 = vrot.slane %v1151_v42, %v9146_v17  ;;  %v1165_v42 = vrot.slane %v7320_v40, %v9146_v17 }
 0x404   : > { %v7537_v24 = vadd.f32 %v9243_v35, %v9242_v9  ;;  %v7541_v45 = vadd.f32 %v9245_v12, %v9244_v43  ;;  %v9249_v33 = vld [vmem:[#allocation85_spill] sm:$0xff]  ;;  %v9250_v32 = vld [vmem:[#allocation23_spill] sm:$0xff]  ;;  %v923_v43 = vrot.slane %v7292_v47, %v9146_v17  ;;  %v1004_v12 = vrot.slane %v7302_v25, %v9146_v17  ;;  %609 = vrot.lane.b32.xlu0 %v608_v53, %s4815_s7  ;;  %v9257_v61 = vld [vmem:[#allocation86_spill] sm:$0xff]  ;;  %s4833_s7 = smov 79  }
 0x405   : > { %v7551_v4 = vadd.f32 %v9250_v32, %v9249_v33  ;;  %v9252_v10 = vld [vmem:[#allocation175_spill] sm:$0xff]  ;;  %v9253_v9 = vld [vmem:[#allocation153_spill] sm:$0xff]  ;;  %v1313_v16 = vcombine.low %v9256_v28, %v7332_v34  ;;  %v850_v33 = vrot.slane %v843_v58, %v9146_v17  ;;  %v1077_v32 = vrot.slane %v1070_v36, %v9146_v17  ;;  %v9258_v25 = vld [vmem:[#allocation28_spill] sm:$0xff]  ;;  %v7583_v36 = vpop.permute.xlu1 %3963 }
 0x406   : > { %v7555_v35 = vadd.f32 %v9253_v9, %v9252_v10  ;;  %v9255_v7 = vld [vmem:[#allocation71_spill] sm:$0xff]  ;;  %v769_v10 = vrot.slane %v762_v48, %v9146_v17  ;;  %v1005_v47 = vcombine.low %v997_v14, %v1004_v12  ;;  %v924_v9 = vcombine.low %v916_v59, %v923_v43  ;;  %v9259_v53 = vld [vmem:[#allocation177_spill] sm:$0xff]  ;;  %9263 = vst [vmem:[#allocation92_spill] sm:$0xff] %v7583_v36  ;;  %v9265_v14 = vld [vmem:[#allocation156_spill] sm:$0xff] }
 0x407   : > { %9251 = vst [vmem:[#allocation91_spill] sm:$0xff] %v7551_v4  ;;  %v1232_v38 = vcombine.low %v9255_v7, %v7324_v37  ;;  %v9260_v4 = vld [vmem:[#allocation155_spill] sm:$0xff]  ;;  %v9261_v7 = vld [vmem:[#allocation93_spill] sm:$0xff]  ;;  %851 = vrot.lane.b32.xlu1 %v850_v33, %s4816_s12  ;;  %v9270_v12 = vld [vmem:[#allocation158_spill] sm:$0xff]  ;;  %s4835_s12 = smov 78  }
 0x408   : > { %9254 = vst [vmem:[#allocation178_spill] sm:$0xff] %v7555_v35  ;;  %v7571_v35 = vadd.f32 %v9258_v25, %v9257_v61  ;;  %v7575_v37 = vadd.f32 %v9260_v4, %v9259_v53  ;;  %v9262_v34 = vld [vmem:[#allocation29_spill] sm:$0xff]  ;;  %v9264_v59 = vld [vmem:[#allocation179_spill] sm:$0xff]  ;;  %v9266_v61 = vld [vmem:[#allocation94_spill] sm:$0xff]  ;;  %v1084_v53 = vrot.slane %v7310_v55, %v9146_v17  ;;  %770 = vrot.lane.b32.xlu0 %v769_v10, %s4817_s8  ;;  %s4836_s8 = smov 75  }
 0x409   : > { %v7579_v28 = vadd.f32 %v9262_v34, %v9261_v7  ;;  %v7587_v58 = vadd.f32 %v9265_v14, %v9264_v59  ;;  %v9267_v48 = vld [vmem:[#allocation35_spill] sm:$0xff]  ;;  %v9269_v4 = vld [vmem:[#allocation182_spill] sm:$0xff]  ;;  %v9272_v40 = vld [vmem:[#allocation80_spill] sm:$0xff]  ;;  %v1320_v7 = vrot.slane %v1313_v16, %v9146_v17  ;;  %v1012_v34 = vrot.slane %v1005_v47, %v9146_v17  ;;  %v7603_v59 = vpop.permute.xlu0 %3965 }
 0x40a   : > { %v7591_v43 = vadd.f32 %v9267_v48, %v9266_v61  ;;  %v7595_v25 = vadd.f32 %v9270_v12, %v9269_v4  ;;  %v1475_v33 = vcombine.low %v9272_v40, %v7348_v50  ;;  %9273 = vst [vmem:[#allocation183_spill] sm:$0xff] %v7603_v59  ;;  %v1166_v14 = vcombine.low %v1158_v62, %v1165_v42  ;;  %v9274_v61 = vld [vmem:[#allocation79_spill] sm:$0xff]  ;;  %v9275_v36 = vld [vmem:[#allocation101_spill] sm:$0xff]  ;;  %v9277_v50 = vld [vmem:[#allocation184_spill] sm:$0xff] }
 0x40b   : > { %v1394_v48 = vcombine.low %v9274_v61, %v7340_v51  ;;  %v1239_v4 = vrot.slane %v1232_v38, %v9146_v17  ;;  %v931_v12 = vrot.slane %v924_v9, %v9146_v17  ;;  %v1085_v55 = vcombine.low %v1077_v32, %v1084_v53  ;;  %v9276_v10 = vld [vmem:[#allocation159_spill] sm:$0xff]  ;;  %v9279_v47 = vld [vmem:[#allocation102_spill] sm:$0xff]  ;;  %1013 = vrot.lane.b32.xlu1 %v1012_v34, %s4818_s13  ;;  %v9283_v32 = vld [vmem:[#allocation113_spill] sm:$0xff]  ;;  %s4837_s13 = smov 76  }
 0x40c   : > { %9268 = vst [vmem:[#allocation181_spill] sm:$0xff] %v7591_v43  ;;  %9271 = vst [vmem:[#allocation99_spill] sm:$0xff] %v7595_v25  ;;  %v7611_v25 = vadd.f32 %v9276_v10, %v9275_v36  ;;  %v9278_v40 = vld [vmem:[#allocation43_spill] sm:$0xff]  ;;  %v9280_v43 = vld [vmem:[#allocation160_spill] sm:$0xff]  ;;  %v1327_v51 = vrot.slane %v7336_v6, %v9146_v17  ;;  %v7629_v9 = vadd.f32 %v7237_v44, %v9283_v32 }
 0x40d   : > { %v7615_v16 = vadd.f32 %v9278_v40, %v9277_v50  ;;  %v7619_v59 = vadd.f32 %v9280_v43, %v9279_v47  ;;  %v9281_v38 = vld [vmem:[#allocation106_spill] sm:$0xff]  ;;  %v9284_v42 = vld [vmem:[#allocation109_spill] sm:$0xff]  ;;  %v9285_v36 = vld [vmem:[#allocation123_spill] sm:$0xff]  ;;  %v1246_v43 = vrot.slane %v7328_v29, %v9146_v17  ;;  %932 = vrot.lane.b32.xlu0 %v931_v12, %s4819_s14  ;;  %v1482_v61 = vrot.slane %v1475_v33, %v9146_v17  ;;  %v7640_v50 = vpop.permute.xlu1 %4021  ;;  %s4838_s14 = smov 74  }
 0x40e   : > { %v7625_v62 = vadd.f32 %v7233_v52, %v9281_v38  ;;  %v3704_v53 = vsel %vm3703_vm11, %v9285_v36, %v9284_v42  ;;  %v9286_v6 = vld [vmem:[#allocation103_spill] sm:$0xff]  ;;  %v1173_v52 = vrot.slane %v1166_v14, %v9146_v17  ;;  %v1328_v10 = vcombine.low %v1320_v7, %v1327_v51  ;;  %9287 = vst [vmem:[#allocation104_spill] sm:$0xff] %v7640_v50  ;;  %v9288_v44 = vld [vmem:[#allocation88_spill] sm:$0xff]  ;;  %v9292_v14 = vld [vmem:[#allocation205_spill] sm:$0xff] }
 0x40f   : > { %v1637_v34 = vcombine.low %v9286_v6, %v7364_v30  ;;  %v1556_v40 = vcombine.low %v9288_v44, %v7356_v57  ;;  %v1401_v47 = vrot.slane %v1394_v48, %v9146_v17  ;;  %v1092_v38 = vrot.slane %v1085_v55, %v9146_v17  ;;  %v9289_v32 = vld [vmem:[#allocation204_spill] sm:$0xff]  ;;  %v9291_v30 = vld [vmem:[#allocation117_spill] sm:$0xff]  ;;  %v7660_v48 = vpop.permute.xlu0 %4023 }
 0x410   : > { %9282 = vst [vmem:[#allocation100_spill] sm:$0xff] %v7625_v62  ;;  %v1247_v29 = vcombine.low %v1239_v4, %v1246_v43  ;;  %v7648_v12 = vadd.f32 %v7241_v46, %v9289_v32  ;;  %v7652_v33 = vadd.f32 %v7245_v31, %v9291_v30  ;;  %v7656_v7 = vadd.f32 %v7252_v54, %v9292_v14  ;;  %v9295_v4 = vld [vmem:[#allocation194_spill] sm:$0xff]  ;;  %v9296_v46 = vld [vmem:[#allocation13_spill] sm:$0xff] }
 0x411   : > { %v1489_v57 = vrot.slane %v7352_v19, %v9146_v17  ;;  %1174 = vrot.lane.b32.xlu1 %v1173_v52, %s4820_s18  ;;  %9294 = vst [vmem:[#allocation111_spill] sm:$0xff] %v7660_v48  ;;  %v7664_v55 = vmul.f32 %v9285_v36, %v9295_v4  ;;  %v7667_v51 = vmul.f32 %v3704_v53, %v9296_v46  ;;  %v9297_v19 = vld [vmem:[#allocation9_spill] sm:$0xff]  ;;  %v9298_v52 = vld [vmem:[#allocation4_spill] sm:$0xff]  ;;  %v9319_v48 = vld [vmem:[#allocation75_spill] sm:$0xff]  ;;  %s4840_s18 = smov 63  }
 0x412   : > { %9290 = vst [vmem:[#allocation107_spill] sm:$0xff] %v7648_v12  ;;  %9293 = vst [vmem:[#allocation108_spill] sm:$0xff] %v7656_v7  ;;  %v1408_v31 = vrot.slane %v7344_v26, %v9146_v17  ;;  %v1570_v54 = vrot.slane %v7360_v13, %v9146_v17  ;;  %1093 = vrot.lane.b32.xlu0 %v1092_v38, %s4821_s19  ;;  %v1799_v42 = vcombine.low %v9297_v19, %v7382_v21  ;;  %v9373_v12 = vld [vmem:[#allocation13_spill] sm:$0xff]  ;;  %s4841_s19 = smov 60  }
 0x413   : > { %v1644_v43 = vrot.slane %v1637_v34, %v9146_v17  ;;  %v1335_v6 = vrot.slane %v1328_v10, %v9146_v17  ;;  %v1490_v36 = vcombine.low %v1482_v61, %v1489_v57  ;;  %v1718_v53 = vcombine.low %v9298_v52, %v7372_v8  ;;  %v9299_v34 = vld [vmem:[#allocation146_spill] sm:$0xff]  ;;  %v7689_v8 = vpop.permute.xlu1 %4044  ;;  %v7702_v30 = vpop.permute.xlu0 %4046 }
 0x414   : > { %v1563_v44 = vrot.slane %v1556_v40, %v9146_v17  ;;  %v1254_v26 = vrot.slane %v1247_v29, %v9146_v17  ;;  %v1409_v32 = vcombine.low %v1401_v47, %v1408_v31  ;;  %v1651_v13 = vrot.slane %v7368_v22, %v9146_v17  ;;  %9300 = vst [vmem:[#allocation112_spill] sm:$0xff] %v7689_v8  ;;  %v9301_v40 = vld [vmem:[#allocation20_spill] sm:$0xff]  ;;  %v9328_v8 = vld [vmem:[#allocation77_spill] sm:$0xff] }
 0x415   : > { %v1732_v38 = vrot.slane %v7376_v39, %v9146_v17  ;;  %v1813_v21 = vrot.slane %v7386_v56, %v9146_v17  ;;  %v1880_v61 = vcombine.low %v9299_v34, %v7390_v5  ;;  %1336 = vrot.lane.b32.xlu1 %v1335_v6, %s4822_s21  ;;  %v1894_v10 = vrot.slane %v7394_v20, %v9146_v17  ;;  %v9302_v39 = vld [vmem:[#allocation152_spill] sm:$0xff]  ;;  %v9305_v6 = vld [vmem:[#allocation37_spill] sm:$0xff]  ;;  %v9307_v34 = vld [vmem:[#allocation59_spill] sm:$0xff]  ;;  %s4842_s21 = smov 61  }
 0x416   : > { %v1961_v47 = vcombine.low %v9301_v40, %v7398_v2  ;;  %v1975_v22 = vrot.slane %v7402_v60, %v9146_v17  ;;  %v2042_v29 = vcombine.low %v9302_v39, %v7406_v18  ;;  %1255 = vrot.lane.b32.xlu0 %v1254_v26, %s4823_s23  ;;  %v1806_v5 = vrot.slane %v1799_v42, %v9146_v17  ;;  %v9304_v2 = vld [vmem:[#allocation27_spill] sm:$0xff]  ;;  %v9313_v40 = vld [vmem:[#allocation50_spill] sm:$0xff]  ;;  %s4843_s23 = smov 58  }
 0x417   : > { %9303 = vst [vmem:[#allocation115_spill] sm:$0xff] %v7702_v30  ;;  %v1497_v20 = vrot.slane %v1490_v36, %v9146_v17  ;;  %v1652_v14 = vcombine.low %v1644_v43, %v1651_v13  ;;  %v2123_v57 = vcombine.low %v9304_v2, %v7417_v11  ;;  %v1725_v60 = vrot.slane %v1718_v53, %v9146_v17  ;;  %v9306_v42 = vld [vmem:[#allocation163_spill] sm:$0xff]  ;;  %v9308_v36 = vld [vmem:[#allocation41_spill] sm:$0xff]  ;;  %v9309_v11 = vld [vmem:[#allocation164_spill] sm:$0xff]  ;;  %v7743_v30 = vpop.permute.xlu0 %4104 }
 0x418   : > { %v1416_v31 = vrot.slane %v1409_v32, %v9146_v17  ;;  %v1571_v18 = vcombine.low %v1563_v44, %v1570_v54  ;;  %v2137_v19 = vrot.slane %v7421_v0, %v9146_v17  ;;  %v2204_v52 = vcombine.low %v9305_v6, %v7427_v15  ;;  %v9310_v32 = vld [vmem:[#allocation46_spill] sm:$0xff]  ;;  %v9311_v44 = vld [vmem:[#allocation60_spill] sm:$0xff]  ;;  %v9314_v39 = vld [vmem:[#allocation67_spill] sm:$0xff]  ;;  %9324 = vst [vmem:[#allocation122_spill] sm:$0xff] %v7743_v30 }
 0x419   : > { %v2285_v43 = vcombine.low %v9308_v36, %v9307_v34  ;;  %1498 = vrot.lane.b32.xlu1 %v1497_v20, %s4824_s24  ;;  %v9312_v13 = vld [vmem:[#allocation166_spill] sm:$0xff]  ;;  %v1968_v6 = vrot.slane %v1961_v47, %v9146_v17  ;;  %v1659_v20 = vrot.slane %v1652_v14, %v9146_v17  ;;  %v1814_v34 = vcombine.low %v1806_v5, %v1813_v21  ;;  %v7729_v36 = vpop.permute.xlu1 %4102  ;;  %v9316_v26 = vld [vmem:[#allocation167_spill] sm:$0xff]  ;;  %v9317_v54 = vld [vmem:[#allocation61_spill] sm:$0xff]  ;;  %s4844_s24 = smov 59  }
 0x41a   : > { %1417 = vrot.lane.b32.xlu0 %v1416_v31, %s4825_s25  ;;  %9315 = vst [vmem:[#allocation116_spill] sm:$0xff] %v7729_v36  ;;  %v1887_v0 = vrot.slane %v1880_v61, %v9146_v17  ;;  %v1578_v56 = vrot.slane %v1571_v18, %v9146_v17  ;;  %v1733_v15 = vcombine.low %v1725_v60, %v1732_v38  ;;  %v9318_v31 = vld [vmem:[#allocation168_spill] sm:$0xff]  ;;  %v9320_v2 = vld [vmem:[#allocation65_spill] sm:$0xff]  ;;  %v9321_v47 = vld [vmem:[#allocation170_spill] sm:$0xff]  ;;  %s4845_s25 = smov 47  }
 0x41b   : > { %v9322_v21 = vld [vmem:[#allocation76_spill] sm:$0xff]  ;;  %v9323_v5 = vld [vmem:[#allocation70_spill] sm:$0xff]  ;;  %v9326_v38 = vld [vmem:[#allocation83_spill] sm:$0xff]  ;;  %v2850_v46 = vcombine.low %v9328_v8, %v7510_v41  ;;  %v2130_v36 = vrot.slane %v2123_v57, %v9146_v17  ;;  %v1976_v30 = vcombine.low %v1968_v6, %v1975_v22  ;;  %v2211_v6 = vrot.slane %v2204_v52, %v9146_v17 }
 0x41c   : > { %v9327_v60 = vld [vmem:[#allocation6_spill] sm:$0xff]  ;;  %v9329_v18 = vld [vmem:[#allocation81_spill] sm:$0xff]  ;;  %v1895_v50 = vcombine.low %v1887_v0, %v1894_v10  ;;  %v9331_v14 = vld [vmem:[#allocation91_spill] sm:$0xff]  ;;  %v9372_v7 = vrot.slane %v9318_v31, %v9146_v17 }
 0x41d   : > { %1660 = vrot.lane.b32.xlu1 %v1659_v20, %s4806_s9  ;;  %v2770_v53 = vcombine.low %v9327_v60, %v9326_v38  ;;  %v1821_v20 = vrot.slane %v1814_v34, %v9146_v17  ;;  %v2931_v61 = vcombine.low %v9329_v18, %v7519_v1  ;;  %v2049_v38 = vrot.slane %v2042_v29, %v9146_v17  ;;  %v9330_v8 = vld [vmem:[#allocation82_spill] sm:$0xff]  ;;  %v9332_v34 = vld [vmem:[#allocation89_spill] sm:$0xff]  ;;  %s4827_s9 = smov 94   ;;  %v7770_v1 = vpop.permute.xlu1 %4125  ;;  %v9371_v52 = vld [vmem:[#allocation68_spill] sm:$0xff] }
 0x41e   : > { %1579 = vrot.lane.b32.xlu0 %v1578_v56, %s4826_s26  ;;  %v1740_v60 = vrot.slane %v1733_v15, %v9146_v17  ;;  %v3012_v56 = vcombine.low %v9330_v8, %v7541_v45  ;;  %v3093_v22 = vcombine.low %v9332_v34, %v9331_v14  ;;  %9333 = vst [vmem:[#allocation186_spill] sm:$0xff] %v7770_v1  ;;  %v9334_v29 = vld [vmem:[#allocation178_spill] sm:$0xff]  ;;  %v9336_v45 = vld [vmem:[#allocation97_spill] sm:$0xff]  ;;  %v7783_v8 = vpop.permute.xlu0 %4127  ;;  %v9340_v14 = vld [vmem:[#allocation99_spill] sm:$0xff]  ;;  %s4847_s26 = smov 46  }
 0x41f   : > { %v9335_v10 = vld [vmem:[#allocation90_spill] sm:$0xff]  ;;  %v3255_v18 = vcombine.low %v9336_v45, %v7579_v28  ;;  %v1983_v34 = vrot.slane %v1976_v30, %v9146_v17  ;;  %v2138_v57 = vcombine.low %v2130_v36, %v2137_v19  ;;  %v1902_v28 = vrot.slane %v1895_v50, %v9146_v17  ;;  %v9341_v41 = vld [vmem:[#allocation105_spill] sm:$0xff]  ;;  %v9376_v31 = vld [vmem:[#allocation92_spill] sm:$0xff] }
 0x420   : > { %v3174_v0 = vcombine.low %v9335_v10, %v7571_v35  ;;  %v9337_v35 = vld [vmem:[#allocation181_spill] sm:$0xff]  ;;  %v9338_v10 = vld [vmem:[#allocation98_spill] sm:$0xff]  ;;  %v3415_v1 = vcombine.low %v9341_v41, %v7611_v25 }
 0x421   : > { %1822 = vrot.lane.b32.xlu1 %v1821_v20, %s4827_s9  ;;  %v2292_v20 = vrot.slane %v2285_v43, %v9146_v17  ;;  %v3335_v15 = vcombine.low %v9338_v10, %v9337_v35  ;;  %v9342_v19 = vld [vmem:[#allocation110_spill] sm:$0xff]  ;;  %v9344_v35 = vld [vmem:[#allocation185_spill] sm:$0xff]  ;;  %v2145_v10 = vrot.slane %v2138_v57, %v9146_v17  ;;  %v9349_v43 = vld [vmem:[#allocation36_spill] sm:$0xff]  ;;  %s4848_s9 = smov 43  }
 0x422   : > { %1741 = vrot.lane.b32.xlu0 %v1740_v60, %s4828_s27  ;;  %v9339_v60 = vrot.slane %v7413_v27, %v9146_v17  ;;  %v3496_v36 = vcombine.low %v9342_v19, %v7619_v59  ;;  %v9343_v27 = vld [vmem:[#allocation114_spill] sm:$0xff]  ;;  %v9345_v59 = vcombine.low %v9313_v40, %v9312_v13  ;;  %v9347_v19 = vrot.slane %v9309_v11, %v9146_v17  ;;  %s4849_s27 = smov 44  }
 0x423   : > { %v9351_v40 = vrot.slane %v9306_v42, %v9146_v17  ;;  %v9352_v11 = vcombine.low %v9317_v54, %v9316_v26  ;;  %v7849_v42 = vrot.slane %v2850_v46, %v9146_v17  ;;  %v7852_v26 = vrot.slane %v2931_v61, %v9146_v17  ;;  %v9356_v54 = vld [vmem:[#allocation31_spill] sm:$0xff]  ;;  %v9370_v25 = vld [vmem:[#allocation174_spill] sm:$0xff] }
 0x424   : > { %v2057_v45 = vcombine.low %v2049_v38, %v9339_v60  ;;  %v7816_v60 = vpop.permute.xlu1 %4183  ;;  %v2300_v50 = vcombine.low %v2292_v20, %v9347_v19  ;;  %v9348_v38 = vld [vmem:[#allocation18_spill] sm:$0xff]  ;;  %v9358_v61 = vrot.slane %v9314_v39, %v9146_v17 }
 0x425   : > { %1984 = vrot.lane.b32.xlu1 %v1983_v34, %s4829_s28  ;;  %v2453_v34 = vrot.slane %v9345_v59, %v9146_v17  ;;  %9346 = vst [vmem:[#allocation124_spill] sm:$0xff] %v7816_v60  ;;  %v7823_v30 = vmul.f32 %v9349_v43, %v9348_v38  ;;  %v2219_v57 = vcombine.low %v2211_v6, %v9351_v40  ;;  %v9362_v39 = vld [vmem:[#allocation206_spill] sm:$0xff]  ;;  %s4850_s28 = smov 42  }
 0x426   : > { %1903 = vrot.lane.b32.xlu0 %v1902_v28, %s4830_s29  ;;  %v9350_v28 = vcombine.low %v9310_v32, %v7443_v3  ;;  %v2064_v13 = vrot.slane %v2057_v45, %v9146_v17  ;;  %v2534_v20 = vrot.slane %v9352_v11, %v9146_v17  ;;  %v9353_v59 = vcombine.low %v9320_v2, %v9319_v48  ;;  %v9357_v2 = vld [vmem:[#allocation24_spill] sm:$0xff]  ;;  %s4851_s29 = smov 30  }
 0x427   : > { %v9354_v3 = vcombine.low %v9323_v5, %v9322_v21  ;;  %v2777_v45 = vrot.slane %v2770_v53, %v9146_v17  ;;  %v7855_v48 = vrot.slane %v3012_v56, %v9146_v17  ;;  %v3726_v21 = vsel %vm3703_vm11, %v9357_v2, %v9356_v54 }
 0x428   : > { %v2373_v41 = vrot.slane %v9350_v28, %v9146_v17  ;;  %v2615_v19 = vrot.slane %v9353_v59, %v9146_v17  ;;  %v7846_v28 = vpop.permute.xlu0 %4185  ;;  %v7861_v53 = vrot.slane %v3093_v22, %v9146_v17  ;;  %v7864_v5 = vrot.slane %v3174_v0, %v9146_v17  ;;  %v9365_v59 = vld [vmem:[#allocation51_spill] sm:$0xff] }
 0x429   : > { %v2696_v32 = vrot.slane %v9354_v3, %v9146_v17  ;;  %9355 = vst [vmem:[#allocation188_spill] sm:$0xff] %v7846_v28  ;;  %2146 = vrot.lane.b32.xlu1 %v2145_v10, %s4831_s5  ;;  %v2307_v46 = vrot.slane %v2300_v50, %v9146_v17  ;;  %v2461_v6 = vcombine.low %v2453_v34, %v9358_v61  ;;  %v9381_v28 = vld [vmem:[#allocation176_spill] sm:$0xff]  ;;  %s4853_s5 = smov 28   ;;  %vm854_vm11 = vcmask 1014784  }
 0x42a   : > { %2065 = vrot.lane.b32.xlu0 %v2064_v13, %s4832_s6  ;;  %v7871_v56 = vrot.slane %v3255_v18, %v9146_v17  ;;  %v7874_v10 = vrot.slane %v3335_v15, %v9146_v17  ;;  %v2226_v13 = vrot.slane %v2219_v57, %v9146_v17  ;;  %v9360_v22 = vrot.slane %v9311_v44, %v9146_v17  ;;  %v9363_v18 = vld [vmem:[#allocation203_spill] sm:$0xff]  ;;  %v7889_v15 = vpop.permute.xlu1 %4206  ;;  %v9364_v57 = vld [vmem:[#allocation12_spill] sm:$0xff]  ;;  %s4854_s6 = smov 29  }
 0x42b   : > { %v7881_v0 = vrot.slane %v3415_v1, %v9146_v17  ;;  %v7884_v50 = vrot.slane %v3496_v36, %v9146_v17  ;;  %v3730_v34 = vmul.f32 %v9357_v2, %v9362_v39  ;;  %v3731_v11 = vmul.f32 %v3726_v21, %v9363_v18  ;;  %v9366_v44 = vld [vmem:[#allocation151_spill] sm:$0xff]  ;;  %v9368_v2 = vld [vmem:[#allocation52_spill] sm:$0xff] }
 0x42c   : > { %9359 = vst [vmem:[#allocation126_spill] sm:$0xff] %v7874_v10  ;;  %v2381_v40 = vcombine.low %v2373_v41, %v9360_v22  ;;  %v3813_v3 = vmul.f32 %v9365_v59, %v9364_v57  ;;  %v3785_v1 = vsel %vm3784_vm14, %v9366_v44, %v9349_v43  ;;  %v3789_v36 = vmul.f32 %v9366_v44, %v9295_v4  ;;  %v9367_v41 = vld [vmem:[#allocation161_spill] sm:$0xff]  ;;  %v9382_v10 = vld [vmem:[#allocation84_spill] sm:$0xff] }
 0x42d   : > { %9361 = vst [vmem:[#allocation191_spill] sm:$0xff] %v7884_v50  ;;  %2308 = vrot.lane.b32.xlu1 %v2307_v46, %s4833_s7  ;;  %v3807_v54 = vsel %vm3784_vm14, %v9367_v41, %v9365_v59  ;;  %v3871_v21 = vmul.f32 %v9368_v2, %v9348_v38  ;;  %v7904_v46 = vpop.permute.xlu0 %4208  ;;  %v2468_v61 = vrot.slane %v2461_v6, %v9146_v17  ;;  %s4855_s7 = smov 26   ;;  %vm935_vm14 = vcmask 1006592  }
 0x42e   : > { %2227 = vrot.lane.b32.xlu0 %v2226_v13, %s4799_s11  ;;  %v9369_v43 = vrot.slane %v9321_v47, %v9146_v17  ;;  %v3811_v44 = vmul.f32 %v9367_v41, %v9362_v39  ;;  %v3887_v59 = vsel %vm1663_vm0, %v9371_v52, %v9370_v25  ;;  %v2388_v13 = vrot.slane %v2381_v40, %v9146_v17  ;;  %s4834_s11 = smov 77  }
 0x42f   : > { %v2542_v50 = vcombine.low %v2534_v20, %v9372_v7  ;;  %v3733_v62 = vadd.f32 %v3730_v34, %v7664_v55  ;;  %v3734_v6 = vadd.f32 %v3731_v11, %v7667_v51  ;;  %v3790_v47 = vmul.f32 %v3785_v1, %v9373_v12  ;;  %v9375_v51 = vld [vmem:[#allocation183_spill] sm:$0xff]  ;;  %v7933_v34 = vpop.permute.xlu1 %4264 }
 0x430   : > { %v2623_v22 = vcombine.low %v2615_v19, %v9369_v43  ;;  %v3812_v19 = vmul.f32 %v3807_v54, %v9363_v18  ;;  %v3893_v41 = vmul.f32 %v9370_v25, %v9364_v57  ;;  %v9374_v43 = vld [vmem:[#allocation162_spill] sm:$0xff]  ;;  %v3891_v7 = vmul.f32 %v9371_v52, %v9362_v39  ;;  %9377 = vst [vmem:[#allocation128_spill] sm:$0xff] %v7933_v34 }
 0x431   : > { %2469 = vrot.lane.b32.xlu1 %v2468_v61, %s4834_s11  ;;  %v3865_v40 = vsel %vm1663_vm0, %v9374_v43, %v9368_v2  ;;  %v3892_v55 = vmul.f32 %v3887_v59, %v9363_v18  ;;  %v3967_v20 = vsel %vm3944_vm2, %v9376_v31, %v9375_v51  ;;  %v9378_v25 = vrot.slane %v7506_v49, %v9146_v17  ;;  %v9379_v61 = vld [vmem:[#allocation172_spill] sm:$0xff] }
 0x432   : > { %2389 = vrot.lane.b32.xlu0 %v2388_v13, %s4835_s12  ;;  %v2630_v11 = vrot.slane %v2623_v22, %v9146_v17  ;;  %v7940_v54 = vadd.f32 %v3813_v3, %v7823_v30  ;;  %v3814_v52 = vadd.f32 %v3811_v44, %v3789_v36  ;;  %v2549_v2 = vrot.slane %v2542_v50, %v9146_v17 }
 0x433   : > { %v2785_v1 = vcombine.low %v2777_v45, %v9378_v25  ;;  %v9380_v59 = vrot.slane %v9379_v61, %v9146_v17  ;;  %v3815_v60 = vadd.f32 %v3812_v19, %v3790_v47  ;;  %v3869_v34 = vmul.f32 %v9374_v43, %v9295_v4  ;;  %v7951_v45 = vpop.permute.xlu0 %4266 }
 0x434   : > { %v3870_v22 = vmul.f32 %v3865_v40, %v9373_v12  ;;  %v3945_v49 = vsel %vm3944_vm2, %v9382_v10, %v9381_v28  ;;  %v3739_v30 = vcombine.low %v3733_v62, %v3734_v6  ;;  %v7953_v3 = vadd.f32 %v3893_v41, %v3871_v21 }
 0x435   : > { %v2704_v13 = vcombine.low %v2696_v32, %v9380_v59  ;;  %2631 = vrot.lane.b32.xlu1 %v2630_v11, %s4836_s8  ;;  %v3971_v50 = vmul.f32 %v9376_v31, %v9362_v39  ;;  %v3972_v32 = vmul.f32 %v3967_v20, %v9363_v18  ;;  %v3894_v36 = vadd.f32 %v3891_v7, %v3869_v34  ;;  %v7985_v20 = vpop.permute.xlu1 %4287  ;;  %v9390_v59 = vld [vmem:[#allocation112_spill] sm:$0xff]  ;;  %s4856_s8 = smov 27  }
 0x436   : > { %2550 = vrot.lane.b32.xlu0 %v2549_v2, %s4837_s13  ;;  %v3895_v44 = vadd.f32 %v3892_v55, %v3870_v22  ;;  %v2792_v47 = vrot.slane %v2785_v1, %v9146_v17  ;;  %v9383_v19 = vrot.slane %v7537_v24, %v9146_v17  ;;  %v3949_v62 = vmul.f32 %v9382_v10, %v9295_v4  ;;  %v9391_v22 = vld [vmem:[#allocation111_spill] sm:$0xff] }
 0x437   : > { %v3950_v21 = vmul.f32 %v3945_v49, %v9373_v12  ;;  %v2711_v6 = vrot.slane %v2704_v13, %v9146_v17  ;;  %v9384_v41 = vrot.slane %v7515_v23, %v9146_v17  ;;  %v9385_v7 = vcombine.low %v9343_v27, %v7629_v9 }
 0x438   : > { %v2946_v43 = vcombine.low %v7852_v26, %v9383_v19  ;;  %v9386_v24 = vcombine.low %v9344_v35, %v7652_v33  ;;  %v3820_v10 = vcombine.low %v3814_v52, %v3815_v60  ;;  %v3973_v31 = vmul.f32 %v9375_v51, %v9364_v57  ;;  %v7992_v35 = vpop.permute.xlu0 %4289 }
 0x439   : > { %v2865_v40 = vcombine.low %v7849_v42, %v9384_v41  ;;  %v7975_v55 = vrot.slane %v9385_v7, %v9146_v17  ;;  %2793 = vrot.lane.b32.xlu1 %v2792_v47, %s4792_s10  ;;  %v3834_v23 = vrot.slane %v7940_v54, %v9146_v17  ;;  %v3951_v9 = vmul.f32 %v9381_v28, %v9348_v38  ;;  %s4839_s10 = smov 62  }
 0x43a   : > { %v7981_v26 = vrot.slane %v9386_v24, %v9146_v17  ;;  %v3974_v27 = vadd.f32 %v3971_v50, %v3949_v62  ;;  %v3975_v42 = vadd.f32 %v3972_v32, %v3950_v21  ;;  %2712 = vrot.lane.b32.xlu0 %v2711_v6, %s4838_s14  ;;  %v3900_v33 = vcombine.low %v3894_v36, %v3895_v44  ;;  %v8031_v44 = vpop.permute.xlu1 %4345  ;;  %v9395_v24 = vld [vmem:[#allocation122_spill] sm:$0xff] }
 0x43b   : > { %v2953_v60 = vrot.slane %v2946_v43, %v9146_v17  ;;  %v9387_v51 = vrot.slane %v9334_v29, %v9146_v17  ;;  %v8000_v11 = vrot.slane %v3739_v30, %v9146_v17  ;;  %v3914_v28 = vrot.slane %v7953_v3, %v9146_v17  ;;  %v9389_v29 = vld [vmem:[#allocation115_spill] sm:$0xff] }
 0x43c   : > { %v2872_v25 = vrot.slane %v2865_v40, %v9146_v17  ;;  %v9388_v1 = vrot.slane %v7545_v63, %v9146_v17  ;;  %v8010_v2 = vrot.slane %v3820_v10, %v9146_v17  ;;  %v8012_v61 = vadd.f32 %v3973_v31, %v3951_v9  ;;  %v9396_v31 = vld [vmem:[#allocation186_spill] sm:$0xff] }
 0x43d   : > { %v3108_v34 = vcombine.low %v7861_v53, %v9387_v51  ;;  %v4054_v53 = vmul.f32 %v9389_v29, %v9364_v57  ;;  %v4048_v13 = vsel %vm4025_vm3, %v9390_v59, %v9389_v29  ;;  %2954 = vrot.lane.b32.xlu1 %v2953_v60, %s4839_s10  ;;  %v4032_v49 = vmul.f32 %v9391_v22, %v9348_v38  ;;  %v9400_v29 = vld [vmem:[#allocation126_spill] sm:$0xff] }
 0x43e   : > { %v3027_v52 = vcombine.low %v7855_v48, %v9388_v1  ;;  %v3980_v63 = vcombine.low %v3974_v27, %v3975_v42  ;;  %v9392_v48 = vld [vmem:[#allocation104_spill] sm:$0xff]  ;;  %v4052_v50 = vmul.f32 %v9390_v59, %v9362_v39  ;;  %2873 = vrot.lane.b32.xlu0 %v2872_v25, %s4840_s18  ;;  %v8027_v32 = vrot.slane %v3900_v33, %v9146_v17 }
 0x43f   : > { %v4026_v30 = vsel %vm4025_vm3, %v9392_v48, %v9391_v22  ;;  %v4030_v36 = vmul.f32 %v9392_v48, %v9295_v4  ;;  %v3115_v47 = vrot.slane %v3108_v34, %v9146_v17  ;;  %v9393_v19 = vrot.slane %v7587_v58, %v9146_v17  ;;  %v9397_v27 = vld [vmem:[#allocation116_spill] sm:$0xff] }
 0x440   : > { %v4053_v62 = vmul.f32 %v4048_v13, %v9363_v18  ;;  %v3034_v21 = vrot.slane %v3027_v52, %v9146_v17  ;;  %v9394_v6 = vrot.slane %v7575_v37, %v9146_v17  ;;  %v8044_v40 = vadd.f32 %v4054_v53, %v4032_v49  ;;  %v9401_v59 = vld [vmem:[#allocation188_spill] sm:$0xff] }
 0x441   : > { %v3270_v43 = vcombine.low %v7871_v56, %v9393_v19  ;;  %v4031_v7 = vmul.f32 %v4026_v30, %v9373_v12  ;;  %v8049_v10 = vmul.f32 %v9395_v24, %v9348_v38  ;;  %v8053_v58 = vmul.f32 %v7783_v8, %v9364_v57  ;;  %v8055_v56 = vpop.permute.xlu0 %4347  ;;  %3116 = vrot.lane.b32.xlu1 %v3115_v47, %s4841_s19  ;;  %v9402_v22 = vld [vmem:[#allocation124_spill] sm:$0xff]  ;;  %v9403_v19 = vld [vmem:[#allocation107_spill] sm:$0xff] }
 0x442   : > { %v3189_v41 = vcombine.low %v7864_v5, %v9394_v6  ;;  %v8058_v37 = vrot.slane %v3980_v63, %v9146_v17  ;;  %v4055_v5 = vadd.f32 %v4052_v50, %v4030_v36  ;;  %v4129_v9 = vsel %vm4106_vm4, %v9396_v31, %v7783_v8  ;;  %3035 = vrot.lane.b32.xlu0 %v3034_v21, %s4842_s21  ;;  %v4369_v63 = vpop.permute.xlu1 %4368 }
 0x443   : > { %v4107_v42 = vsel %vm4106_vm4, %v9397_v27, %v9395_v24  ;;  %v4210_v33 = vsel %vm4187_vm5, %v7889_v15, %v7904_v46  ;;  %v3277_v60 = vrot.slane %v3270_v43, %v9146_v17  ;;  %v9398_v51 = vrot.slane %v7615_v16, %v9146_v17  ;;  %v9407_v24 = vld [vmem:[#allocation191_spill] sm:$0xff] }
 0x444   : > { %v4056_v25 = vadd.f32 %v4053_v62, %v4031_v7  ;;  %v4111_v8 = vmul.f32 %v9397_v27, %v9295_v4  ;;  %v3196_v1 = vrot.slane %v3189_v41, %v9146_v17  ;;  %v9399_v52 = vrot.slane %v9340_v14, %v9146_v17  ;;  %v9405_v41 = vld [vmem:[#allocation100_spill] sm:$0xff] }
 0x445   : > { %v3430_v34 = vcombine.low %v7881_v0, %v9398_v51  ;;  %v8082_v13 = vmul.f32 %v9401_v59, %v9348_v38  ;;  %v4133_v16 = vmul.f32 %v9396_v31, %v9362_v39  ;;  %v4134_v0 = vmul.f32 %v4129_v9, %v9363_v18  ;;  %3278 = vrot.lane.b32.xlu1 %v3277_v60, %s4843_s23  ;;  %v4371_v36 = vpop.permute.xlu0 %4370  ;;  %v9408_v51 = vld [vmem:[#allocation128_spill] sm:$0xff]  ;;  %s197_s23 = scalar_lea.vmem %s8229_s4, %s4613_s17 }
 0x446   : > { %v3350_v53 = vcombine.low %v9400_v29, %v9399_v52  ;;  %v4188_v49 = vsel %vm4187_vm5, %v9402_v22, %v9401_v59  ;;  %v4112_v48 = vmul.f32 %v4107_v42, %v9373_v12  ;;  %v4192_v14 = vmul.f32 %v9402_v22, %v9295_v4  ;;  %3197 = vrot.lane.b32.xlu0 %v3196_v1, %s4844_s24  ;;  %v9409_v52 = vld [vmem:[#allocation44_spill] sm:$0xff] }
 0x447   : > { %v4214_v30 = vmul.f32 %v7889_v15, %v9362_v39  ;;  %v4215_v50 = vmul.f32 %v4210_v33, %v9363_v18  ;;  %v3437_v47 = vrot.slane %v3430_v34, %v9146_v17  ;;  %v9404_v43 = vrot.slane %v9403_v19, %v9146_v17  ;;  %v9411_v22 = vld [vmem:[#allocation108_spill] sm:$0xff] }
 0x448   : > { %v4193_v21 = vmul.f32 %v4188_v49, %v9373_v12  ;;  %v4372_v6 = vsel %vm4349_vm9, %v4369_v63, %v4371_v36  ;;  %v3357_v15 = vrot.slane %v3350_v53, %v9146_v17  ;;  %v9406_v7 = vrot.slane %v9405_v41, %v9146_v17 }
 0x449   : > { %v3592_v62 = vcombine.low %v7975_v55, %v9404_v43  ;;  %v4061_v9 = vcombine.low %v4055_v5, %v4056_v25  ;;  %v4136_v27 = vadd.f32 %v4133_v16, %v4111_v8  ;;  %v4137_v42 = vadd.f32 %v4134_v0, %v4112_v48  ;;  %3438 = vrot.lane.b32.xlu1 %v3437_v47, %s4845_s25 }
 0x44a   : > { %v3511_v31 = vcombine.low %v9407_v24, %v9406_v7  ;;  %v4291_v33 = vsel %vm4268_vm6, %v7985_v20, %v7992_v35  ;;  %v4217_v55 = vadd.f32 %v4214_v30, %v4192_v14  ;;  %v4218_v60 = vadd.f32 %v4215_v50, %v4193_v21  ;;  %3358 = vrot.lane.b32.xlu0 %v3357_v15, %s4785_s22  ;;  %s4846_s22 = smov 45  }
 0x44b   : > { %v4269_v34 = vsel %vm4268_vm6, %v9408_v51, %v7951_v45  ;;  %v4350_v1 = vsel %vm4349_vm9, %v8031_v44, %v8055_v56  ;;  %v4376_v5 = vmul.f32 %v4369_v63, %v9362_v39  ;;  %v4377_v25 = vmul.f32 %v4372_v6, %v9363_v18 }
 0x44c   : > { %v3599_v8 = vrot.slane %v3592_v62, %v9146_v17  ;;  %v9410_v29 = vrot.slane %v9409_v52, %v9146_v17  ;;  %v4295_v59 = vmul.f32 %v7985_v20, %v9362_v39  ;;  %v4296_v16 = vmul.f32 %v4291_v33, %v9363_v18  ;;  %v4513_v52 = vld [vmem:[%s8228_s3 + $0x61] ss:$8 sm:$0x3] }
 0x44d   : > { %v3518_v0 = vrot.slane %v3511_v31, %v9146_v17  ;;  %v9412_v49 = vrot.slane %v9411_v22, %v9146_v17  ;;  %v4068_v48 = vrot.slane %v4061_v9, %v9146_v17  ;;  %v4216_v14 = vmul.f32 %v7904_v46, %v9364_v57 }
 0x44e   : > { %v3754_v53 = vcombine.low %v8000_v11, %v9410_v29  ;;  %v4354_v11 = vmul.f32 %v8031_v44, %v9295_v4  ;;  %v4355_v30 = vmul.f32 %v4350_v1, %v9373_v12  ;;  %3600 = vrot.lane.b32.xlu1 %v3599_v8, %s4846_s22  ;;  %v4142_v20 = vcombine.low %v4136_v27, %v4137_v42  ;;  %v9413_v29 = vld [vmem:[#allocation3_spill] sm:$0xff] }
 0x44f   : > { %v3673_v63 = vcombine.low %v7981_v26, %v9412_v49  ;;  %v4223_v50 = vcombine.low %v4217_v55, %v4218_v60  ;;  %v4273_v47 = vmul.f32 %v9408_v51, %v9295_v4  ;;  %v4274_v19 = vmul.f32 %v4269_v34, %v9373_v12  ;;  %3519 = vrot.lane.b32.xlu0 %v3518_v0, %s4847_s26  ;;  %v9414_v0 = vld [vmem:[#allocation2_spill] sm:$0xff] }
 0x450   : > { %v4379_v26 = vadd.f32 %v4376_v5, %v4354_v11  ;;  %v4380_v43 = vadd.f32 %v4377_v25, %v4355_v30  ;;  %v3761_v46 = vrot.slane %v3754_v53, %v9146_v17  ;;  %v3915_v44 = vcombine.low %v8027_v32, %v3914_v28 }
 0x451   : > { %v4298_v62 = vadd.f32 %v4295_v59, %v4273_v47  ;;  %v4299_v21 = vadd.f32 %v4296_v16, %v4274_v19  ;;  %v3680_v6 = vrot.slane %v3673_v63, %v9146_v17  ;;  %v3835_v15 = vcombine.low %v8010_v2, %v3834_v23  ;;  %v485_v59 = vld [vmem:[%s8228_s3] ss:$8 sm:$0x3] }
 0x452   : > { %v3994_v41 = vrot.slane %v8012_v61, %v9146_v17  ;;  %v4075_v7 = vrot.slane %v8044_v40, %v9146_v17  ;;  %v4219_v24 = vadd.f32 %v4216_v14, %v8082_v13  ;;  %v4378_v3 = vmul.f32 %v4371_v36, %v9364_v57  ;;  %3762 = vrot.lane.b32.xlu1 %v3761_v46, %s4848_s9 }
 0x453   : > { %v4138_v28 = vadd.f32 %v8053_v58, %v8049_v10  ;;  %v4275_v54 = vmul.f32 %v7951_v45, %v9348_v38  ;;  %v4297_v23 = vmul.f32 %v7992_v35, %v9364_v57  ;;  %v4356_v2 = vmul.f32 %v8055_v56, %v9348_v38  ;;  %3681 = vrot.lane.b32.xlu0 %v3680_v6, %s4849_s27 }
 0x454   : > { %v4230_v61 = vrot.slane %v4223_v50, %v9146_v17  ;;  %v4385_v32 = vcombine.low %v4379_v26, %v4380_v43  ;;  %v3922_v40 = vrot.slane %v3915_v44, %v9146_v17  ;;  %v4076_v13 = vcombine.low %v4068_v48, %v4075_v7  ;;  %v4512_v26 = vld [vmem:[%s8228_s3 + $0xc2] ss:$8 sm:$0x3] }
 0x455   : > { %v4149_v36 = vrot.slane %v4142_v20, %v9146_v17  ;;  %v4304_v10 = vcombine.low %v4298_v62, %v4299_v21  ;;  %v3842_v58 = vrot.slane %v3835_v15, %v9146_v17  ;;  %v3995_v45 = vcombine.low %v8058_v37, %v3994_v41 }
 0x456   : > { %v4237_v57 = vrot.slane %v4219_v24, %v9146_v17  ;;  %v4381_v35 = vadd.f32 %v4378_v3, %v4356_v2  ;;  %3923 = vrot.lane.b32.xlu1 %v3922_v40, %s4778_s30  ;;  %v4156_v38 = vrot.slane %v4138_v28, %v9146_v17  ;;  %v4300_v56 = vadd.f32 %v4297_v23, %v4275_v54  ;;  %s4852_s30 = smov 31  }
 0x457   : > { %3843 = vrot.lane.b32.xlu0 %v3842_v58, %s4850_s28  ;;  %v4392_v31 = vrot.slane %v4385_v32, %v9146_v17  ;;  %v4083_v9 = vrot.slane %v4076_v13, %v9146_v17  ;;  %v4311_v42 = vrot.slane %v4304_v10, %v9146_v17  ;;  %v4002_v33 = vrot.slane %v3995_v45, %v9146_v17 }
 0x458   : > { %v4238_v27 = vcombine.low %v4230_v61, %v4237_v57  ;;  %v4157_v37 = vcombine.low %v4149_v36, %v4156_v38  ;;  %v4399_v55 = vrot.slane %v4381_v35, %v9146_v17  ;;  %v4318_v60 = vrot.slane %v4300_v56, %v9146_v17 }
 0x459   : > { %v509_v53 = vrot.slane %v4513_v52, %v9413_v29  ;;  %v494_v16 = vrot.slane %v485_v59, %v9413_v29  ;;  %v505_v22 = vrot.slane %v4513_v52, %v9414_v0  ;;  %v490_v49 = vrot.slane %v485_v59, %v9414_v0 }
 0x45a   : > { %4084 = vrot.lane.b32.xlu1 %v4083_v9, %s4851_s29  ;;  %v4245_v51 = vrot.slane %v4238_v27, %v9146_v17  ;;  %v4400_v34 = vcombine.low %v4392_v31, %v4399_v55  ;;  %v4164_v1 = vrot.slane %v4157_v37, %v9146_v17  ;;  %v4319_v5 = vcombine.low %v4311_v42, %v4318_v60 }
 0x45b   : > { %4003 = vrot.lane.b32.xlu0 %v4002_v33, %s4852_s30  ;;  %v513_v63 = vmul.f32 %v509_v53, %v9363_v18  ;;  %v498_v48 = vmul.f32 %v494_v16, %v9373_v12  ;;  %v512_v14 = vmul.f32 %v505_v22, %v9362_v39  ;;  %v497_v11 = vmul.f32 %v490_v49, %v9295_v4 }
 0x45c   : > { %v4407_v25 = vrot.slane %v4400_v34, %v9146_v17  ;;  %v4326_v8 = vrot.slane %v4319_v5, %v9146_v17  ;;  %vm1016_vm2 = vcmask 998400   ;;  %vm1096_vm3 = vcmask 916480  }
 0x45d   : > { %v515_v30 = vadd.f32 %v513_v63, %v498_v48  ;;  %v514_v20 = vadd.f32 %v512_v14, %v497_v11  ;;  %vm1177_vm4 = vcmask 908288   ;;  %vm1258_vm5 = vcmask 900096  }
 0x45e   : > { %4246 = vrot.lane.b32.xlu1 %v4245_v51, %s4853_s5  ;;  %vm1339_vm6 = vcmask 891904   ;;  %vm1420_vm9 = vcmask 883712  }
 0x45f   : > { %4165 = vrot.lane.b32.xlu0 %v4164_v1, %s4854_s6  ;;  %v518_v50 = vcombine.low %v514_v20, %v515_v30 }
 0x461   : > { %v525_v47 = vrot.slane %v518_v50, %v9146_v17 }
 0x462   : > { %4408 = vrot.lane.b32.xlu1 %v4407_v25, %s4855_s7 }
 0x463   : > { %4327 = vrot.lane.b32.xlu0 %v4326_v8, %s4856_s8  ;;  %v532_v19 = vrot.slane %v525_v47, %v9146_v17 }
 0x465   : > { %v534_v44 = vadd.f32 %v4512_v26, %v532_v19 }
 0x474   : > { %v690_v43 = vpop.permute.xlu1 %689 }
 0x475   : > { %v691_v12 = vrot.slane %v690_v43, 1 }
 0x476   : > { %v610_v18 = vpop.permute.xlu0 %609 }
 0x477   : > { %v611_v46 = vrot.slane %v610_v18, 1  ;;  %v693_v6 = vsel %vm692_vm12, %v690_v43, %v691_v12  ;;  %vm1582_vm12 = vcmask 867328  }
 0x479   : > { %v613_v39 = vsel %vm612_vm10, %v610_v18, %v611_v46  ;;  %v852_v4 = vpop.permute.xlu1 %851  ;;  %vm1501_vm10 = vcmask 875520  }
 0x47a   : > { %v615_v62 = vadd.f32 %v613_v39, %v534_v44  ;;  %v771_v21 = vpop.permute.xlu0 %770  ;;  %v853_v41 = vrot.slane %v852_v4, 1 }
 0x47b   : > { %v772_v15 = vrot.slane %v771_v21, 1 }
 0x47c   : > { %v695_v17 = vadd.f32 %v693_v6, %v615_v62  ;;  %v855_v54 = vsel %vm854_vm11, %v852_v4, %v853_v41  ;;  %vm1825_vm11 = vcmask 769024  }
 0x47d   : > { %v774_v7 = vsel %vm773_vm13, %v771_v21, %v772_v15  ;;  %v1014_v24 = vpop.permute.xlu1 %1013  ;;  %vm1744_vm13 = vcmask 777216  }
 0x47e   : > { %v776_v3 = vadd.f32 %v774_v7, %v695_v17  ;;  %v1015_v2 = vrot.slane %v1014_v24, 1 }
 0x47f   : > { %v933_v28 = vpop.permute.xlu0 %932 }
 0x480   : > { %v934_v23 = vrot.slane %v933_v28, 1  ;;  %v857_v61 = vadd.f32 %v855_v54, %v776_v3  ;;  %v1017_v10 = vsel %vm1016_vm2, %v1014_v24, %v1015_v2  ;;  %vm1987_vm2 = vcmask 752640  }
 0x482   : > { %v936_v32 = vsel %vm935_vm14, %v933_v28, %v934_v23  ;;  %vm1906_vm14 = vcmask 760832  }
 0x483   : > { %v1175_v40 = vpop.permute.xlu1 %1174  ;;  %v938_v13 = vadd.f32 %v936_v32, %v857_v61 }
 0x484   : > { %v1094_v36 = vpop.permute.xlu0 %1093  ;;  %v1176_v45 = vrot.slane %v1175_v40, 1 }
 0x485   : > { %v1095_v58 = vrot.slane %v1094_v36, 1  ;;  %v1019_v57 = vadd.f32 %v1017_v10, %v938_v13 }
 0x486   : > { %v1178_v9 = vsel %vm1177_vm4, %v1175_v40, %v1176_v45  ;;  %vm2311_vm4 = vcmask 646144  }
 0x487   : > { %v1097_v35 = vsel %vm1096_vm3, %v1094_v36, %v1095_v58  ;;  %v1337_v38 = vpop.permute.xlu1 %1336  ;;  %vm2068_vm3 = vcmask 744448  }
 0x488   : > { %v1099_v56 = vadd.f32 %v1097_v35, %v1019_v57  ;;  %v1256_v31 = vpop.permute.xlu0 %1255  ;;  %v1338_v42 = vrot.slane %v1337_v38, 1 }
 0x489   : > { %v1257_v27 = vrot.slane %v1256_v31, 1 }
 0x48a   : > { %v1180_v33 = vadd.f32 %v1178_v9, %v1099_v56  ;;  %v1340_v34 = vsel %vm1339_vm6, %v1337_v38, %v1338_v42  ;;  %vm2472_vm6 = vcmask 629760  }
 0x48b   : > { %v1259_v37 = vsel %vm1258_vm5, %v1256_v31, %v1257_v27  ;;  %v1499_v55 = vpop.permute.xlu1 %1498  ;;  %vm2392_vm5 = vcmask 637952  }
 0x48c   : > { %v1261_v60 = vadd.f32 %v1259_v37, %v1180_v33  ;;  %v1418_v51 = vpop.permute.xlu0 %1417  ;;  %v1500_v5 = vrot.slane %v1499_v55, 1 }
 0x48d   : > { %v1419_v1 = vrot.slane %v1418_v51, 1 }
 0x48e   : > { %v1342_v25 = vadd.f32 %v1340_v34, %v1261_v60  ;;  %v1502_v16 = vsel %vm1501_vm10, %v1499_v55, %v1500_v5  ;;  %vm2634_vm10 = vcmask 613376  }
 0x48f   : > { %v1421_v8 = vsel %vm1420_vm9, %v1418_v51, %v1419_v1  ;;  %v1661_v52 = vpop.permute.xlu1 %1660  ;;  %vm2553_vm9 = vcmask 621568  }
 0x490   : > { %v1423_v53 = vadd.f32 %v1421_v8, %v1342_v25  ;;  %v1580_v59 = vpop.permute.xlu0 %1579  ;;  %v1662_v49 = vrot.slane %v1661_v52, 1 }
 0x491   : > { %v1581_v22 = vrot.slane %v1580_v59, 1 }
 0x492   : > { %v1504_v63 = vadd.f32 %v1502_v16, %v1423_v53  ;;  %v1664_v20 = vsel %vm1663_vm0, %v1661_v52, %v1662_v49  ;;  %vm2149_vm0 = vcmask 736256  }
 0x493   : > { %v1583_v48 = vsel %vm1582_vm12, %v1580_v59, %v1581_v22  ;;  %v1823_v14 = vpop.permute.xlu1 %1822  ;;  %vm2876_vm12 = vcmask 515072  }
 0x494   : > { %v1585_v11 = vadd.f32 %v1583_v48, %v1504_v63  ;;  %v1742_v30 = vpop.permute.xlu0 %1741  ;;  %v1824_v47 = vrot.slane %v1823_v14, 1 }
 0x495   : > { %v1743_v50 = vrot.slane %v1742_v30, 1 }
 0x496   : > { %v1666_v19 = vadd.f32 %v1664_v20, %v1585_v11  ;;  %v1826_v12 = vsel %vm1825_vm11, %v1823_v14, %v1824_v47  ;;  %vm3038_vm11 = vcmask 498688  }
 0x497   : > { %v1745_v26 = vsel %vm1744_vm13, %v1742_v30, %v1743_v50  ;;  %v1985_v43 = vpop.permute.xlu1 %1984  ;;  %vm2957_vm13 = vcmask 506880  }
 0x498   : > { %v1747_v18 = vadd.f32 %v1745_v26, %v1666_v19  ;;  %v1904_v46 = vpop.permute.xlu0 %1903  ;;  %v1986_v39 = vrot.slane %v1985_v43, 1 }
 0x499   : > { %v1905_v44 = vrot.slane %v1904_v46, 1 }
 0x49a   : > { %v1828_v4 = vadd.f32 %v1826_v12, %v1747_v18  ;;  %v1988_v41 = vsel %vm1987_vm2, %v1985_v43, %v1986_v39  ;;  %vm3200_vm2 = vcmask 482304  }
 0x49b   : > { %v1907_v62 = vsel %vm1906_vm14, %v1904_v46, %v1905_v44  ;;  %v2147_v21 = vpop.permute.xlu1 %2146  ;;  %vm3119_vm14 = vcmask 490496  }
 0x49c   : > { %v1909_v6 = vadd.f32 %v1907_v62, %v1828_v4  ;;  %v2066_v15 = vpop.permute.xlu0 %2065  ;;  %v2148_v7 = vrot.slane %v2147_v21, 1 }
 0x49d   : > { %v2067_v17 = vrot.slane %v2066_v15, 1 }
 0x49e   : > { %v1990_v24 = vadd.f32 %v1988_v41, %v1909_v6  ;;  %v2150_v2 = vsel %vm2149_vm0, %v2147_v21, %v2148_v7  ;;  %vm3522_vm0 = vcmask 375808  }
 0x49f   : > { %v2069_v3 = vsel %vm2068_vm3, %v2066_v15, %v2067_v17  ;;  %v2309_v28 = vpop.permute.xlu1 %2308  ;;  %vm3441_vm3 = vcmask 384000  }
 0x4a0   : > { %v2071_v54 = vadd.f32 %v2069_v3, %v1990_v24  ;;  %v2228_v23 = vpop.permute.xlu0 %2227  ;;  %v2310_v32 = vrot.slane %v2309_v28, 1 }
 0x4a1   : > { %v2229_v61 = vrot.slane %v2228_v23, 1 }
 0x4a2   : > { %v2152_v40 = vadd.f32 %v2150_v2, %v2071_v54  ;;  %v2312_v45 = vsel %vm2311_vm4, %v2309_v28, %v2310_v32  ;;  %vm3603_vm4 = vcmask 367616  }
 0x4a3   : > { %v2231_v13 = vsel %vm2230_vm7, %v2228_v23, %v2229_v61  ;;  %v2470_v36 = vpop.permute.xlu1 %2469  ;;  %vm2715_vm7 = vcmask 605184  }
 0x4a4   : > { %v2233_v10 = vadd.f32 %v2231_v13, %v2152_v40  ;;  %v2390_v58 = vpop.permute.xlu0 %2389  ;;  %v2471_v35 = vrot.slane %v2470_v36, 1 }
 0x4a5   : > { %v2391_v57 = vrot.slane %v2390_v58, 1 }
 0x4a6   : > { %v2314_v38 = vadd.f32 %v2312_v45, %v2233_v10  ;;  %v2473_v42 = vsel %vm2472_vm6, %v2470_v36, %v2471_v35  ;;  %vm3765_vm6 = vcmask 351232  }
 0x4a7   : > { %v2393_v56 = vsel %vm2392_vm5, %v2390_v58, %v2391_v57  ;;  %v2632_v31 = vpop.permute.xlu1 %2631  ;;  %vm3684_vm5 = vcmask 359424  }
 0x4a8   : > { %v2395_v9 = vadd.f32 %v2393_v56, %v2314_v38  ;;  %v2551_v27 = vpop.permute.xlu0 %2550  ;;  %v2633_v37 = vrot.slane %v2632_v31, 1 }
 0x4a9   : > { %v2552_v33 = vrot.slane %v2551_v27, 1 }
 0x4aa   : > { %v2475_v55 = vadd.f32 %v2473_v42, %v2395_v9  ;;  %v2635_v5 = vsel %vm2634_vm10, %v2632_v31, %v2633_v37  ;;  %vm4087_vm10 = vcmask 244736  }
 0x4ab   : > { %v2554_v60 = vsel %vm2553_vm9, %v2551_v27, %v2552_v33  ;;  %v2794_v51 = vpop.permute.xlu1 %2793  ;;  %vm4006_vm9 = vcmask 252928  }
 0x4ac   : > { %v2556_v34 = vadd.f32 %v2554_v60, %v2475_v55  ;;  %v2713_v1 = vpop.permute.xlu0 %2712  ;;  %v2795_v8 = vrot.slane %v2794_v51, 1 }
 0x4ad   : > { %v2714_v25 = vrot.slane %v2713_v1, 1 }
 0x4ae   : > { %v2637_v52 = vadd.f32 %v2635_v5, %v2556_v34  ;;  %v2796_v49 = vsel %vm2734_vm15, %v2794_v51, %v2795_v8  ;;  %vm3281_vm15 = vcmask 474112  }
 0x4af   : > { %v2716_v53 = vsel %vm2715_vm7, %v2713_v1, %v2714_v25  ;;  %v2955_v59 = vpop.permute.xlu1 %2954  ;;  %vm4168_vm7 = vcmask 236544  }
 0x4b0   : > { %v2718_v16 = vadd.f32 %v2716_v53, %v2637_v52  ;;  %v2874_v22 = vpop.permute.xlu0 %2873  ;;  %v2956_v48 = vrot.slane %v2955_v59, 1 }
 0x4b1   : > { %v2875_v63 = vrot.slane %v2874_v22, 1 }
 0x4b2   : > { %v2798_v14 = vadd.f32 %v2796_v49, %v2718_v16  ;;  %v2958_v47 = vsel %vm2957_vm13, %v2955_v59, %v2956_v48  ;;  %vm4330_vm13 = vcmask 220160  }
 0x4b3   : > { %v2877_v11 = vsel %vm2876_vm12, %v2874_v22, %v2875_v63  ;;  %v3117_v30 = vpop.permute.xlu1 %3116  ;;  %vm4249_vm12 = vcmask 228352  }
 0x4b4   : > { %v2879_v20 = vadd.f32 %v2877_v11, %v2798_v14  ;;  %v3036_v50 = vpop.permute.xlu0 %3035  ;;  %v3118_v26 = vrot.slane %v3117_v30, 1 }
 0x4b5   : > { %v3037_v19 = vrot.slane %v3036_v50, 1 }
 0x4b6   : > { %v2960_v43 = vadd.f32 %v2958_v47, %v2879_v20  ;;  %v3120_v39 = vsel %vm3119_vm14, %v3117_v30, %v3118_v26 }
 0x4b7   : > { %v3039_v18 = vsel %vm3038_vm11, %v3036_v50, %v3037_v19  ;;  %v3279_v46 = vpop.permute.xlu1 %3278 }
 0x4b8   : > { %v3041_v12 = vadd.f32 %v3039_v18, %v2960_v43  ;;  %v3198_v44 = vpop.permute.xlu0 %3197  ;;  %v3280_v62 = vrot.slane %v3279_v46, 1 }
 0x4b9   : > { %v3199_v4 = vrot.slane %v3198_v44, 1 }
 0x4ba   : > { %v3122_v21 = vadd.f32 %v3120_v39, %v3041_v12  ;;  %v3282_v7 = vsel %vm3281_vm15, %v3279_v46, %v3280_v62 }
 0x4bb   : > { %v3201_v6 = vsel %vm3200_vm2, %v3198_v44, %v3199_v4  ;;  %v3439_v15 = vpop.permute.xlu1 %3438 }
 0x4bc   : > { %v3203_v41 = vadd.f32 %v3201_v6, %v3122_v21  ;;  %v3359_v17 = vpop.permute.xlu0 %3358  ;;  %v3440_v3 = vrot.slane %v3439_v15, 1 }
 0x4bd   : > { %v3360_v24 = vrot.slane %v3359_v17, 1 }
 0x4be   : > { %v3284_v28 = vadd.f32 %v3282_v7, %v3203_v41  ;;  %v3442_v32 = vsel %vm3441_vm3, %v3439_v15, %v3440_v3  ;;  %v9415_v7 = vld [vmem:[#allocation118_spill] sm:$0xff]  ;;  %v9416_v3 = vld [vmem:[#allocation119_spill] sm:$0xff] }
 0x4bf   : > { %v3361_v54 = vsel %vm2168_vm8, %v3359_v17, %v3360_v24  ;;  %vm3846_vm8 = vcmask 343040  }
 0x4c0   : > { %v3601_v23 = vpop.permute.xlu1 %3600  ;;  %v3363_v2 = vadd.f32 %v3361_v54, %v3284_v28  ;;  %v9417_v54 = vld [vmem:[#allocation120_spill] sm:$0xff] }
 0x4c1   : > { %v3520_v61 = vpop.permute.xlu0 %3519  ;;  %v3602_v13 = vrot.slane %v3601_v23, 1 }
 0x4c2   : > { %v3521_v40 = vrot.slane %v3520_v61, 1  ;;  %v3444_v36 = vadd.f32 %v3442_v32, %v3363_v2  ;;  %v9418_v2 = vld [vmem:[#allocation121_spill] sm:$0xff]  ;;  %v4750_v32 = vld [vmem:[%s4901_s20] sm:$0xff] }
 0x4c3   : > { %v3604_v35 = vsel %vm3603_vm4, %v3601_v23, %v3602_v13  ;;  %v4751_v13 = vld [vmem:[%s4901_s20 + $0x8] sm:$0xff] }
 0x4c4   : > { %v3523_v10 = vsel %vm3522_vm0, %v3520_v61, %v3521_v40  ;;  %v3763_v58 = vpop.permute.xlu1 %3762 }
 0x4c5   : > { %v3525_v45 = vadd.f32 %v3523_v10, %v3444_v36  ;;  %v3682_v57 = vpop.permute.xlu0 %3681  ;;  %v3764_v56 = vrot.slane %v3763_v58, 1 }
 0x4c6   : > { %v3683_v38 = vrot.slane %v3682_v57, 1 }
 0x4c7   : > { %v3606_v31 = vadd.f32 %v3604_v35, %v3525_v45  ;;  %v3766_v37 = vsel %vm3765_vm6, %v3763_v58, %v3764_v56 }
 0x4c8   : > { %v3685_v9 = vsel %vm3684_vm5, %v3682_v57, %v3683_v38  ;;  %v3924_v27 = vpop.permute.xlu1 %3923 }
 0x4c9   : > { %v3687_v42 = vadd.f32 %v3685_v9, %v3606_v31  ;;  %v3844_v33 = vpop.permute.xlu0 %3843  ;;  %v3925_v60 = vrot.slane %v3924_v27, 1 }
 0x4ca   : > { %v3845_v55 = vrot.slane %v3844_v33, 1 }
 0x4cb   : > { %v3768_v51 = vadd.f32 %v3766_v37, %v3687_v42  ;;  %v3926_v8 = vsel %vm1601_vm1, %v3924_v27, %v3925_v60  ;;  %vm4411_vm1 = vcmask 211968  }
 0x4cc   : > { %v3847_v34 = vsel %vm3846_vm8, %v3844_v33, %v3845_v55  ;;  %v4085_v1 = vpop.permute.xlu1 %4084 }
 0x4cd   : > { %v3849_v5 = vadd.f32 %v3847_v34, %v3768_v51  ;;  %v4004_v25 = vpop.permute.xlu0 %4003  ;;  %v4086_v53 = vrot.slane %v4085_v1, 1 }
 0x4ce   : > { %v4005_v52 = vrot.slane %v4004_v25, 1 }
 0x4cf   : > { %v3928_v59 = vadd.f32 %v3926_v8, %v3849_v5  ;;  %v4088_v48 = vsel %vm4087_vm10, %v4085_v1, %v4086_v53 }
 0x4d0   : > { %v4007_v16 = vsel %vm4006_vm9, %v4004_v25, %v4005_v52  ;;  %v4247_v22 = vpop.permute.xlu1 %4246 }
 0x4d1   : > { %v4009_v49 = vadd.f32 %v4007_v16, %v3928_v59  ;;  %v4166_v63 = vpop.permute.xlu0 %4165  ;;  %v4248_v11 = vrot.slane %v4247_v22, 1 }
 0x4d2   : > { %v4167_v14 = vrot.slane %v4166_v63, 1 }
 0x4d3   : > { %v4090_v30 = vadd.f32 %v4088_v48, %v4009_v49  ;;  %v4250_v26 = vsel %vm4249_vm12, %v4247_v22, %v4248_v11 }
 0x4d4   : > { %v4169_v20 = vsel %vm4168_vm7, %v4166_v63, %v4167_v14  ;;  %v4409_v50 = vpop.permute.xlu1 %4408 }
 0x4d5   : > { %v4171_v47 = vadd.f32 %v4169_v20, %v4090_v30  ;;  %v4328_v19 = vpop.permute.xlu0 %4327  ;;  %v4410_v18 = vrot.slane %v4409_v50, 1 }
 0x4d6   : > { %v4329_v43 = vrot.slane %v4328_v19, 1 }
 0x4d7   : > { %v4252_v46 = vadd.f32 %v4250_v26, %v4171_v47  ;;  %v4412_v39 = vsel %vm4411_vm1, %v4409_v50, %v4410_v18 }
 0x4d8   : > { %v4331_v12 = vsel %vm4330_vm13, %v4328_v19, %v4329_v43 }
 0x4d9   : > { %v4333_v44 = vadd.f32 %v4331_v12, %v4252_v46 }
 0x4db   : > { %v4414_v4 = vadd.f32 %v4412_v39, %v4333_v44 }
 0x4dd   : > { %v4610_v62 = vmul.f32 -1.442695, %v4414_v4 }
 0x4df   : > { %4742 = vpow2.f32 %v4610_v62 }
 0x4e9   : > { %v4743_v21 = vpop.eup %4742 }
 0x4ea   : > { %v4418_v6 = vadd.f32 1.0, %v4743_v21 }
 0x4ec   : > { %4744 = vrcp.f32 %v4418_v6 }
 0x4f6   : > { %v4745_v15 = vpop.eup %4744 }
 0x4f7   : > { %v4425_v41 = vrot.slane %v4745_v15, %v9414_v0  ;;  %v4429_v17 = vrot.slane %v4745_v15, %v9413_v29  ;;  %v4752_v0 = vld [vmem:[%s4901_s20 + $0x10] sm:$0xff]  ;;  %v4753_v29 = vld [vmem:[%s4901_s20 + $0x18] sm:$0xff] }
 0x4f9   : > { %v4432_v24 = vmul.f32 %v4425_v41, %v9415_v7  ;;  %v4433_v28 = vmul.f32 %v4429_v17, %v9416_v3  ;;  %v4434_v23 = vmul.f32 %v4425_v41, %v9417_v54  ;;  %v4435_v61 = vmul.f32 %v4429_v17, %v9418_v2 }
 0x4fb   : > { %v4436_v40 = vadd.f32 %v4750_v32, %v4432_v24  ;;  %v4437_v36 = vadd.f32 %v4751_v13, %v4433_v28  ;;  %v4438_v10 = vadd.f32 %v4752_v0, %v4434_v23  ;;  %v4439_v58 = vadd.f32 %v4753_v29, %v4435_v61 }
 0x4fd   : > { %4440 = vst [vmem:[%s197_s23] sm:$0xff] %v4436_v40  ;;  %4441 = vst [vmem:[%s197_s23 + $0x8] sm:$0xff] %v4437_v36 }
 0x4fe   : > { %4442 = vst [vmem:[%s197_s23 + $0x10] sm:$0xff] %v4438_v10  ;;  %4443 = vst [vmem:[%s197_s23 + $0x18] sm:$0xff] %v4439_v58 }
 0x4ff PF: > { %s14_s15 = sadd.s32 1, %s4760_s15  }
 0x500   : > { %p11_p4 = scmp.ge.s32.totalorder %s14_s15, 4  }
 0x502   :  { %13 = sbr.rel (!%p11_p4) target bundleno = 1 (0x1), region = 164 }

</bundles_post_ra>
